<compile_context>
chip_gen: v5e
topology: v5e:2x2
jax: 0.10.0
libtpu: 0.0.40
codegen_flags: <defaults>
</compile_context>

<pallas_src>
import functools

import jax
import jax.numpy as jnp
import numpy as np
from jax import lax
from jax.experimental import pallas as pl
from jax.experimental.pallas import tpu as pltpu

# Set to jnp.bfloat16 on v6e/v7x for full-rate MXU and half-size scratch.
COMPUTE_DTYPE = jnp.float32


def _round_up(v, m):
    return (v + m - 1) // m * m


def make_rdb_kernel(Cin, G, L, K, NB, Wp, P_pad, margin,
                    block_nch, block_rows, block_rp, cum_rp):
    ph = K // 2
    Ctot = Cin + G * L
    NBP = NB * P_pad
    LW = 2 * margin + NBP                  # total lane width of feat scratch
    taps = [(ky, kx) for ky in range(K) for kx in range(K)]
    block_off = [0]
    for rp in block_rp[:-1]:
        block_off.append(block_off[-1] + rp)

    def fill_block(feat, slab, j, ch_lo):
        """Append slab block j: K*K shifted windows of block_nch[j] feat rows."""
        nch = block_nch[j]
        off0 = block_off[j]
        for t, (ky, kx) in enumerate(taps):
            off = (ky - ph) * Wp + (kx - ph)        # static flat lane offset
            slab[off0 + t * nch: off0 + (t + 1) * nch, :] = feat[
                ch_lo:ch_lo + nch,
                margin + off: margin + off + NBP].astype(slab.dtype)
        pad = block_rp[j] - block_rows[j]
        if pad:  # keep pad rows finite (matching weight columns are zero)
            slab[off0 + block_rows[j]: off0 + block_rp[j], :] = jnp.zeros(
                (pad, NBP), slab.dtype)

    def kernel(*refs):
        x_ref = refs[0]                    # (NB, Cin, P_pad)  host-padded in
        mask_ref = refs[1]                 # (1, NBP) 1.0 on interior pixels
        wb_refs = refs[2:2 + 2 * L]        # per layer: (G, cum_rp[i]), (G, 1)
        wlff_ref = refs[2 + 2 * L]         # (G, Ctot)
        blff_ref = refs[3 + 2 * L]         # (G, 1)
        o_ref = refs[4 + 2 * L]            # (NB, G, P_pad)
        feat = refs[5 + 2 * L]             # VMEM (Ctot, LW) padded features
        slab = refs[6 + 2 * L]             # VMEM (sum(block_rp), NBP) im2col

        # Lane margins must be zero: shifted-window reads extend +-(ph*Wp+ph)
        # lanes past [margin, margin+NBP).  Zeroed every step (cheap:
        # Ctot*2*margin elements) rather than only at program_id==0, so the
        # kernel stays correct if the parallel grid axis is core-sharded
        # (each core owns its own scratch and may never see step 0).
        feat[:, 0:margin] = jnp.zeros((Ctot, margin), feat.dtype)
        feat[:, margin + NBP:LW] = jnp.zeros((Ctot, margin), feat.dtype)

        # Stage host-padded input: one aligned, full-width store per image.
        for b in range(NB):
            feat[0:Cin, margin + b * P_pad: margin + (b + 1) * P_pad] = (
                x_ref[b].astype(feat.dtype))

        mask = mask_ref[...]               # (1, NBP)

        # im2col block 0: shifted windows of the Cin input channels.
        fill_block(feat, slab, 0, 0)

        # ---- Dense layers: one MXU matmul each, incremental slab growth ----
        for i in range(L):
            w_ref = wb_refs[2 * i]         # (G, cum_rp[i])
            b_ref = wb_refs[2 * i + 1]     # (G, 1)
            acc = jnp.dot(w_ref[...], slab[0:cum_rp[i], :],
                          preferred_element_type=jnp.float32)   # (G, NBP)
            # bias + ReLU, then zero the border (conv zero-padding invariant;
            # masking BEFORE the feat write is what keeps later layers'
            # border taps and cross-image lanes reading exact zeros).
            acc = jnp.maximum(acc + b_ref[...], 0.0) * mask
            feat[Cin + i * G: Cin + (i + 1) * G, margin:margin + NBP] = (
                acc.astype(feat.dtype))
            if i < L - 1:
                # Append only the K*K windows of the G new channels.
                fill_block(feat, slab, i + 1, Cin + i * G)

        # ---- LFF 1x1 conv + local residual learning (lrl=True). ----
        all_feat = feat[0:Ctot, margin:margin + NBP]             # (Ctot, NBP)
        lff = jnp.dot(wlff_ref[...], all_feat.astype(wlff_ref.dtype),
                      preferred_element_type=jnp.float32)        # (G, NBP)
        out = lff + blff_ref[...] + all_feat[0:Cin, :].astype(jnp.float32)
        for b in range(NB):
            o_ref[b, :, :] = out[:, b * P_pad:(b + 1) * P_pad].astype(
                o_ref.dtype)

    return kernel


def rdb_pallas(x_nchw, params, K=5, compute_dtype=COMPUTE_DTYPE):
    dense_w = params["dense_w"]   # list of (K, K, Cin + G*i, G)
    dense_b = params["dense_b"]   # list of (1, G)
    wlff = params["lff_w"]        # (Ctot, G)
    blff = params["lff_b"]        # (1, G)

    N, Cin, H, W = x_nchw.shape
    G = dense_w[0].shape[-1]
    L = len(dense_w)
    Ctot = Cin + G * L
    assert Cin == G, "residual add in RDB requires in_channels == growth_rate"

    ph = K // 2
    K2 = K * K
    Hp, Wp = H + 2 * ph, W + 2 * ph
    P_pad = _round_up(Hp * Wp, 128)           # per-image lane segment
    margin = _round_up(ph * Wp + ph, 128)     # room for shifted window reads
    # Correctness invariants of the lane layout (see review notes): shifted
    # windows must stay inside feat, and interior taps must never cross an
    # image segment boundary.
    assert margin >= ph * Wp + ph
    assert P_pad >= Hp * Wp

    comp_size = jnp.dtype(compute_dtype).itemsize
    in_size = jnp.dtype(x_nchw.dtype).itemsize
    SUB = 16 if comp_size == 2 else 8         # sublane tile (bf16 packs x2)

    # Slab blocks: block 0 = input channels, block j>=1 = layer j-1 outputs.
    block_nch = [Cin] + [G] * (L - 1)
    block_rows = [K2 * n for n in block_nch]
    block_rp = [_round_up(r, SUB) for r in block_rows]   # tile-aligned blocks
    cum_rp, s = [], 0
    for rp in block_rp:
        s += rp
        cum_rp.append(s)
    kkc_pad_total = s

    # ---- VMEM accounting (feat margins, slab element size, double-buffered
    # I/O blocks and weights) and NB / vmem_limit selection. ----
    def vmem_bytes(nb):
        nbp = nb * P_pad
        lw = 2 * margin + nbp
        feat_b = Ctot * lw * comp_size
        slab_b = kkc_pad_total * nbp * comp_size
        io_b = 2 * (nb * Cin * P_pad * in_size        # input block (x2 bufs)
                    + nb * G * P_pad * in_size        # output block
                    + nbp * 4)                        # mask
        w_b = 2 * (sum(G * c for c in cum_rp) * comp_size + L * G * 4
                   + G * Ctot * comp_size + G * 4)
        return feat_b + slab_b + io_b + w_b

    try:
        cap = int(pltpu.get_tpu_info().vmem_capacity_bytes)
    except Exception:
        cap = 64 * 1024 * 1024                 # conservative (v7x per-TC)
    budget = cap // 2

    NB = 1
    for cand in range(N, 0, -1):
        if N % cand == 0 and vmem_bytes(cand) <= budget:
            NB = cand
            break
    if N >= 2:
        # Keep >=2 grid steps under dimension_semantics=("parallel",) so both
        # v7x TensorCores get work (negligible cost on single-TC v5e/v6e).
        NB = min(NB, N // 2)
    while N % NB:
        NB -= 1
    NBP = NB * P_pad
    LW = 2 * margin + NBP
    vmem_limit = int(min(int(cap * 0.9),
                         max(2 * vmem_bytes(NB), 32 * 1024 * 1024)))
    # TODO(synk): for large H*W (e.g. 256x256 SR shapes) add a spatial
    # row-strip grid axis with a (K-1)-row halo so feat/slab scale with strip
    # height and fit v7x's 64 MiB VMEM with double-buffered strips.

    # Interior-pixel mask over the NB*P_pad lane axis (built once on host).
    mask_np = np.zeros((P_pad,), np.float32)
    for y in range(ph, ph + H):
        mask_np[y * Wp + ph: y * Wp + ph + W] = 1.0
    mask = jnp.asarray(np.tile(mask_np, NB))[None, :]            # (1, NBP)

    # Host-side padded/flattened input: (N, Cin, P_pad) with zero borders.
    xp = jnp.pad(x_nchw, ((0, 0), (0, 0), (ph, ph), (ph, ph)))
    xp = xp.reshape(N, Cin, Hp * Wp)
    xp = jnp.pad(xp, ((0, 0), (0, 0), (0, P_pad - Hp * Wp)))

    inputs = [xp, mask]
    in_specs = [
        pl.BlockSpec((NB, Cin, P_pad), lambda n: (n, 0, 0)),
        pl.BlockSpec((1, NBP), lambda n: (0, 0)),
    ]
    # Host-side weight re-layout (tiny, one-time): per layer i the (K,K,cin_i,G)
    # conv weight is split into the same channel blocks as the slab, each block
    # flattened tap-major (ky,kx,c) and zero-padded to block_rp[j] columns.
    for i in range(L):
        parts, ch = [], 0
        for j in range(i + 1):
            nch = block_nch[j]
            blk = dense_w[i][:, :, ch:ch + nch, :].reshape(K2 * nch, G)
            blk = jnp.pad(blk, ((0, block_rp[j] - K2 * nch), (0, 0)))
            parts.append(blk)
            ch += nch
        wflat = jnp.concatenate(parts, axis=0).T.astype(compute_dtype)
        bcol = dense_b[i].reshape(G, 1).astype(jnp.float32)
        inputs += [wflat, bcol]
        kkc_i = cum_rp[i]
        in_specs += [
            pl.BlockSpec((G, kkc_i), lambda n: (0, 0)),
            pl.BlockSpec((G, 1), lambda n: (0, 0)),
        ]
    wlff_t = jnp.transpose(wlff).astype(compute_dtype)           # (G, Ctot)
    blff_c = blff.reshape(G, 1).astype(jnp.float32)
    inputs += [wlff_t, blff_c]
    in_specs += [
        pl.BlockSpec((G, Ctot), lambda n: (0, 0)),
        pl.BlockSpec((G, 1), lambda n: (0, 0)),
    ]

    out_spec = pl.BlockSpec((NB, G, P_pad), lambda n: (n, 0, 0))
    kernel = make_rdb_kernel(Cin, G, L, K, NB, Wp, P_pad, margin,
                             block_nch, block_rows, block_rp, cum_rp)

    out_padded = pl.pallas_call(
        kernel,
        out_shape=jax.ShapeDtypeStruct((N, G, P_pad), x_nchw.dtype),
        grid_spec=pltpu.PrefetchScalarGridSpec(
            num_scalar_prefetch=0,
            grid=(N // NB,),
            in_specs=in_specs,
            out_specs=out_spec,
            scratch_shapes=[
                pltpu.VMEM((Ctot, LW), compute_dtype),          # padded feats
                pltpu.VMEM((kkc_pad_total, NBP), compute_dtype),  # im2col slab
            ],
        ),
        compiler_params=pltpu.CompilerParams(
            dimension_semantics=("parallel",),
            vmem_limit_bytes=vmem_limit,
        ),
    )(*inputs)

    # (N, G, P_pad) -> crop padded flattened spatial back to NCHW.
    out = out_padded[:, :, :Hp * Wp].reshape(N, G, Hp, Wp)
    return out[:, :, ph:ph + H, ph:ph + W]


def rdb_reference(x_nchw, params, K=5):
    """Pure-JAX reference (lax.conv) matching the PyTorch forward (lrl=True)."""
    x = jnp.transpose(x_nchw, (0, 2, 3, 1))  # NHWC
    dn = ("NHWC", "HWIO", "NHWC")
    feats = x
    for w, b in zip(params["dense_w"], params["dense_b"]):
        y = lax.conv_general_dilated(
            feats, w, (1, 1), "SAME", dimension_numbers=dn,
            precision=lax.Precision.HIGHEST)
        y = jax.nn.relu(y + b.reshape(1, 1, 1, -1))
        feats = jnp.concatenate([feats, y], axis=-1)
    wl = params["lff_w"].reshape(1, 1, *params["lff_w"].shape)
    z = lax.conv_general_dilated(
        feats, wl, (1, 1), "SAME", dimension_numbers=dn,
        precision=lax.Precision.HIGHEST)
    z = z + params["lff_b"].reshape(1, 1, 1, -1)
    out = x + z
    return jnp.transpose(out, (0, 3, 1, 2))


def make_params(key, Cin, G, L, K):
    Ctot = Cin + G * L
    keys = jax.random.split(key, 2 * L + 2)
    dense_w, dense_b = [], []
    kidx = 0
    for i in range(L):
        ci = Cin + G * i
        w = 0.1 * jax.random.normal(keys[kidx], (K, K, ci, G), jnp.float32)
        kidx += 1
        b = 0.1 * jax.random.normal(keys[kidx], (G,), jnp.float32)
        kidx += 1
        dense_w.append(w)
        dense_b.append(b.reshape(1, G))
    lff_w = 0.1 * jax.random.normal(keys[kidx], (Ctot, G), jnp.float32)
    kidx += 1
    lff_b = 0.1 * jax.random.normal(keys[kidx], (G,), jnp.float32)
    return dict(dense_w=dense_w, dense_b=dense_b,
                lff_w=lff_w, lff_b=lff_b.reshape(1, G))


if __name__ == "__main__":
    # RDB(in_channels=4, growth_rate=4, num_layers=3, kernel_size=5)
    N, Cin, H, W = 2, 4, 16, 16
    G, L, K = 4, 3, 5

    key = jax.random.PRNGKey(0)
    kx, kp = jax.random.split(key)
    x = jax.random.normal(kx, (N, Cin, H, W), jnp.float32)   # NCHW like PyTorch
    params = make_params(kp, Cin, G, L, K)

    rdb_fn = jax.jit(functools.partial(rdb_pallas, K=K))
    out = rdb_fn(x, params)
    jax.block_until_ready(out)

    ref = rdb_reference(x, params, K=K)
    np.testing.assert_allclose(np.asarray(out), np.asarray(ref),
                               rtol=2e-2, atol=2e-2)
    print("KERNEL_OK")
</pallas_src>

<mosaic_0001>
module attributes {stable_mosaic.version = 11 : i64} {
  func.func @kernel(%arg0: i32, %arg1: memref<1x4x512xf32, #tpu.memory_space<vmem>>, %arg2: memref<1x512xf32, #tpu.memory_space<vmem>>, %arg3: memref<4x104xf32, #tpu.memory_space<vmem>>, %arg4: memref<4x1xf32, #tpu.memory_space<vmem>>, %arg5: memref<4x208xf32, #tpu.memory_space<vmem>>, %arg6: memref<4x1xf32, #tpu.memory_space<vmem>>, %arg7: memref<4x312xf32, #tpu.memory_space<vmem>>, %arg8: memref<4x1xf32, #tpu.memory_space<vmem>>, %arg9: memref<4x16xf32, #tpu.memory_space<vmem>>, %arg10: memref<4x1xf32, #tpu.memory_space<vmem>>, %arg11: memref<1x4x512xf32, #tpu.memory_space<vmem>>, %arg12: memref<16x768xf32, #tpu.memory_space<vmem>>, %arg13: memref<312x512xf32, #tpu.memory_space<vmem>>) attributes {dimension_semantics = [#tpu.dimension_semantics<parallel>], iteration_bounds = array<i64: 2>, scalar_prefetch = 0 : i64, scratch_operands = 2 : i64, tpu.core_type = #tpu.core_type<tc>, window_params = [{transform_indices = @transform_0, window_bounds = array<i64: 1, 4, 512>}, {pipeline_mode = #tpu.pipeline_mode<synchronous>, transform_indices = @transform_1, window_bounds = array<i64: 1, 512>}, {pipeline_mode = #tpu.pipeline_mode<synchronous>, transform_indices = @transform_2, window_bounds = array<i64: 4, 104>}, {pipeline_mode = #tpu.pipeline_mode<synchronous>, transform_indices = @transform_3, window_bounds = array<i64: 4, 1>}, {pipeline_mode = #tpu.pipeline_mode<synchronous>, transform_indices = @transform_4, window_bounds = array<i64: 4, 208>}, {pipeline_mode = #tpu.pipeline_mode<synchronous>, transform_indices = @transform_5, window_bounds = array<i64: 4, 1>}, {pipeline_mode = #tpu.pipeline_mode<synchronous>, transform_indices = @transform_6, window_bounds = array<i64: 4, 312>}, {pipeline_mode = #tpu.pipeline_mode<synchronous>, transform_indices = @transform_7, window_bounds = array<i64: 4, 1>}, {pipeline_mode = #tpu.pipeline_mode<synchronous>, transform_indices = @transform_8, window_bounds = array<i64: 4, 16>}, {pipeline_mode = #tpu.pipeline_mode<synchronous>, transform_indices = @transform_9, window_bounds = array<i64: 4, 1>}, {transform_indices = @transform_10, window_bounds = array<i64: 1, 4, 512>}]} {
    %cst = arith.constant 0.000000e+00 : f32
    %0 = vector.broadcast %cst : f32 to vector<16x128xf32>
    %c0 = arith.constant 0 : index
    %c0_0 = arith.constant 0 : index
    %1 = vector.load %arg12[%c0, %c0_0] : memref<16x768xf32, #tpu.memory_space<vmem>>, vector<16x128xf32>
    tpu.vector_store %arg12[%c0, %c0_0], %0 {strides = array<i32>} : memref<16x768xf32, #tpu.memory_space<vmem>>, vector<16x128xf32>,
    %cst_1 = arith.constant 0.000000e+00 : f32
    %2 = vector.broadcast %cst_1 : f32 to vector<16x128xf32>
    %c0_2 = arith.constant 0 : index
    %c640 = arith.constant 640 : index
    %3 = vector.load %arg12[%c0_2, %c640] : memref<16x768xf32, #tpu.memory_space<vmem>>, vector<16x128xf32>
    tpu.vector_store %arg12[%c0_2, %c640], %2 {strides = array<i32>} : memref<16x768xf32, #tpu.memory_space<vmem>>, vector<16x128xf32>,
    %c0_3 = arith.constant 0 : index
    %c0_4 = arith.constant 0 : index
    %c0_5 = arith.constant 0 : index
    %4 = vector.load %arg1[%c0_3, %c0_4, %c0_5] : memref<1x4x512xf32, #tpu.memory_space<vmem>>, vector<1x4x512xf32>
    %5 = vector.shape_cast %4 : vector<1x4x512xf32> to vector<4x512xf32>
    %c0_6 = arith.constant 0 : index
    %c128 = arith.constant 128 : index
    %6 = vector.load %arg12[%c0_6, %c128] : memref<16x768xf32, #tpu.memory_space<vmem>>, vector<4x512xf32>
    tpu.vector_store %arg12[%c0_6, %c128], %5 {strides = array<i32>} : memref<16x768xf32, #tpu.memory_space<vmem>>, vector<4x512xf32>,
    %c0_7 = arith.constant 0 : index
    %c0_8 = arith.constant 0 : index
    %7 = vector.load %arg2[%c0_7, %c0_8] : memref<1x512xf32, #tpu.memory_space<vmem>>, vector<1x512xf32>
    %c0_9 = arith.constant 0 : index
    %c86 = arith.constant 86 : index
    %8 = vector.load %arg12[%c0_9, %c86] : memref<16x768xf32, #tpu.memory_space<vmem>>, vector<4x512xf32>
    %c0_10 = arith.constant 0 : index
    %c0_11 = arith.constant 0 : index
    %9 = vector.load %arg13[%c0_10, %c0_11] : memref<312x512xf32, #tpu.memory_space<vmem>>, vector<4x512xf32>
    tpu.vector_store %arg13[%c0_10, %c0_11], %8 {strides = array<i32>} : memref<312x512xf32, #tpu.memory_space<vmem>>, vector<4x512xf32>,
    %c0_12 = arith.constant 0 : index
    %c87 = arith.constant 87 : index
    %10 = vector.load %arg12[%c0_12, %c87] : memref<16x768xf32, #tpu.memory_space<vmem>>, vector<4x512xf32>
    %c4 = arith.constant 4 : index
    %c0_13 = arith.constant 0 : index
    %11 = vector.load %arg13[%c4, %c0_13] : memref<312x512xf32, #tpu.memory_space<vmem>>, vector<4x512xf32>
    tpu.vector_store %arg13[%c4, %c0_13], %10 {strides = array<i32>} : memref<312x512xf32, #tpu.memory_space<vmem>>, vector<4x512xf32>,
    %c0_14 = arith.constant 0 : index
    %c88 = arith.constant 88 : index
    %12 = vector.load %arg12[%c0_14, %c88] : memref<16x768xf32, #tpu.memory_space<vmem>>, vector<4x512xf32>
    %c8 = arith.constant 8 : index
    %c0_15 = arith.constant 0 : index
    %13 = vector.load %arg13[%c8, %c0_15] : memref<312x512xf32, #tpu.memory_space<vmem>>, vector<4x512xf32>
    tpu.vector_store %arg13[%c8, %c0_15], %12 {strides = array<i32>} : memref<312x512xf32, #tpu.memory_space<vmem>>, vector<4x512xf32>,
    %c0_16 = arith.constant 0 : index
    %c89 = arith.constant 89 : index
    %14 = vector.load %arg12[%c0_16, %c89] : memref<16x768xf32, #tpu.memory_space<vmem>>, vector<4x512xf32>
    %c12 = arith.constant 12 : index
    %c0_17 = arith.constant 0 : index
    %15 = vector.load %arg13[%c12, %c0_17] : memref<312x512xf32, #tpu.memory_space<vmem>>, vector<4x512xf32>
    tpu.vector_store %arg13[%c12, %c0_17], %14 {strides = array<i32>} : memref<312x512xf32, #tpu.memory_space<vmem>>, vector<4x512xf32>,
    %c0_18 = arith.constant 0 : index
    %c90 = arith.constant 90 : index
    %16 = vector.load %arg12[%c0_18, %c90] : memref<16x768xf32, #tpu.memory_space<vmem>>, vector<4x512xf32>
    %c16 = arith.constant 16 : index
    %c0_19 = arith.constant 0 : index
    %17 = vector.load %arg13[%c16, %c0_19] : memref<312x512xf32, #tpu.memory_space<vmem>>, vector<4x512xf32>
    tpu.vector_store %arg13[%c16, %c0_19], %16 {strides = array<i32>} : memref<312x512xf32, #tpu.memory_space<vmem>>, vector<4x512xf32>,
    %c0_20 = arith.constant 0 : index
    %c106 = arith.constant 106 : index
    %18 = vector.load %arg12[%c0_20, %c106] : memref<16x768xf32, #tpu.memory_space<vmem>>, vector<4x512xf32>
    %c20 = arith.constant 20 : index
    %c0_21 = arith.constant 0 : index
    %19 = vector.load %arg13[%c20, %c0_21] : memref<312x512xf32, #tpu.memory_space<vmem>>, vector<4x512xf32>
    tpu.vector_store %arg13[%c20, %c0_21], %18 {strides = array<i32>} : memref<312x512xf32, #tpu.memory_space<vmem>>, vector<4x512xf32>,
    %c0_22 = arith.constant 0 : index
    %c107 = arith.constant 107 : index
    %20 = vector.load %arg12[%c0_22, %c107] : memref<16x768xf32, #tpu.memory_space<vmem>>, vector<4x512xf32>
    %c24 = arith.constant 24 : index
    %c0_23 = arith.constant 0 : index
    %21 = vector.load %arg13[%c24, %c0_23] : memref<312x512xf32, #tpu.memory_space<vmem>>, vector<4x512xf32>
    tpu.vector_store %arg13[%c24, %c0_23], %20 {strides = array<i32>} : memref<312x512xf32, #tpu.memory_space<vmem>>, vector<4x512xf32>,
    %c0_24 = arith.constant 0 : index
    %c108 = arith.constant 108 : index
    %22 = vector.load %arg12[%c0_24, %c108] : memref<16x768xf32, #tpu.memory_space<vmem>>, vector<4x512xf32>
    %c28 = arith.constant 28 : index
    %c0_25 = arith.constant 0 : index
    %23 = vector.load %arg13[%c28, %c0_25] : memref<312x512xf32, #tpu.memory_space<vmem>>, vector<4x512xf32>
    tpu.vector_store %arg13[%c28, %c0_25], %22 {strides = array<i32>} : memref<312x512xf32, #tpu.memory_space<vmem>>, vector<4x512xf32>,
    %c0_26 = arith.constant 0 : index
    %c109 = arith.constant 109 : index
    %24 = vector.load %arg12[%c0_26, %c109] : memref<16x768xf32, #tpu.memory_space<vmem>>, vector<4x512xf32>
    %c32 = arith.constant 32 : index
    %c0_27 = arith.constant 0 : index
    %25 = vector.load %arg13[%c32, %c0_27] : memref<312x512xf32, #tpu.memory_space<vmem>>, vector<4x512xf32>
    tpu.vector_store %arg13[%c32, %c0_27], %24 {strides = array<i32>} : memref<312x512xf32, #tpu.memory_space<vmem>>, vector<4x512xf32>,
    %c0_28 = arith.constant 0 : index
    %c110 = arith.constant 110 : index
    %26 = vector.load %arg12[%c0_28, %c110] : memref<16x768xf32, #tpu.memory_space<vmem>>, vector<4x512xf32>
    %c36 = arith.constant 36 : index
    %c0_29 = arith.constant 0 : index
    %27 = vector.load %arg13[%c36, %c0_29] : memref<312x512xf32, #tpu.memory_space<vmem>>, vector<4x512xf32>
    tpu.vector_store %arg13[%c36, %c0_29], %26 {strides = array<i32>} : memref<312x512xf32, #tpu.memory_space<vmem>>, vector<4x512xf32>,
    %c0_30 = arith.constant 0 : index
    %c126 = arith.constant 126 : index
    %28 = vector.load %arg12[%c0_30, %c126] : memref<16x768xf32, #tpu.memory_space<vmem>>, vector<4x512xf32>
    %c40 = arith.constant 40 : index
    %c0_31 = arith.constant 0 : index
    %29 = vector.load %arg13[%c40, %c0_31] : memref<312x512xf32, #tpu.memory_space<vmem>>, vector<4x512xf32>
    tpu.vector_store %arg13[%c40, %c0_31], %28 {strides = array<i32>} : memref<312x512xf32, #tpu.memory_space<vmem>>, vector<4x512xf32>,
    %c0_32 = arith.constant 0 : index
    %c127 = arith.constant 127 : index
    %30 = vector.load %arg12[%c0_32, %c127] : memref<16x768xf32, #tpu.memory_space<vmem>>, vector<4x512xf32>
    %c44 = arith.constant 44 : index
    %c0_33 = arith.constant 0 : index
    %31 = vector.load %arg13[%c44, %c0_33] : memref<312x512xf32, #tpu.memory_space<vmem>>, vector<4x512xf32>
    tpu.vector_store %arg13[%c44, %c0_33], %30 {strides = array<i32>} : memref<312x512xf32, #tpu.memory_space<vmem>>, vector<4x512xf32>,
    %c0_34 = arith.constant 0 : index
    %c128_35 = arith.constant 128 : index
    %32 = vector.load %arg12[%c0_34, %c128_35] : memref<16x768xf32, #tpu.memory_space<vmem>>, vector<4x512xf32>
    %c48 = arith.constant 48 : index
    %c0_36 = arith.constant 0 : index
    %33 = vector.load %arg13[%c48, %c0_36] : memref<312x512xf32, #tpu.memory_space<vmem>>, vector<4x512xf32>
    tpu.vector_store %arg13[%c48, %c0_36], %32 {strides = array<i32>} : memref<312x512xf32, #tpu.memory_space<vmem>>, vector<4x512xf32>,
    %c0_37 = arith.constant 0 : index
    %c129 = arith.constant 129 : index
    %34 = vector.load %arg12[%c0_37, %c129] : memref<16x768xf32, #tpu.memory_space<vmem>>, vector<4x512xf32>
    %c52 = arith.constant 52 : index
    %c0_38 = arith.constant 0 : index
    %35 = vector.load %arg13[%c52, %c0_38] : memref<312x512xf32, #tpu.memory_space<vmem>>, vector<4x512xf32>
    tpu.vector_store %arg13[%c52, %c0_38], %34 {strides = array<i32>} : memref<312x512xf32, #tpu.memory_space<vmem>>, vector<4x512xf32>,
    %c0_39 = arith.constant 0 : index
    %c130 = arith.constant 130 : index
    %36 = vector.load %arg12[%c0_39, %c130] : memref<16x768xf32, #tpu.memory_space<vmem>>, vector<4x512xf32>
    %c56 = arith.constant 56 : index
    %c0_40 = arith.constant 0 : index
    %37 = vector.load %arg13[%c56, %c0_40] : memref<312x512xf32, #tpu.memory_space<vmem>>, vector<4x512xf32>
    tpu.vector_store %arg13[%c56, %c0_40], %36 {strides = array<i32>} : memref<312x512xf32, #tpu.memory_space<vmem>>, vector<4x512xf32>,
    %c0_41 = arith.constant 0 : index
    %c146 = arith.constant 146 : index
    %38 = vector.load %arg12[%c0_41, %c146] : memref<16x768xf32, #tpu.memory_space<vmem>>, vector<4x512xf32>
    %c60 = arith.constant 60 : index
    %c0_42 = arith.constant 0 : index
    %39 = vector.load %arg13[%c60, %c0_42] : memref<312x512xf32, #tpu.memory_space<vmem>>, vector<4x512xf32>
    tpu.vector_store %arg13[%c60, %c0_42], %38 {strides = array<i32>} : memref<312x512xf32, #tpu.memory_space<vmem>>, vector<4x512xf32>,
    %c0_43 = arith.constant 0 : index
    %c147 = arith.constant 147 : index
    %40 = vector.load %arg12[%c0_43, %c147] : memref<16x768xf32, #tpu.memory_space<vmem>>, vector<4x512xf32>
    %c64 = arith.constant 64 : index
    %c0_44 = arith.constant 0 : index
    %41 = vector.load %arg13[%c64, %c0_44] : memref<312x512xf32, #tpu.memory_space<vmem>>, vector<4x512xf32>
    tpu.vector_store %arg13[%c64, %c0_44], %40 {strides = array<i32>} : memref<312x512xf32, #tpu.memory_space<vmem>>, vector<4x512xf32>,
    %c0_45 = arith.constant 0 : index
    %c148 = arith.constant 148 : index
    %42 = vector.load %arg12[%c0_45, %c148] : memref<16x768xf32, #tpu.memory_space<vmem>>, vector<4x512xf32>
    %c68 = arith.constant 68 : index
    %c0_46 = arith.constant 0 : index
    %43 = vector.load %arg13[%c68, %c0_46] : memref<312x512xf32, #tpu.memory_space<vmem>>, vector<4x512xf32>
    tpu.vector_store %arg13[%c68, %c0_46], %42 {strides = array<i32>} : memref<312x512xf32, #tpu.memory_space<vmem>>, vector<4x512xf32>,
    %c0_47 = arith.constant 0 : index
    %c149 = arith.constant 149 : index
    %44 = vector.load %arg12[%c0_47, %c149] : memref<16x768xf32, #tpu.memory_space<vmem>>, vector<4x512xf32>
    %c72 = arith.constant 72 : index
    %c0_48 = arith.constant 0 : index
    %45 = vector.load %arg13[%c72, %c0_48] : memref<312x512xf32, #tpu.memory_space<vmem>>, vector<4x512xf32>
    tpu.vector_store %arg13[%c72, %c0_48], %44 {strides = array<i32>} : memref<312x512xf32, #tpu.memory_space<vmem>>, vector<4x512xf32>,
    %c0_49 = arith.constant 0 : index
    %c150 = arith.constant 150 : index
    %46 = vector.load %arg12[%c0_49, %c150] : memref<16x768xf32, #tpu.memory_space<vmem>>, vector<4x512xf32>
    %c76 = arith.constant 76 : index
    %c0_50 = arith.constant 0 : index
    %47 = vector.load %arg13[%c76, %c0_50] : memref<312x512xf32, #tpu.memory_space<vmem>>, vector<4x512xf32>
    tpu.vector_store %arg13[%c76, %c0_50], %46 {strides = array<i32>} : memref<312x512xf32, #tpu.memory_space<vmem>>, vector<4x512xf32>,
    %c0_51 = arith.constant 0 : index
    %c166 = arith.constant 166 : index
    %48 = vector.load %arg12[%c0_51, %c166] : memref<16x768xf32, #tpu.memory_space<vmem>>, vector<4x512xf32>
    %c80 = arith.constant 80 : index
    %c0_52 = arith.constant 0 : index
    %49 = vector.load %arg13[%c80, %c0_52] : memref<312x512xf32, #tpu.memory_space<vmem>>, vector<4x512xf32>
    tpu.vector_store %arg13[%c80, %c0_52], %48 {strides = array<i32>} : memref<312x512xf32, #tpu.memory_space<vmem>>, vector<4x512xf32>,
    %c0_53 = arith.constant 0 : index
    %c167 = arith.constant 167 : index
    %50 = vector.load %arg12[%c0_53, %c167] : memref<16x768xf32, #tpu.memory_space<vmem>>, vector<4x512xf32>
    %c84 = arith.constant 84 : index
    %c0_54 = arith.constant 0 : index
    %51 = vector.load %arg13[%c84, %c0_54] : memref<312x512xf32, #tpu.memory_space<vmem>>, vector<4x512xf32>
    tpu.vector_store %arg13[%c84, %c0_54], %50 {strides = array<i32>} : memref<312x512xf32, #tpu.memory_space<vmem>>, vector<4x512xf32>,
    %c0_55 = arith.constant 0 : index
    %c168 = arith.constant 168 : index
    %52 = vector.load %arg12[%c0_55, %c168] : memref<16x768xf32, #tpu.memory_space<vmem>>, vector<4x512xf32>
    %c88_56 = arith.constant 88 : index
    %c0_57 = arith.constant 0 : index
    %53 = vector.load %arg13[%c88_56, %c0_57] : memref<312x512xf32, #tpu.memory_space<vmem>>, vector<4x512xf32>
    tpu.vector_store %arg13[%c88_56, %c0_57], %52 {strides = array<i32>} : memref<312x512xf32, #tpu.memory_space<vmem>>, vector<4x512xf32>,
    %c0_58 = arith.constant 0 : index
    %c169 = arith.constant 169 : index
    %54 = vector.load %arg12[%c0_58, %c169] : memref<16x768xf32, #tpu.memory_space<vmem>>, vector<4x512xf32>
    %c92 = arith.constant 92 : index
    %c0_59 = arith.constant 0 : index
    %55 = vector.load %arg13[%c92, %c0_59] : memref<312x512xf32, #tpu.memory_space<vmem>>, vector<4x512xf32>
    tpu.vector_store %arg13[%c92, %c0_59], %54 {strides = array<i32>} : memref<312x512xf32, #tpu.memory_space<vmem>>, vector<4x512xf32>,
    %c0_60 = arith.constant 0 : index
    %c170 = arith.constant 170 : index
    %56 = vector.load %arg12[%c0_60, %c170] : memref<16x768xf32, #tpu.memory_space<vmem>>, vector<4x512xf32>
    %c96 = arith.constant 96 : index
    %c0_61 = arith.constant 0 : index
    %57 = vector.load %arg13[%c96, %c0_61] : memref<312x512xf32, #tpu.memory_space<vmem>>, vector<4x512xf32>
    tpu.vector_store %arg13[%c96, %c0_61], %56 {strides = array<i32>} : memref<312x512xf32, #tpu.memory_space<vmem>>, vector<4x512xf32>,
    %cst_62 = arith.constant 0.000000e+00 : f32
    %58 = vector.broadcast %cst_62 : f32 to vector<4x512xf32>
    %c100 = arith.constant 100 : index
    %c0_63 = arith.constant 0 : index
    %59 = vector.load %arg13[%c100, %c0_63] : memref<312x512xf32, #tpu.memory_space<vmem>>, vector<4x512xf32>
    tpu.vector_store %arg13[%c100, %c0_63], %58 {strides = array<i32>} : memref<312x512xf32, #tpu.memory_space<vmem>>, vector<4x512xf32>,
    %c0_64 = arith.constant 0 : index
    %c0_65 = arith.constant 0 : index
    %60 = vector.load %arg3[%c0_64, %c0_65] : memref<4x104xf32, #tpu.memory_space<vmem>>, vector<4x104xf32>
    %c0_66 = arith.constant 0 : index
    %c0_67 = arith.constant 0 : index
    %61 = vector.load %arg13[%c0_66, %c0_67] : memref<312x512xf32, #tpu.memory_space<vmem>>, vector<104x512xf32>
    %cst_68 = arith.constant dense<0.000000e+00> : vector<4x512xf32>
    %62 = tpu.matmul %60, %61, %cst_68 {dimension_numbers = #tpu.dot_dimension_numbers<[1], [0], [0], [1], [0, 0, 1, 1], [], []>} : vector<4x104xf32>, vector<104x512xf32>, vector<4x512xf32> -> vector<4x512xf32>
    %c0_69 = arith.constant 0 : index
    %c0_70 = arith.constant 0 : index
    %63 = vector.load %arg4[%c0_69, %c0_70] : memref<4x1xf32, #tpu.memory_space<vmem>>, vector<4x1xf32>
    %64 = vector.broadcast %63 : vector<4x1xf32> to vector<4x512xf32>
    %65 = arith.addf %62, %64 : vector<4x512xf32>
    %cst_71 = arith.constant 0.000000e+00 : f32
    %66 = vector.broadcast %cst_71 : f32 to vector<4x512xf32>
    %67 = arith.maximumf %65, %66 : vector<4x512xf32>
    %68 = vector.broadcast %7 : vector<1x512xf32> to vector<4x512xf32>
    %69 = arith.mulf %67, %68 : vector<4x512xf32>
    %c4_72 = arith.constant 4 : index
    %c128_73 = arith.constant 128 : index
    %70 = vector.load %arg12[%c4_72, %c128_73] : memref<16x768xf32, #tpu.memory_space<vmem>>, vector<4x512xf32>
    tpu.vector_store %arg12[%c4_72, %c128_73], %69 {strides = array<i32>} : memref<16x768xf32, #tpu.memory_space<vmem>>, vector<4x512xf32>,
    %c4_74 = arith.constant 4 : index
    %c86_75 = arith.constant 86 : index
    %71 = vector.load %arg12[%c4_74, %c86_75] : memref<16x768xf32, #tpu.memory_space<vmem>>, vector<4x512xf32>
    %c104 = arith.constant 104 : index
    %c0_76 = arith.constant 0 : index
    %72 = vector.load %arg13[%c104, %c0_76] : memref<312x512xf32, #tpu.memory_space<vmem>>, vector<4x512xf32>
    tpu.vector_store %arg13[%c104, %c0_76], %71 {strides = array<i32>} : memref<312x512xf32, #tpu.memory_space<vmem>>, vector<4x512xf32>,
    %c4_77 = arith.constant 4 : index
    %c87_78 = arith.constant 87 : index
    %73 = vector.load %arg12[%c4_77, %c87_78] : memref<16x768xf32, #tpu.memory_space<vmem>>, vector<4x512xf32>
    %c108_79 = arith.constant 108 : index
    %c0_80 = arith.constant 0 : index
    %74 = vector.load %arg13[%c108_79, %c0_80] : memref<312x512xf32, #tpu.memory_space<vmem>>, vector<4x512xf32>
    tpu.vector_store %arg13[%c108_79, %c0_80], %73 {strides = array<i32>} : memref<312x512xf32, #tpu.memory_space<vmem>>, vector<4x512xf32>,
    %c4_81 = arith.constant 4 : index
    %c88_82 = arith.constant 88 : index
    %75 = vector.load %arg12[%c4_81, %c88_82] : memref<16x768xf32, #tpu.memory_space<vmem>>, vector<4x512xf32>
    %c112 = arith.constant 112 : index
    %c0_83 = arith.constant 0 : index
    %76 = vector.load %arg13[%c112, %c0_83] : memref<312x512xf32, #tpu.memory_space<vmem>>, vector<4x512xf32>
    tpu.vector_store %arg13[%c112, %c0_83], %75 {strides = array<i32>} : memref<312x512xf32, #tpu.memory_space<vmem>>, vector<4x512xf32>,
    %c4_84 = arith.constant 4 : index
    %c89_85 = arith.constant 89 : index
    %77 = vector.load %arg12[%c4_84, %c89_85] : memref<16x768xf32, #tpu.memory_space<vmem>>, vector<4x512xf32>
    %c116 = arith.constant 116 : index
    %c0_86 = arith.constant 0 : index
    %78 = vector.load %arg13[%c116, %c0_86] : memref<312x512xf32, #tpu.memory_space<vmem>>, vector<4x512xf32>
    tpu.vector_store %arg13[%c116, %c0_86], %77 {strides = array<i32>} : memref<312x512xf32, #tpu.memory_space<vmem>>, vector<4x512xf32>,
    %c4_87 = arith.constant 4 : index
    %c90_88 = arith.constant 90 : index
    %79 = vector.load %arg12[%c4_87, %c90_88] : memref<16x768xf32, #tpu.memory_space<vmem>>, vector<4x512xf32>
    %c120 = arith.constant 120 : index
    %c0_89 = arith.constant 0 : index
    %80 = vector.load %arg13[%c120, %c0_89] : memref<312x512xf32, #tpu.memory_space<vmem>>, vector<4x512xf32>
    tpu.vector_store %arg13[%c120, %c0_89], %79 {strides = array<i32>} : memref<312x512xf32, #tpu.memory_space<vmem>>, vector<4x512xf32>,
    %c4_90 = arith.constant 4 : index
    %c106_91 = arith.constant 106 : index
    %81 = vector.load %arg12[%c4_90, %c106_91] : memref<16x768xf32, #tpu.memory_space<vmem>>, vector<4x512xf32>
    %c124 = arith.constant 124 : index
    %c0_92 = arith.constant 0 : index
    %82 = vector.load %arg13[%c124, %c0_92] : memref<312x512xf32, #tpu.memory_space<vmem>>, vector<4x512xf32>
    tpu.vector_store %arg13[%c124, %c0_92], %81 {strides = array<i32>} : memref<312x512xf32, #tpu.memory_space<vmem>>, vector<4x512xf32>,
    %c4_93 = arith.constant 4 : index
    %c107_94 = arith.constant 107 : index
    %83 = vector.load %arg12[%c4_93, %c107_94] : memref<16x768xf32, #tpu.memory_space<vmem>>, vector<4x512xf32>
    %c128_95 = arith.constant 128 : index
    %c0_96 = arith.constant 0 : index
    %84 = vector.load %arg13[%c128_95, %c0_96] : memref<312x512xf32, #tpu.memory_space<vmem>>, vector<4x512xf32>
    tpu.vector_store %arg13[%c128_95, %c0_96], %83 {strides = array<i32>} : memref<312x512xf32, #tpu.memory_space<vmem>>, vector<4x512xf32>,
    %c4_97 = arith.constant 4 : index
    %c108_98 = arith.constant 108 : index
    %85 = vector.load %arg12[%c4_97, %c108_98] : memref<16x768xf32, #tpu.memory_space<vmem>>, vector<4x512xf32>
    %c132 = arith.constant 132 : index
    %c0_99 = arith.constant 0 : index
    %86 = vector.load %arg13[%c132, %c0_99] : memref<312x512xf32, #tpu.memory_space<vmem>>, vector<4x512xf32>
    tpu.vector_store %arg13[%c132, %c0_99], %85 {strides = array<i32>} : memref<312x512xf32, #tpu.memory_space<vmem>>, vector<4x512xf32>,
    %c4_100 = arith.constant 4 : index
    %c109_101 = arith.constant 109 : index
    %87 = vector.load %arg12[%c4_100, %c109_101] : memref<16x768xf32, #tpu.memory_space<vmem>>, vector<4x512xf32>
    %c136 = arith.constant 136 : index
    %c0_102 = arith.constant 0 : index
    %88 = vector.load %arg13[%c136, %c0_102] : memref<312x512xf32, #tpu.memory_space<vmem>>, vector<4x512xf32>
    tpu.vector_store %arg13[%c136, %c0_102], %87 {strides = array<i32>} : memref<312x512xf32, #tpu.memory_space<vmem>>, vector<4x512xf32>,
    %c4_103 = arith.constant 4 : index
    %c110_104 = arith.constant 110 : index
    %89 = vector.load %arg12[%c4_103, %c110_104] : memref<16x768xf32, #tpu.memory_space<vmem>>, vector<4x512xf32>
    %c140 = arith.constant 140 : index
    %c0_105 = arith.constant 0 : index
    %90 = vector.load %arg13[%c140, %c0_105] : memref<312x512xf32, #tpu.memory_space<vmem>>, vector<4x512xf32>
    tpu.vector_store %arg13[%c140, %c0_105], %89 {strides = array<i32>} : memref<312x512xf32, #tpu.memory_space<vmem>>, vector<4x512xf32>,
    %c4_106 = arith.constant 4 : index
    %c126_107 = arith.constant 126 : index
    %91 = vector.load %arg12[%c4_106, %c126_107] : memref<16x768xf32, #tpu.memory_space<vmem>>, vector<4x512xf32>
    %c144 = arith.constant 144 : index
    %c0_108 = arith.constant 0 : index
    %92 = vector.load %arg13[%c144, %c0_108] : memref<312x512xf32, #tpu.memory_space<vmem>>, vector<4x512xf32>
    tpu.vector_store %arg13[%c144, %c0_108], %91 {strides = array<i32>} : memref<312x512xf32, #tpu.memory_space<vmem>>, vector<4x512xf32>,
    %c4_109 = arith.constant 4 : index
    %c127_110 = arith.constant 127 : index
    %93 = vector.load %arg12[%c4_109, %c127_110] : memref<16x768xf32, #tpu.memory_space<vmem>>, vector<4x512xf32>
    %c148_111 = arith.constant 148 : index
    %c0_112 = arith.constant 0 : index
    %94 = vector.load %arg13[%c148_111, %c0_112] : memref<312x512xf32, #tpu.memory_space<vmem>>, vector<4x512xf32>
    tpu.vector_store %arg13[%c148_111, %c0_112], %93 {strides = array<i32>} : memref<312x512xf32, #tpu.memory_space<vmem>>, vector<4x512xf32>,
    %c4_113 = arith.constant 4 : index
    %c128_114 = arith.constant 128 : index
    %95 = vector.load %arg12[%c4_113, %c128_114] : memref<16x768xf32, #tpu.memory_space<vmem>>, vector<4x512xf32>
    %c152 = arith.constant 152 : index
    %c0_115 = arith.constant 0 : index
    %96 = vector.load %arg13[%c152, %c0_115] : memref<312x512xf32, #tpu.memory_space<vmem>>, vector<4x512xf32>
    tpu.vector_store %arg13[%c152, %c0_115], %95 {strides = array<i32>} : memref<312x512xf32, #tpu.memory_space<vmem>>, vector<4x512xf32>,
    %c4_116 = arith.constant 4 : index
    %c129_117 = arith.constant 129 : index
    %97 = vector.load %arg12[%c4_116, %c129_117] : memref<16x768xf32, #tpu.memory_space<vmem>>, vector<4x512xf32>
    %c156 = arith.constant 156 : index
    %c0_118 = arith.constant 0 : index
    %98 = vector.load %arg13[%c156, %c0_118] : memref<312x512xf32, #tpu.memory_space<vmem>>, vector<4x512xf32>
    tpu.vector_store %arg13[%c156, %c0_118], %97 {strides = array<i32>} : memref<312x512xf32, #tpu.memory_space<vmem>>, vector<4x512xf32>,
    %c4_119 = arith.constant 4 : index
    %c130_120 = arith.constant 130 : index
    %99 = vector.load %arg12[%c4_119, %c130_120] : memref<16x768xf32, #tpu.memory_space<vmem>>, vector<4x512xf32>
    %c160 = arith.constant 160 : index
    %c0_121 = arith.constant 0 : index
    %100 = vector.load %arg13[%c160, %c0_121] : memref<312x512xf32, #tpu.memory_space<vmem>>, vector<4x512xf32>
    tpu.vector_store %arg13[%c160, %c0_121], %99 {strides = array<i32>} : memref<312x512xf32, #tpu.memory_space<vmem>>, vector<4x512xf32>,
    %c4_122 = arith.constant 4 : index
    %c146_123 = arith.constant 146 : index
    %101 = vector.load %arg12[%c4_122, %c146_123] : memref<16x768xf32, #tpu.memory_space<vmem>>, vector<4x512xf32>
    %c164 = arith.constant 164 : index
    %c0_124 = arith.constant 0 : index
    %102 = vector.load %arg13[%c164, %c0_124] : memref<312x512xf32, #tpu.memory_space<vmem>>, vector<4x512xf32>
    tpu.vector_store %arg13[%c164, %c0_124], %101 {strides = array<i32>} : memref<312x512xf32, #tpu.memory_space<vmem>>, vector<4x512xf32>,
    %c4_125 = arith.constant 4 : index
    %c147_126 = arith.constant 147 : index
    %103 = vector.load %arg12[%c4_125, %c147_126] : memref<16x768xf32, #tpu.memory_space<vmem>>, vector<4x512xf32>
    %c168_127 = arith.constant 168 : index
    %c0_128 = arith.constant 0 : index
    %104 = vector.load %arg13[%c168_127, %c0_128] : memref<312x512xf32, #tpu.memory_space<vmem>>, vector<4x512xf32>
    tpu.vector_store %arg13[%c168_127, %c0_128], %103 {strides = array<i32>} : memref<312x512xf32, #tpu.memory_space<vmem>>, vector<4x512xf32>,
    %c4_129 = arith.constant 4 : index
    %c148_130 = arith.constant 148 : index
    %105 = vector.load %arg12[%c4_129, %c148_130] : memref<16x768xf32, #tpu.memory_space<vmem>>, vector<4x512xf32>
    %c172 = arith.constant 172 : index
    %c0_131 = arith.constant 0 : index
    %106 = vector.load %arg13[%c172, %c0_131] : memref<312x512xf32, #tpu.memory_space<vmem>>, vector<4x512xf32>
    tpu.vector_store %arg13[%c172, %c0_131], %105 {strides = array<i32>} : memref<312x512xf32, #tpu.memory_space<vmem>>, vector<4x512xf32>,
    %c4_132 = arith.constant 4 : index
    %c149_133 = arith.constant 149 : index
    %107 = vector.load %arg12[%c4_132, %c149_133] : memref<16x768xf32, #tpu.memory_space<vmem>>, vector<4x512xf32>
    %c176 = arith.constant 176 : index
    %c0_134 = arith.constant 0 : index
    %108 = vector.load %arg13[%c176, %c0_134] : memref<312x512xf32, #tpu.memory_space<vmem>>, vector<4x512xf32>
    tpu.vector_store %arg13[%c176, %c0_134], %107 {strides = array<i32>} : memref<312x512xf32, #tpu.memory_space<vmem>>, vector<4x512xf32>,
    %c4_135 = arith.constant 4 : index
    %c150_136 = arith.constant 150 : index
    %109 = vector.load %arg12[%c4_135, %c150_136] : memref<16x768xf32, #tpu.memory_space<vmem>>, vector<4x512xf32>
    %c180 = arith.constant 180 : index
    %c0_137 = arith.constant 0 : index
    %110 = vector.load %arg13[%c180, %c0_137] : memref<312x512xf32, #tpu.memory_space<vmem>>, vector<4x512xf32>
    tpu.vector_store %arg13[%c180, %c0_137], %109 {strides = array<i32>} : memref<312x512xf32, #tpu.memory_space<vmem>>, vector<4x512xf32>,
    %c4_138 = arith.constant 4 : index
    %c166_139 = arith.constant 166 : index
    %111 = vector.load %arg12[%c4_138, %c166_139] : memref<16x768xf32, #tpu.memory_space<vmem>>, vector<4x512xf32>
    %c184 = arith.constant 184 : index
    %c0_140 = arith.constant 0 : index
    %112 = vector.load %arg13[%c184, %c0_140] : memref<312x512xf32, #tpu.memory_space<vmem>>, vector<4x512xf32>
    tpu.vector_store %arg13[%c184, %c0_140], %111 {strides = array<i32>} : memref<312x512xf32, #tpu.memory_space<vmem>>, vector<4x512xf32>,
    %c4_141 = arith.constant 4 : index
    %c167_142 = arith.constant 167 : index
    %113 = vector.load %arg12[%c4_141, %c167_142] : memref<16x768xf32, #tpu.memory_space<vmem>>, vector<4x512xf32>
    %c188 = arith.constant 188 : index
    %c0_143 = arith.constant 0 : index
    %114 = vector.load %arg13[%c188, %c0_143] : memref<312x512xf32, #tpu.memory_space<vmem>>, vector<4x512xf32>
    tpu.vector_store %arg13[%c188, %c0_143], %113 {strides = array<i32>} : memref<312x512xf32, #tpu.memory_space<vmem>>, vector<4x512xf32>,
    %c4_144 = arith.constant 4 : index
    %c168_145 = arith.constant 168 : index
    %115 = vector.load %arg12[%c4_144, %c168_145] : memref<16x768xf32, #tpu.memory_space<vmem>>, vector<4x512xf32>
    %c192 = arith.constant 192 : index
    %c0_146 = arith.constant 0 : index
    %116 = vector.load %arg13[%c192, %c0_146] : memref<312x512xf32, #tpu.memory_space<vmem>>, vector<4x512xf32>
    tpu.vector_store %arg13[%c192, %c0_146], %115 {strides = array<i32>} : memref<312x512xf32, #tpu.memory_space<vmem>>, vector<4x512xf32>,
    %c4_147 = arith.constant 4 : index
    %c169_148 = arith.constant 169 : index
    %117 = vector.load %arg12[%c4_147, %c169_148] : memref<16x768xf32, #tpu.memory_space<vmem>>, vector<4x512xf32>
    %c196 = arith.constant 196 : index
    %c0_149 = arith.constant 0 : index
    %118 = vector.load %arg13[%c196, %c0_149] : memref<312x512xf32, #tpu.memory_space<vmem>>, vector<4x512xf32>
    tpu.vector_store %arg13[%c196, %c0_149], %117 {strides = array<i32>} : memref<312x512xf32, #tpu.memory_space<vmem>>, vector<4x512xf32>,
    %c4_150 = arith.constant 4 : index
    %c170_151 = arith.constant 170 : index
    %119 = vector.load %arg12[%c4_150, %c170_151] : memref<16x768xf32, #tpu.memory_space<vmem>>, vector<4x512xf32>
    %c200 = arith.constant 200 : index
    %c0_152 = arith.constant 0 : index
    %120 = vector.load %arg13[%c200, %c0_152] : memref<312x512xf32, #tpu.memory_space<vmem>>, vector<4x512xf32>
    tpu.vector_store %arg13[%c200, %c0_152], %119 {strides = array<i32>} : memref<312x512xf32, #tpu.memory_space<vmem>>, vector<4x512xf32>,
    %cst_153 = arith.constant 0.000000e+00 : f32
    %121 = vector.broadcast %cst_153 : f32 to vector<4x512xf32>
    %c204 = arith.constant 204 : index
    %c0_154 = arith.constant 0 : index
    %122 = vector.load %arg13[%c204, %c0_154] : memref<312x512xf32, #tpu.memory_space<vmem>>, vector<4x512xf32>
    tpu.vector_store %arg13[%c204, %c0_154], %121 {strides = array<i32>} : memref<312x512xf32, #tpu.memory_space<vmem>>, vector<4x512xf32>,
    %c0_155 = arith.constant 0 : index
    %c0_156 = arith.constant 0 : index
    %123 = vector.load %arg5[%c0_155, %c0_156] : memref<4x208xf32, #tpu.memory_space<vmem>>, vector<4x208xf32>
    %c0_157 = arith.constant 0 : index
    %c0_158 = arith.constant 0 : index
    %124 = vector.load %arg13[%c0_157, %c0_158] : memref<312x512xf32, #tpu.memory_space<vmem>>, vector<208x512xf32>
    %cst_159 = arith.constant dense<0.000000e+00> : vector<4x512xf32>
    %125 = tpu.matmul %123, %124, %cst_159 {dimension_numbers = #tpu.dot_dimension_numbers<[1], [0], [0], [1], [0, 0, 1, 1], [], []>} : vector<4x208xf32>, vector<208x512xf32>, vector<4x512xf32> -> vector<4x512xf32>
    %c0_160 = arith.constant 0 : index
    %c0_161 = arith.constant 0 : index
    %126 = vector.load %arg6[%c0_160, %c0_161] : memref<4x1xf32, #tpu.memory_space<vmem>>, vector<4x1xf32>
    %127 = vector.broadcast %126 : vector<4x1xf32> to vector<4x512xf32>
    %128 = arith.addf %125, %127 : vector<4x512xf32>
    %cst_162 = arith.constant 0.000000e+00 : f32
    %129 = vector.broadcast %cst_162 : f32 to vector<4x512xf32>
    %130 = arith.maximumf %128, %129 : vector<4x512xf32>
    %131 = vector.broadcast %7 : vector<1x512xf32> to vector<4x512xf32>
    %132 = arith.mulf %130, %131 : vector<4x512xf32>
    %c8_163 = arith.constant 8 : index
    %c128_164 = arith.constant 128 : index
    %133 = vector.load %arg12[%c8_163, %c128_164] : memref<16x768xf32, #tpu.memory_space<vmem>>, vector<4x512xf32>
    tpu.vector_store %arg12[%c8_163, %c128_164], %132 {strides = array<i32>} : memref<16x768xf32, #tpu.memory_space<vmem>>, vector<4x512xf32>,
    %c8_165 = arith.constant 8 : index
    %c86_166 = arith.constant 86 : index
    %134 = vector.load %arg12[%c8_165, %c86_166] : memref<16x768xf32, #tpu.memory_space<vmem>>, vector<4x512xf32>
    %c208 = arith.constant 208 : index
    %c0_167 = arith.constant 0 : index
    %135 = vector.load %arg13[%c208, %c0_167] : memref<312x512xf32, #tpu.memory_space<vmem>>, vector<4x512xf32>
    tpu.vector_store %arg13[%c208, %c0_167], %134 {strides = array<i32>} : memref<312x512xf32, #tpu.memory_space<vmem>>, vector<4x512xf32>,
    %c8_168 = arith.constant 8 : index
    %c87_169 = arith.constant 87 : index
    %136 = vector.load %arg12[%c8_168, %c87_169] : memref<16x768xf32, #tpu.memory_space<vmem>>, vector<4x512xf32>
    %c212 = arith.constant 212 : index
    %c0_170 = arith.constant 0 : index
    %137 = vector.load %arg13[%c212, %c0_170] : memref<312x512xf32, #tpu.memory_space<vmem>>, vector<4x512xf32>
    tpu.vector_store %arg13[%c212, %c0_170], %136 {strides = array<i32>} : memref<312x512xf32, #tpu.memory_space<vmem>>, vector<4x512xf32>,
    %c8_171 = arith.constant 8 : index
    %c88_172 = arith.constant 88 : index
    %138 = vector.load %arg12[%c8_171, %c88_172] : memref<16x768xf32, #tpu.memory_space<vmem>>, vector<4x512xf32>
    %c216 = arith.constant 216 : index
    %c0_173 = arith.constant 0 : index
    %139 = vector.load %arg13[%c216, %c0_173] : memref<312x512xf32, #tpu.memory_space<vmem>>, vector<4x512xf32>
    tpu.vector_store %arg13[%c216, %c0_173], %138 {strides = array<i32>} : memref<312x512xf32, #tpu.memory_space<vmem>>, vector<4x512xf32>,
    %c8_174 = arith.constant 8 : index
    %c89_175 = arith.constant 89 : index
    %140 = vector.load %arg12[%c8_174, %c89_175] : memref<16x768xf32, #tpu.memory_space<vmem>>, vector<4x512xf32>
    %c220 = arith.constant 220 : index
    %c0_176 = arith.constant 0 : index
    %141 = vector.load %arg13[%c220, %c0_176] : memref<312x512xf32, #tpu.memory_space<vmem>>, vector<4x512xf32>
    tpu.vector_store %arg13[%c220, %c0_176], %140 {strides = array<i32>} : memref<312x512xf32, #tpu.memory_space<vmem>>, vector<4x512xf32>,
    %c8_177 = arith.constant 8 : index
    %c90_178 = arith.constant 90 : index
    %142 = vector.load %arg12[%c8_177, %c90_178] : memref<16x768xf32, #tpu.memory_space<vmem>>, vector<4x512xf32>
    %c224 = arith.constant 224 : index
    %c0_179 = arith.constant 0 : index
    %143 = vector.load %arg13[%c224, %c0_179] : memref<312x512xf32, #tpu.memory_space<vmem>>, vector<4x512xf32>
    tpu.vector_store %arg13[%c224, %c0_179], %142 {strides = array<i32>} : memref<312x512xf32, #tpu.memory_space<vmem>>, vector<4x512xf32>,
    %c8_180 = arith.constant 8 : index
    %c106_181 = arith.constant 106 : index
    %144 = vector.load %arg12[%c8_180, %c106_181] : memref<16x768xf32, #tpu.memory_space<vmem>>, vector<4x512xf32>
    %c228 = arith.constant 228 : index
    %c0_182 = arith.constant 0 : index
    %145 = vector.load %arg13[%c228, %c0_182] : memref<312x512xf32, #tpu.memory_space<vmem>>, vector<4x512xf32>
    tpu.vector_store %arg13[%c228, %c0_182], %144 {strides = array<i32>} : memref<312x512xf32, #tpu.memory_space<vmem>>, vector<4x512xf32>,
    %c8_183 = arith.constant 8 : index
    %c107_184 = arith.constant 107 : index
    %146 = vector.load %arg12[%c8_183, %c107_184] : memref<16x768xf32, #tpu.memory_space<vmem>>, vector<4x512xf32>
    %c232 = arith.constant 232 : index
    %c0_185 = arith.constant 0 : index
    %147 = vector.load %arg13[%c232, %c0_185] : memref<312x512xf32, #tpu.memory_space<vmem>>, vector<4x512xf32>
    tpu.vector_store %arg13[%c232, %c0_185], %146 {strides = array<i32>} : memref<312x512xf32, #tpu.memory_space<vmem>>, vector<4x512xf32>,
    %c8_186 = arith.constant 8 : index
    %c108_187 = arith.constant 108 : index
    %148 = vector.load %arg12[%c8_186, %c108_187] : memref<16x768xf32, #tpu.memory_space<vmem>>, vector<4x512xf32>
    %c236 = arith.constant 236 : index
    %c0_188 = arith.constant 0 : index
    %149 = vector.load %arg13[%c236, %c0_188] : memref<312x512xf32, #tpu.memory_space<vmem>>, vector<4x512xf32>
    tpu.vector_store %arg13[%c236, %c0_188], %148 {strides = array<i32>} : memref<312x512xf32, #tpu.memory_space<vmem>>, vector<4x512xf32>,
    %c8_189 = arith.constant 8 : index
    %c109_190 = arith.constant 109 : index
    %150 = vector.load %arg12[%c8_189, %c109_190] : memref<16x768xf32, #tpu.memory_space<vmem>>, vector<4x512xf32>
    %c240 = arith.constant 240 : index
    %c0_191 = arith.constant 0 : index
    %151 = vector.load %arg13[%c240, %c0_191] : memref<312x512xf32, #tpu.memory_space<vmem>>, vector<4x512xf32>
    tpu.vector_store %arg13[%c240, %c0_191], %150 {strides = array<i32>} : memref<312x512xf32, #tpu.memory_space<vmem>>, vector<4x512xf32>,
    %c8_192 = arith.constant 8 : index
    %c110_193 = arith.constant 110 : index
    %152 = vector.load %arg12[%c8_192, %c110_193] : memref<16x768xf32, #tpu.memory_space<vmem>>, vector<4x512xf32>
    %c244 = arith.constant 244 : index
    %c0_194 = arith.constant 0 : index
    %153 = vector.load %arg13[%c244, %c0_194] : memref<312x512xf32, #tpu.memory_space<vmem>>, vector<4x512xf32>
    tpu.vector_store %arg13[%c244, %c0_194], %152 {strides = array<i32>} : memref<312x512xf32, #tpu.memory_space<vmem>>, vector<4x512xf32>,
    %c8_195 = arith.constant 8 : index
    %c126_196 = arith.constant 126 : index
    %154 = vector.load %arg12[%c8_195, %c126_196] : memref<16x768xf32, #tpu.memory_space<vmem>>, vector<4x512xf32>
    %c248 = arith.constant 248 : index
    %c0_197 = arith.constant 0 : index
    %155 = vector.load %arg13[%c248, %c0_197] : memref<312x512xf32, #tpu.memory_space<vmem>>, vector<4x512xf32>
    tpu.vector_store %arg13[%c248, %c0_197], %154 {strides = array<i32>} : memref<312x512xf32, #tpu.memory_space<vmem>>, vector<4x512xf32>,
    %c8_198 = arith.constant 8 : index
    %c127_199 = arith.constant 127 : index
    %156 = vector.load %arg12[%c8_198, %c127_199] : memref<16x768xf32, #tpu.memory_space<vmem>>, vector<4x512xf32>
    %c252 = arith.constant 252 : index
    %c0_200 = arith.constant 0 : index
    %157 = vector.load %arg13[%c252, %c0_200] : memref<312x512xf32, #tpu.memory_space<vmem>>, vector<4x512xf32>
    tpu.vector_store %arg13[%c252, %c0_200], %156 {strides = array<i32>} : memref<312x512xf32, #tpu.memory_space<vmem>>, vector<4x512xf32>,
    %c8_201 = arith.constant 8 : index
    %c128_202 = arith.constant 128 : index
    %158 = vector.load %arg12[%c8_201, %c128_202] : memref<16x768xf32, #tpu.memory_space<vmem>>, vector<4x512xf32>
    %c256 = arith.constant 256 : index
    %c0_203 = arith.constant 0 : index
    %159 = vector.load %arg13[%c256, %c0_203] : memref<312x512xf32, #tpu.memory_space<vmem>>, vector<4x512xf32>
    tpu.vector_store %arg13[%c256, %c0_203], %158 {strides = array<i32>} : memref<312x512xf32, #tpu.memory_space<vmem>>, vector<4x512xf32>,
    %c8_204 = arith.constant 8 : index
    %c129_205 = arith.constant 129 : index
    %160 = vector.load %arg12[%c8_204, %c129_205] : memref<16x768xf32, #tpu.memory_space<vmem>>, vector<4x512xf32>
    %c260 = arith.constant 260 : index
    %c0_206 = arith.constant 0 : index
    %161 = vector.load %arg13[%c260, %c0_206] : memref<312x512xf32, #tpu.memory_space<vmem>>, vector<4x512xf32>
    tpu.vector_store %arg13[%c260, %c0_206], %160 {strides = array<i32>} : memref<312x512xf32, #tpu.memory_space<vmem>>, vector<4x512xf32>,
    %c8_207 = arith.constant 8 : index
    %c130_208 = arith.constant 130 : index
    %162 = vector.load %arg12[%c8_207, %c130_208] : memref<16x768xf32, #tpu.memory_space<vmem>>, vector<4x512xf32>
    %c264 = arith.constant 264 : index
    %c0_209 = arith.constant 0 : index
    %163 = vector.load %arg13[%c264, %c0_209] : memref<312x512xf32, #tpu.memory_space<vmem>>, vector<4x512xf32>
    tpu.vector_store %arg13[%c264, %c0_209], %162 {strides = array<i32>} : memref<312x512xf32, #tpu.memory_space<vmem>>, vector<4x512xf32>,
    %c8_210 = arith.constant 8 : index
    %c146_211 = arith.constant 146 : index
    %164 = vector.load %arg12[%c8_210, %c146_211] : memref<16x768xf32, #tpu.memory_space<vmem>>, vector<4x512xf32>
    %c268 = arith.constant 268 : index
    %c0_212 = arith.constant 0 : index
    %165 = vector.load %arg13[%c268, %c0_212] : memref<312x512xf32, #tpu.memory_space<vmem>>, vector<4x512xf32>
    tpu.vector_store %arg13[%c268, %c0_212], %164 {strides = array<i32>} : memref<312x512xf32, #tpu.memory_space<vmem>>, vector<4x512xf32>,
    %c8_213 = arith.constant 8 : index
    %c147_214 = arith.constant 147 : index
    %166 = vector.load %arg12[%c8_213, %c147_214] : memref<16x768xf32, #tpu.memory_space<vmem>>, vector<4x512xf32>
    %c272 = arith.constant 272 : index
    %c0_215 = arith.constant 0 : index
    %167 = vector.load %arg13[%c272, %c0_215] : memref<312x512xf32, #tpu.memory_space<vmem>>, vector<4x512xf32>
    tpu.vector_store %arg13[%c272, %c0_215], %166 {strides = array<i32>} : memref<312x512xf32, #tpu.memory_space<vmem>>, vector<4x512xf32>,
    %c8_216 = arith.constant 8 : index
    %c148_217 = arith.constant 148 : index
    %168 = vector.load %arg12[%c8_216, %c148_217] : memref<16x768xf32, #tpu.memory_space<vmem>>, vector<4x512xf32>
    %c276 = arith.constant 276 : index
    %c0_218 = arith.constant 0 : index
    %169 = vector.load %arg13[%c276, %c0_218] : memref<312x512xf32, #tpu.memory_space<vmem>>, vector<4x512xf32>
    tpu.vector_store %arg13[%c276, %c0_218], %168 {strides = array<i32>} : memref<312x512xf32, #tpu.memory_space<vmem>>, vector<4x512xf32>,
    %c8_219 = arith.constant 8 : index
    %c149_220 = arith.constant 149 : index
    %170 = vector.load %arg12[%c8_219, %c149_220] : memref<16x768xf32, #tpu.memory_space<vmem>>, vector<4x512xf32>
    %c280 = arith.constant 280 : index
    %c0_221 = arith.constant 0 : index
    %171 = vector.load %arg13[%c280, %c0_221] : memref<312x512xf32, #tpu.memory_space<vmem>>, vector<4x512xf32>
    tpu.vector_store %arg13[%c280, %c0_221], %170 {strides = array<i32>} : memref<312x512xf32, #tpu.memory_space<vmem>>, vector<4x512xf32>,
    %c8_222 = arith.constant 8 : index
    %c150_223 = arith.constant 150 : index
    %172 = vector.load %arg12[%c8_222, %c150_223] : memref<16x768xf32, #tpu.memory_space<vmem>>, vector<4x512xf32>
    %c284 = arith.constant 284 : index
    %c0_224 = arith.constant 0 : index
    %173 = vector.load %arg13[%c284, %c0_224] : memref<312x512xf32, #tpu.memory_space<vmem>>, vector<4x512xf32>
    tpu.vector_store %arg13[%c284, %c0_224], %172 {strides = array<i32>} : memref<312x512xf32, #tpu.memory_space<vmem>>, vector<4x512xf32>,
    %c8_225 = arith.constant 8 : index
    %c166_226 = arith.constant 166 : index
    %174 = vector.load %arg12[%c8_225, %c166_226] : memref<16x768xf32, #tpu.memory_space<vmem>>, vector<4x512xf32>
    %c288 = arith.constant 288 : index
    %c0_227 = arith.constant 0 : index
    %175 = vector.load %arg13[%c288, %c0_227] : memref<312x512xf32, #tpu.memory_space<vmem>>, vector<4x512xf32>
    tpu.vector_store %arg13[%c288, %c0_227], %174 {strides = array<i32>} : memref<312x512xf32, #tpu.memory_space<vmem>>, vector<4x512xf32>,
    %c8_228 = arith.constant 8 : index
    %c167_229 = arith.constant 167 : index
    %176 = vector.load %arg12[%c8_228, %c167_229] : memref<16x768xf32, #tpu.memory_space<vmem>>, vector<4x512xf32>
    %c292 = arith.constant 292 : index
    %c0_230 = arith.constant 0 : index
    %177 = vector.load %arg13[%c292, %c0_230] : memref<312x512xf32, #tpu.memory_space<vmem>>, vector<4x512xf32>
    tpu.vector_store %arg13[%c292, %c0_230], %176 {strides = array<i32>} : memref<312x512xf32, #tpu.memory_space<vmem>>, vector<4x512xf32>,
    %c8_231 = arith.constant 8 : index
    %c168_232 = arith.constant 168 : index
    %178 = vector.load %arg12[%c8_231, %c168_232] : memref<16x768xf32, #tpu.memory_space<vmem>>, vector<4x512xf32>
    %c296 = arith.constant 296 : index
    %c0_233 = arith.constant 0 : index
    %179 = vector.load %arg13[%c296, %c0_233] : memref<312x512xf32, #tpu.memory_space<vmem>>, vector<4x512xf32>
    tpu.vector_store %arg13[%c296, %c0_233], %178 {strides = array<i32>} : memref<312x512xf32, #tpu.memory_space<vmem>>, vector<4x512xf32>,
    %c8_234 = arith.constant 8 : index
    %c169_235 = arith.constant 169 : index
    %180 = vector.load %arg12[%c8_234, %c169_235] : memref<16x768xf32, #tpu.memory_space<vmem>>, vector<4x512xf32>
    %c300 = arith.constant 300 : index
    %c0_236 = arith.constant 0 : index
    %181 = vector.load %arg13[%c300, %c0_236] : memref<312x512xf32, #tpu.memory_space<vmem>>, vector<4x512xf32>
    tpu.vector_store %arg13[%c300, %c0_236], %180 {strides = array<i32>} : memref<312x512xf32, #tpu.memory_space<vmem>>, vector<4x512xf32>,
    %c8_237 = arith.constant 8 : index
    %c170_238 = arith.constant 170 : index
    %182 = vector.load %arg12[%c8_237, %c170_238] : memref<16x768xf32, #tpu.memory_space<vmem>>, vector<4x512xf32>
    %c304 = arith.constant 304 : index
    %c0_239 = arith.constant 0 : index
    %183 = vector.load %arg13[%c304, %c0_239] : memref<312x512xf32, #tpu.memory_space<vmem>>, vector<4x512xf32>
    tpu.vector_store %arg13[%c304, %c0_239], %182 {strides = array<i32>} : memref<312x512xf32, #tpu.memory_space<vmem>>, vector<4x512xf32>,
    %cst_240 = arith.constant 0.000000e+00 : f32
    %184 = vector.broadcast %cst_240 : f32 to vector<4x512xf32>
    %c308 = arith.constant 308 : index
    %c0_241 = arith.constant 0 : index
    %185 = vector.load %arg13[%c308, %c0_241] : memref<312x512xf32, #tpu.memory_space<vmem>>, vector<4x512xf32>
    tpu.vector_store %arg13[%c308, %c0_241], %184 {strides = array<i32>} : memref<312x512xf32, #tpu.memory_space<vmem>>, vector<4x512xf32>,
    %c0_242 = arith.constant 0 : index
    %c0_243 = arith.constant 0 : index
    %186 = vector.load %arg7[%c0_242, %c0_243] : memref<4x312xf32, #tpu.memory_space<vmem>>, vector<4x312xf32>
    %c0_244 = arith.constant 0 : index
    %c0_245 = arith.constant 0 : index
    %187 = vector.load %arg13[%c0_244, %c0_245] : memref<312x512xf32, #tpu.memory_space<vmem>>, vector<312x512xf32>
    %cst_246 = arith.constant dense<0.000000e+00> : vector<4x512xf32>
    %188 = tpu.matmul %186, %187, %cst_246 {dimension_numbers = #tpu.dot_dimension_numbers<[1], [0], [0], [1], [0, 0, 1, 1], [], []>} : vector<4x312xf32>, vector<312x512xf32>, vector<4x512xf32> -> vector<4x512xf32>
    %c0_247 = arith.constant 0 : index
    %c0_248 = arith.constant 0 : index
    %189 = vector.load %arg8[%c0_247, %c0_248] : memref<4x1xf32, #tpu.memory_space<vmem>>, vector<4x1xf32>
    %190 = vector.broadcast %189 : vector<4x1xf32> to vector<4x512xf32>
    %191 = arith.addf %188, %190 : vector<4x512xf32>
    %cst_249 = arith.constant 0.000000e+00 : f32
    %192 = vector.broadcast %cst_249 : f32 to vector<4x512xf32>
    %193 = arith.maximumf %191, %192 : vector<4x512xf32>
    %194 = vector.broadcast %7 : vector<1x512xf32> to vector<4x512xf32>
    %195 = arith.mulf %193, %194 : vector<4x512xf32>
    %c12_250 = arith.constant 12 : index
    %c128_251 = arith.constant 128 : index
    %196 = vector.load %arg12[%c12_250, %c128_251] : memref<16x768xf32, #tpu.memory_space<vmem>>, vector<4x512xf32>
    tpu.vector_store %arg12[%c12_250, %c128_251], %195 {strides = array<i32>} : memref<16x768xf32, #tpu.memory_space<vmem>>, vector<4x512xf32>,
    %c0_252 = arith.constant 0 : index
    %c128_253 = arith.constant 128 : index
    %197 = vector.load %arg12[%c0_252, %c128_253] : memref<16x768xf32, #tpu.memory_space<vmem>>, vector<16x512xf32>
    %c0_254 = arith.constant 0 : index
    %c0_255 = arith.constant 0 : index
    %198 = vector.load %arg9[%c0_254, %c0_255] : memref<4x16xf32, #tpu.memory_space<vmem>>, vector<4x16xf32>
    %cst_256 = arith.constant dense<0.000000e+00> : vector<4x512xf32>
    %199 = tpu.matmul %198, %197, %cst_256 {dimension_numbers = #tpu.dot_dimension_numbers<[1], [0], [0], [1], [0, 0, 1, 1], [], []>} : vector<4x16xf32>, vector<16x512xf32>, vector<4x512xf32> -> vector<4x512xf32>
    %c0_257 = arith.constant 0 : index
    %c0_258 = arith.constant 0 : index
    %200 = vector.load %arg10[%c0_257, %c0_258] : memref<4x1xf32, #tpu.memory_space<vmem>>, vector<4x1xf32>
    %201 = vector.broadcast %200 : vector<4x1xf32> to vector<4x512xf32>
    %202 = arith.addf %199, %201 : vector<4x512xf32>
    %203 = vector.extract_strided_slice %197 {offsets = [0, 0], sizes = [4, 512], strides = [1, 1]} : vector<16x512xf32> to vector<4x512xf32>
    %204 = arith.addf %202, %203 : vector<4x512xf32>
    %c0_259 = arith.constant 0 : index
    %c0_260 = arith.constant 0 : index
    %c0_261 = arith.constant 0 : index
    %205 = vector.load %arg11[%c0_259, %c0_260, %c0_261] : memref<1x4x512xf32, #tpu.memory_space<vmem>>, vector<1x4x512xf32>
    %206 = vector.shape_cast %205 : vector<1x4x512xf32> to vector<4x512xf32>
    %207 = vector.shape_cast %204 : vector<4x512xf32> to vector<1x4x512xf32>
    tpu.vector_store %arg11[%c0_259, %c0_260, %c0_261], %207 {strides = array<i32>} : memref<1x4x512xf32, #tpu.memory_space<vmem>>, vector<1x4x512xf32>,
    return
  }
  func.func @transform_0(%arg0: i32) -> (i32, i32, i32) {
    %c0_i32 = arith.constant 0 : i32
    %c0_i32_0 = arith.constant 0 : i32
    %c0_i32_1 = arith.constant 0 : i32
    return %arg0, %c0_i32, %c0_i32_0 : i32, i32, i32
  }
  func.func @transform_1(%arg0: i32) -> (i32, i32) {
    %c0_i32 = arith.constant 0 : i32
    %c0_i32_0 = arith.constant 0 : i32
    %c0_i32_1 = arith.constant 0 : i32
    return %c0_i32, %c0_i32_0 : i32, i32
  }
  func.func @transform_2(%arg0: i32) -> (i32, i32) {
    %c0_i32 = arith.constant 0 : i32
    %c0_i32_0 = arith.constant 0 : i32
    %c0_i32_1 = arith.constant 0 : i32
    return %c0_i32, %c0_i32_0 : i32, i32
  }
  func.func @transform_3(%arg0: i32) -> (i32, i32) {
    %c0_i32 = arith.constant 0 : i32
    %c0_i32_0 = arith.constant 0 : i32
    %c0_i32_1 = arith.constant 0 : i32
    return %c0_i32, %c0_i32_0 : i32, i32
  }
  func.func @transform_4(%arg0: i32) -> (i32, i32) {
    %c0_i32 = arith.constant 0 : i32
    %c0_i32_0 = arith.constant 0 : i32
    %c0_i32_1 = arith.constant 0 : i32
    return %c0_i32, %c0_i32_0 : i32, i32
  }
  func.func @transform_5(%arg0: i32) -> (i32, i32) {
    %c0_i32 = arith.constant 0 : i32
    %c0_i32_0 = arith.constant 0 : i32
    %c0_i32_1 = arith.constant 0 : i32
    return %c0_i32, %c0_i32_0 : i32, i32
  }
  func.func @transform_6(%arg0: i32) -> (i32, i32) {
    %c0_i32 = arith.constant 0 : i32
    %c0_i32_0 = arith.constant 0 : i32
    %c0_i32_1 = arith.constant 0 : i32
    return %c0_i32, %c0_i32_0 : i32, i32
  }
  func.func @transform_7(%arg0: i32) -> (i32, i32) {
    %c0_i32 = arith.constant 0 : i32
    %c0_i32_0 = arith.constant 0 : i32
    %c0_i32_1 = arith.constant 0 : i32
    return %c0_i32, %c0_i32_0 : i32, i32
  }
  func.func @transform_8(%arg0: i32) -> (i32, i32) {
    %c0_i32 = arith.constant 0 : i32
    %c0_i32_0 = arith.constant 0 : i32
    %c0_i32_1 = arith.constant 0 : i32
    return %c0_i32, %c0_i32_0 : i32, i32
  }
  func.func @transform_9(%arg0: i32) -> (i32, i32) {
    %c0_i32 = arith.constant 0 : i32
    %c0_i32_0 = arith.constant 0 : i32
    %c0_i32_1 = arith.constant 0 : i32
    return %c0_i32, %c0_i32_0 : i32, i32
  }
  func.func @transform_10(%arg0: i32) -> (i32, i32, i32) {
    %c0_i32 = arith.constant 0 : i32
    %c0_i32_0 = arith.constant 0 : i32
    %c0_i32_1 = arith.constant 0 : i32
    return %arg0, %c0_i32, %c0_i32_0 : i32, i32, i32
  }
}

</mosaic_0001>

<bundles_post_ra>
// kernel: rdb_pallas.1
= control target key start
LH: loop header
LB: loop body
LE: loop exit
PB: predicated region body
PF: predicated region fallthrough
CT: control target
= control target key end

     0   :  { %s4233_s13 = smov 0   ;;  %s5576_s0 = inlined_call_operand.vmem [shape: f32[2,4,512], index: 0, kind: input, shape index: {}]   ;;  %s5577_s1 = inlined_call_operand.vmem [shape: f32[1,512], index: 1, kind: input, shape index: {}]   ;;  %s5578_s2 = inlined_call_operand.vmem [shape: f32[4,104], index: 2, kind: input, shape index: {}]   ;;  %s5579_s3 = inlined_call_operand.vmem [shape: f32[4,1], index: 3, kind: input, shape index: {}]   ;;  %s5580_s4 = inlined_call_operand.vmem [shape: f32[4,208], index: 4, kind: input, shape index: {}]   ;;  %s5581_s5 = inlined_call_operand.vmem [shape: f32[4,1], index: 5, kind: input, shape index: {}]   ;;  %s5582_s6 = inlined_call_operand.vmem [shape: f32[4,312], index: 6, kind: input, shape index: {}]   ;;  %s5583_s7 = inlined_call_operand.vmem [shape: f32[4,1], index: 7, kind: input, shape index: {}]   ;;  %s5584_s8 = inlined_call_operand.vmem [shape: f32[4,16], index: 8, kind: input, shape index: {}]   ;;  %s5585_s9 = inlined_call_operand.vmem [shape: f32[4,1], index: 9, kind: input, shape index: {}]   ;;  %s5586_s10 = inlined_call_operand.vmem [shape: f32[2,4,512], index: 10, kind: output, shape index: {}]  }
   0x1 LB: > { %s4019_s14 = sadd.s32 4294967295, %s4150_s13   ;;  %p4023_p0 = scmp.ge.s32.totalorder %s4150_s13, 1  ;;  %s4150_s13 = sphi %s4233_s13, %s20_s13  }
   0x2   : > { %p312_p1 = scmp.lt.s32.totalorder %s4150_s13, 3 }
   0x4   : > { %p313_p2 = pnand %p4023_p0, %p312_p1 }
   0x6   : > { %316 = sbr.rel (%p313_p2) target bundleno = 1826 (0x722), region = 60 }
   0xb   : > { %v4152_v0 = vmov 0.0   ;;  %p350_p3 = scmp.lt.s32.totalorder %s4019_s14, 1  ;;  %s5626_s19 = smov 40   ;;  %vm5639_vm0 = vcmask 326656   ;;  %vm5637_vm1 = vcmask 343040   ;;  %vm5636_vm2 = vcmask 334848  }
   0xc   : > { %360 = vst [vmem:[#allocation2 + $0x18] sm:$0xff] %v4152_v0  ;;  %s5620_s20 = smov 41   ;;  %s5622_s21 = smov 42   ;;  %vm5638_vm3 = vcmask 318464   ;;  %vm546_vm4 = vcmask 310272   ;;  %vm5640_vm5 = vcmask 179200  }
   0xd   : > { %361 = vst [vmem:[#allocation2] sm:$0xff] %v4152_v0  ;;  %s5772_s14 = smov (!%p350_p3, %s4019_s14), 1  ;;  %s5624_s22 = smov 39   ;;  %vm617_vm6 = vcmask 171008   ;;  %vm655_vm7 = vcmask 162816   ;;  %vm688_vm8 = vcmask 154624  }
   0xe   : > { %362 = vst [vmem:[#allocation2 + $0x50] sm:$0xff] %v4152_v0  ;;  %s5587_s15 = sshll.u32 %s5772_s14, 4  ;;  %s5630_s23 = smov 38   ;;  %vm5600_vm9 = vcmask 146432   ;;  %vm5602_vm10 = vcmask 15360   ;;  %vm5601_vm11 = vcmask 7168  }
   0xf   : > { %363 = vst [vmem:[#allocation2 + $0x58] sm:$0xff] %v4152_v0  ;;  %s354_s18 = scalar_lea.vmem %s5576_s0, %s5587_s15  ;;  %s5628_s24 = smov 22   ;;  %vm5603_vm12 = vcmask 1039360   ;;  %vm5605_vm13 = vcmask 1031168   ;;  %vm5604_vm14 = vcmask 900096   ;;  %vm5607_vm15 = vcmask 891904  }
  0x10   : > { %1244 = vst [vmem:[#allocation3 + $0x2e8] sm:$0xf0] %v4152_v0  ;;  %v365_v13 = vld [vmem:[%s354_s18 + $0x8] sm:$0xff]  ;;  %v364_v14 = vld [vmem:[%s354_s18] sm:$0xff]  ;;  %s5634_s25 = smov 21   ;;  %s5632_s26 = smov 20  }
  0x11   : > { %1245 = vst [vmem:[#allocation3 + $0x138] sm:$0xf0] %v4152_v0  ;;  %s4161_s27 = smov 19   ;;  %s5588_s28 = smov 18  }
  0x12   : > { %1246 = vst [vmem:[#allocation3 + $0x178] sm:$0xf0] %v4152_v0  ;;  %s5592_s29 = smov 2   ;;  %s5590_s30 = smov 1  }
  0x13   : > { %v455_v1 = vld [vmem:[#allocation2 + $0x18] sm:$0xf]  ;;  %v1493_v2 = vld [vmem:[#allocation2 + $0x18] sm:$0xf0]  ;;  %1247 = vst [vmem:[#allocation3 + $0x2b0] sm:$0xf0] %v4152_v0 }
  0x14   : > { %v1503_v3 = vrot.slane %v1493_v2, 4  ;;  %2272 = vst [vmem:[#allocation3 + $0x308] sm:$0xf0] %v4152_v0  ;;  %v417_v4 = vld [vmem:[#allocation2 + $0x18] sm:$0xf]  ;;  %s5594_s11 = smov 127  }
  0x15   : > { %2273 = vst [vmem:[#allocation3 + $0x378] sm:$0xf0] %v4152_v0  ;;  %v427_v5 = vrot.slane %v417_v4, 4  ;;  %v1461_v6 = vld [vmem:[#allocation2 + $0x18] sm:$0xf0]  ;;  %s5598_s12 = smov 126  }
  0x16   : > { %v4092_v7 = vpack.i.bf16 %v1503_v3, %v455_v1  ;;  %2274 = vst [vmem:[#allocation3 + $0x190] sm:$0xf0] %v4152_v0  ;;  %v384_v8 = vld [vmem:[#allocation2 + $0x18] sm:$0xf]  ;;  %v1424_v9 = vld [vmem:[#allocation2 + $0x18] sm:$0xf0] }
  0x17   : > { %2275 = vst [vmem:[#allocation3 + $0x68] sm:$0xf0] %v4152_v0  ;;  %v4087_v10 = vpack.i.bf16 %v1461_v6, %v427_v5  ;;  %v1434_v11 = vrot.slane %v1424_v9, 4  ;;  %v488_v35 = vld [vmem:[#allocation2 + $0x18] sm:$0xf]  ;;  %s5596_s16 = smov 110  }
  0x18   : > { %4093 = vrot.lane.b32.xlu1 %v4092_v7, %s5626_s19  ;;  %3403 = vst [vmem:[#allocation3 + $0x100] sm:$0xf0] %v4152_v0  ;;  %v498_v38 = vrot.slane %v488_v35, 4  ;;  %v1530_v39 = vld [vmem:[#allocation2 + $0x18] sm:$0xf0]  ;;  %s5610_s17 = smov 109  }
  0x19   : > { %3404 = vst [vmem:[#allocation3 + $0x3d8] sm:$0xf0] %v4152_v0  ;;  %4088 = vrot.lane.b32.xlu2 %v4087_v10, %s5620_s20  ;;  %v4082_v12 = vpack.i.bf16 %v1434_v11, %v384_v8  ;;  %v1562_v42 = vld [vmem:[#allocation2 + $0x18] sm:$0xf0]  ;;  %v526_v45 = vld [vmem:[#allocation2 + $0x18] sm:$0xf] }
  0x1a   : > { %3405 = vst [vmem:[#allocation3 + $0x238] sm:$0xf0] %v4152_v0  ;;  %v4097_v43 = vpack.i.bf16 %v1530_v39, %v498_v38  ;;  %v1572_v44 = vrot.slane %v1562_v42, 4  ;;  %v559_v53 = vld [vmem:[#allocation2 + $0x18] sm:$0xf]  ;;  %s5608_s18 = smov 108  }
  0x1b   : > { %3406 = vst [vmem:[#allocation3 + $0x2c0] sm:$0xf0] %v4152_v0  ;;  %4083 = vrot.lane.b32.xlu0 %v4082_v12, %s5622_s21  ;;  %v569_v55 = vrot.slane %v559_v53, 4  ;;  %v1599_v57 = vld [vmem:[#allocation2 + $0x18] sm:$0xf0]  ;;  %s5643_s15 = smov 107  }
  0x1c   : > { %370 = vst [vmem:[#allocation1 + $0x10] ss:$2 sm:$0xff] %v365_v13  ;;  %v4102_v48 = vpack.i.bf16 %v1572_v44, %v526_v45  ;;  %v1631_v3 = vld [vmem:[#allocation2 + $0x18] sm:$0xf0]  ;;  %v597_v5 = vld [vmem:[#allocation2 + $0x18] sm:$0xf] }
  0x1d   : > { %368 = vst [vmem:[#allocation1] ss:$2 sm:$0xff] %v364_v14  ;;  %v4107_v59 = vpack.i.bf16 %v1599_v57, %v569_v55  ;;  %v1641_v4 = vrot.slane %v1631_v3, 4  ;;  %v630_v7 = vld [vmem:[#allocation2 + $0x18] sm:$0xf] }
  0x1e   : > { %v640_v10 = vrot.slane %v630_v7, 4  ;;  %v1668_v11 = vld [vmem:[#allocation2 + $0x18] sm:$0xf0] }
  0x1f   : > { %v4112_v9 = vpack.i.bf16 %v1641_v4, %v597_v5 }
  0x20   : > { %v4117_v12 = vpack.i.bf16 %v1668_v11, %v640_v10 }
  0x23   : > { %v374_v15 = vld.sshfl [vmem:[#allocation1 + $0x18] sm:$0xff pattern:$0x75316420]  ;;  %v373_v16 = vld.sshfl [vmem:[#allocation1 + $0x10] sm:$0xff pattern:$0x75316420] }
  0x24   : > { %382 = vst [vmem:[#allocation2 + $0x20] sm:$0xf] %v374_v15  ;;  %v372_v17 = vld.sshfl [vmem:[#allocation1 + $0x8] sm:$0xff pattern:$0x75316420] }
  0x25   : > { %380 = vst [vmem:[#allocation2 + $0x8] sm:$0xf] %v372_v17  ;;  %v371_v18 = vld.sshfl [vmem:[#allocation1] sm:$0xff pattern:$0x75316420] }
  0x26   : > { %379 = vst [vmem:[#allocation2 + $0x48] sm:$0xf] %v371_v18 }
  0x27   : > { %381 = vst [vmem:[#allocation2 + $0x30] sm:$0xf] %v373_v16 }
  0x2b   : > { %v388_v19 = vld [vmem:[#allocation2 + $0x20] sm:$0xf] }
  0x2c   : > { %402 = vrot.lane.b32.xlu2 %v388_v19, %s5622_s21  ;;  %v386_v20 = vld [vmem:[#allocation2 + $0x8] sm:$0xf]  ;;  %v421_v28 = vld [vmem:[#allocation2 + $0x20] sm:$0xf] }
  0x2d   : > { %398 = vrot.lane.b32.xlu1 %v386_v20, %s5622_s21  ;;  %v385_v21 = vld [vmem:[#allocation2 + $0x48] sm:$0xf]  ;;  %v431_v31 = vrot.slane %v421_v28, 4  ;;  %v459_v32 = vld [vmem:[#allocation2 + $0x20] sm:$0xf] }
  0x2e   : > { %396 = vrot.lane.b32.xlu0 %v385_v21, %s5622_s21  ;;  %v418_v22 = vld [vmem:[#allocation2 + $0x48] sm:$0xf]  ;;  %v387_v24 = vld [vmem:[#allocation2 + $0x30] sm:$0xf]  ;;  %v492_v46 = vld [vmem:[#allocation2 + $0x20] sm:$0xf] }
  0x2f   : > { %v456_v23 = vld [vmem:[#allocation2 + $0x48] sm:$0xf]  ;;  %v428_v25 = vrot.slane %v418_v22, 4  ;;  %v420_v26 = vld [vmem:[#allocation2 + $0x30] sm:$0xf]  ;;  %v502_v49 = vrot.slane %v492_v46, 4 }
  0x30   : > { %v419_v27 = vld [vmem:[#allocation2 + $0x8] sm:$0xf]  ;;  %v430_v29 = vrot.slane %v420_v26, 4  ;;  %v458_v33 = vld [vmem:[#allocation2 + $0x30] sm:$0xf] }
  0x31   : > { %v429_v30 = vrot.slane %v419_v27, 4  ;;  %v457_v34 = vld [vmem:[#allocation2 + $0x8] sm:$0xf]  ;;  %v491_v47 = vld [vmem:[#allocation2 + $0x30] sm:$0xf] }
  0x32   : > { %v490_v36 = vld [vmem:[#allocation2 + $0x8] sm:$0xf]  ;;  %v501_v50 = vrot.slane %v491_v47, 4  ;;  %v529_v51 = vld [vmem:[#allocation2 + $0x30] sm:$0xf] }
  0x33   : > { %v489_v37 = vld [vmem:[#allocation2 + $0x48] sm:$0xf]  ;;  %v500_v40 = vrot.slane %v490_v36, 4  ;;  %v530_v60 = vld [vmem:[#allocation2 + $0x20] sm:$0xf] }
  0x34   : > { %467 = vrot.lane.b32.xlu2 %v456_v23, %s5626_s19  ;;  %v499_v41 = vrot.slane %v489_v37, 4  ;;  %v528_v52 = vld [vmem:[#allocation2 + $0x8] sm:$0xf]  ;;  %v563_v61 = vld [vmem:[#allocation2 + $0x20] sm:$0xf] }
  0x35   : > { %400 = vrot.lane.b32.xlu1 %v387_v24, %s5622_s21  ;;  %v527_v54 = vld [vmem:[#allocation2 + $0x48] sm:$0xf]  ;;  %v562_v62 = vld [vmem:[#allocation2 + $0x30] sm:$0xf]  ;;  %v573_v0 = vrot.slane %v563_v61, 4 }
  0x36   : > { %434 = vrot.lane.b32.xlu0 %v428_v25, %s5620_s20  ;;  %v560_v56 = vld [vmem:[#allocation2 + $0x48] sm:$0xf]  ;;  %v572_v1 = vrot.slane %v562_v62, 4  ;;  %v601_v13 = vld [vmem:[#allocation2 + $0x20] sm:$0xf] }
  0x37   : > { %v570_v58 = vrot.slane %v560_v56, 4  ;;  %v561_v63 = vld [vmem:[#allocation2 + $0x8] sm:$0xf]  ;;  %v600_v14 = vld [vmem:[#allocation2 + $0x30] sm:$0xf] }
  0x38   : > { %v571_v2 = vrot.slane %v561_v63, 4  ;;  %v599_v6 = vld [vmem:[#allocation2 + $0x8] sm:$0xf]  ;;  %v633_v16 = vld [vmem:[#allocation2 + $0x30] sm:$0xf] }
  0x39   : > { %v598_v8 = vld [vmem:[#allocation2 + $0x48] sm:$0xf]  ;;  %v643_v19 = vrot.slane %v633_v16, 4  ;;  %v1700_v22 = vld [vmem:[#allocation2 + $0x18] sm:$0xf0] }
  0x3a   : > { %v632_v17 = vld [vmem:[#allocation2 + $0x8] sm:$0xf]  ;;  %v1710_v23 = vrot.slane %v1700_v22, 4  ;;  %v668_v25 = vld [vmem:[#allocation2 + $0x18] sm:$0xf] }
  0x3b   : > { %v631_v18 = vld [vmem:[#allocation2 + $0x48] sm:$0xf]  ;;  %v642_v20 = vrot.slane %v632_v17, 4  ;;  %v634_v26 = vld [vmem:[#allocation2 + $0x20] sm:$0xf] }
  0x3c   : > { %438 = vrot.lane.b32.xlu2 %v430_v29, %s5620_s20  ;;  %v641_v21 = vrot.slane %v631_v18, 4  ;;  %v4122_v27 = vpack.i.bf16 %v1710_v23, %v668_v25  ;;  %v669_v28 = vld [vmem:[#allocation2 + $0x48] sm:$0xf]  ;;  %v644_v29 = vrot.slane %v634_v26, 4  ;;  %v671_v35 = vld [vmem:[#allocation2 + $0x30] sm:$0xf] }
  0x3d   : > { %436 = vrot.lane.b32.xlu1 %v429_v30, %s5620_s20  ;;  %v670_v36 = vld [vmem:[#allocation2 + $0x8] sm:$0xf]  ;;  %v701_v37 = vld [vmem:[#allocation2 + $0x18] sm:$0xf]  ;;  %v776_v16 = vld [vmem:[#allocation2 + $0x20] sm:$0xf] }
  0x3e   : > { %440 = vrot.lane.b32.xlu0 %v431_v31, %s5620_s20  ;;  %v703_v38 = vld [vmem:[#allocation2 + $0x8] sm:$0xf]  ;;  %v711_v42 = vrot.slane %v701_v37, 4  ;;  %v739_v56 = vld [vmem:[#allocation2 + $0x18] sm:$0xf]  ;;  %v786_v23 = vrot.slane %v776_v16, 4 }
  0x3f   : > { %v713_v44 = vrot.slane %v703_v38, 4  ;;  %v740_v3 = vld [vmem:[#allocation2 + $0x48] sm:$0xf]  ;;  %v775_v18 = vld [vmem:[#allocation2 + $0x30] sm:$0xf] }
  0x40   : > { %v773_v4 = vld [vmem:[#allocation2 + $0x48] sm:$0xf]  ;;  %v785_v26 = vrot.slane %v775_v18, 4 }
  0x41   : > { %v783_v11 = vrot.slane %v773_v4, 4 }
  0x44   : > { %473 = vrot.lane.b32.xlu2 %v459_v32, %s5626_s19 }
  0x45   : > { %471 = vrot.lane.b32.xlu1 %v458_v33, %s5626_s19 }
  0x46   : > { %469 = vrot.lane.b32.xlu0 %v457_v34, %s5626_s19  ;;  %v672_v34 = vld [vmem:[#allocation2 + $0x20] sm:$0xf] }
  0x4c   : > { %507 = vrot.lane.b32.xlu2 %v500_v40, %s5624_s22 }
  0x4d   : > { %505 = vrot.lane.b32.xlu1 %v499_v41, %s5624_s22  ;;  %v702_v41 = vld [vmem:[#allocation2 + $0x48] sm:$0xf] }
  0x4e   : > { %4098 = vrot.lane.b32.xlu0 %v4097_v43, %s5624_s22  ;;  %v1737_v43 = vld [vmem:[#allocation2 + $0x18] sm:$0xf0]  ;;  %v712_v45 = vrot.slane %v702_v41, 4 }
  0x4f   : > { %v4127_v46 = vpack.i.bf16 %v1737_v43, %v711_v42  ;;  %v822_v43 = vld [vmem:[#allocation2 + $0x50] sm:$0xf] }
  0x54   : > { %4103 = vrot.lane.b32.xlu2 %v4102_v48, %s5630_s23  ;;  %v705_v48 = vld [vmem:[#allocation2 + $0x20] sm:$0xf] }
  0x55   : > { %511 = vrot.lane.b32.xlu1 %v502_v49, %s5624_s22  ;;  %v715_v55 = vrot.slane %v705_v48, 4 }
  0x56   : > { %509 = vrot.lane.b32.xlu0 %v501_v50, %s5624_s22 }
  0x5c   : > { %542 = vrot.lane.b32.xlu2 %v529_v51, %s5630_s23  ;;  %v704_v51 = vld [vmem:[#allocation2 + $0x30] sm:$0xf] }
  0x5d   : > { %540 = vrot.lane.b32.xlu1 %v528_v52, %s5630_s23  ;;  %v714_v57 = vrot.slane %v704_v51, 4 }
  0x5e   : > { %538 = vrot.lane.b32.xlu0 %v527_v54, %s5630_s23 }
  0x64   : > { %576 = vrot.lane.b32.xlu2 %v570_v58, %s5628_s24 }
  0x65   : > { %4108 = vrot.lane.b32.xlu1 %v4107_v59, %s5628_s24 }
  0x66   : > { %544 = vrot.lane.b32.xlu0 %v530_v60, %s5630_s23 }
  0x6c   : > { %582 = vrot.lane.b32.xlu2 %v573_v0, %s5628_s24 }
  0x6d   : > { %580 = vrot.lane.b32.xlu1 %v572_v1, %s5628_s24  ;;  %v742_v1 = vld [vmem:[#allocation2 + $0x30] sm:$0xf] }
  0x6e   : > { %578 = vrot.lane.b32.xlu0 %v571_v2, %s5628_s24  ;;  %v741_v2 = vld [vmem:[#allocation2 + $0x8] sm:$0xf] }
  0x73   : > { %v4283_v15 = vpop.permute.xlu2 %4088 }
  0x74   : > { %611 = vrot.lane.b32.xlu2 %v599_v6, %s5634_s25  ;;  %v4090_v59 = vunpack.i.l.bf16 %v4283_v15  ;;  %v772_v6 = vld [vmem:[#allocation2 + $0x18] sm:$0xf] }
  0x75   : > { %609 = vrot.lane.b32.xlu1 %v598_v8, %s5634_s25 }
  0x76   : > { %4113 = vrot.lane.b32.xlu0 %v4112_v9, %s5634_s25 }
  0x7c   : > { %4118 = vrot.lane.b32.xlu2 %v4117_v12, %s5632_s26 }
  0x7d   : > { %615 = vrot.lane.b32.xlu1 %v601_v13, %s5634_s25  ;;  %v782_v13 = vrot.slane %v772_v6, 4 }
  0x7e   : > { %613 = vrot.lane.b32.xlu0 %v600_v14, %s5634_s25  ;;  %v743_v14 = vld [vmem:[#allocation2 + $0x20] sm:$0xf] }
  0x84   : > { %651 = vrot.lane.b32.xlu2 %v643_v19, %s5632_s26 }
  0x85   : > { %649 = vrot.lane.b32.xlu1 %v642_v20, %s5632_s26  ;;  %v774_v20 = vld [vmem:[#allocation2 + $0x8] sm:$0xf] }
  0x86   : > { %647 = vrot.lane.b32.xlu0 %v641_v21, %s5632_s26  ;;  %v403_v24 = vpop.permute.xlu2 %402 }
  0x8a   : > { %v4290_v30 = vpop.permute.xlu1 %4093 }
  0x8b   : > { %v4095_v31 = vunpack.i.l.bf16 %v4290_v30 }
  0x8c   : > { %680 = vrot.lane.b32.xlu2 %v669_v28, %s4161_s27  ;;  %v820_v28 = vld [vmem:[#allocation2 + $0x30] sm:$0xf] }
  0x8d   : > { %4123 = vrot.lane.b32.xlu1 %v4122_v27, %s4161_s27  ;;  %v4303_v39 = vpop.permute.xlu0 %4083  ;;  %v784_v27 = vrot.slane %v774_v20, 4 }
  0x8e   : > { %653 = vrot.lane.b32.xlu0 %v644_v29, %s5632_s26  ;;  %v4296_v32 = vpop.permute.xlu2 %467  ;;  %v4085_v49 = vunpack.i.l.bf16 %v4303_v39 }
  0x8f   : > { %v476_v33 = vsel %vm5639_vm0, %v4095_v31, %v4296_v32  ;;  %v819_v31 = vld [vmem:[#allocation2 + $0x8] sm:$0xf] }
  0x90   : > { %484 = vst [vmem:[#allocation3 + $0x2c8] sm:$0xf] %v476_v33  ;;  %v829_v38 = vrot.slane %v819_v31, 4 }
  0x94   : > { %686 = vrot.lane.b32.xlu2 %v672_v34, %s4161_s27  ;;  %v818_v34 = vld [vmem:[#allocation2 + $0x48] sm:$0xf] }
  0x95   : > { %684 = vrot.lane.b32.xlu1 %v671_v35, %s4161_s27 }
  0x96   : > { %682 = vrot.lane.b32.xlu0 %v670_v36, %s4161_s27  ;;  %v439_v40 = vpop.permute.xlu2 %438  ;;  %v830_v36 = vrot.slane %v820_v28, 4  ;;  %v929_v28 = vld [vmem:[#allocation2 + $0x30] sm:$0xf] }
  0x9c   : > { %720 = vrot.lane.b32.xlu2 %v713_v44, %s5588_s28 }
  0x9d   : > { %718 = vrot.lane.b32.xlu1 %v712_v45, %s5588_s28  ;;  %v821_v45 = vld [vmem:[#allocation2 + $0x20] sm:$0xf] }
  0x9e   : > { %4128 = vrot.lane.b32.xlu0 %v4127_v46, %s5588_s28  ;;  %v474_v47 = vpop.permute.xlu2 %473  ;;  %v831_v51 = vrot.slane %v821_v45, 4 }
  0x9f   : > { %v399_v50 = vpop.permute.xlu1 %398 }
  0xa0   : > { %v397_v52 = vpop.permute.xlu0 %396 }
  0xa1   : > { %v405_v53 = vsel %vm5637_vm1, %v4085_v49, %v397_v52  ;;  %v406_v54 = vsel %vm5637_vm1, %v397_v52, %v399_v50  ;;  %v832_v49 = vrot.slane %v822_v43, 4  ;;  %v930_v43 = vld [vmem:[#allocation2 + $0x20] sm:$0xf] }
  0xa2   : > { %413 = vst [vmem:[#allocation3 + $0x4c8] sm:$0xf] %v405_v53 }
  0xa3   : > { %414 = vst [vmem:[#allocation3 + $0x448] sm:$0xf] %v406_v54 }
  0xa4   : > { %749 = vrot.lane.b32.xlu2 %v739_v56, %s5592_s29 }
  0xa5   : > { %724 = vrot.lane.b32.xlu1 %v715_v55, %s5588_s28 }
  0xa6   : > { %722 = vrot.lane.b32.xlu0 %v714_v57, %s5588_s28  ;;  %v4314_v58 = vpop.permute.xlu2 %507  ;;  %s4171_s28 = smov 86  }
  0xa7   : > { %v401_v60 = vpop.permute.xlu1 %400 }
  0xa8   : > { %v407_v61 = vsel %vm5637_vm1, %v399_v50, %v401_v60  ;;  %v408_v62 = vsel %vm5637_vm1, %v401_v60, %v403_v24  ;;  %v435_v63 = vpop.permute.xlu0 %434  ;;  %v856_v50 = vld [vmem:[#allocation2 + $0x48] sm:$0xf]  ;;  %v858_v60 = vld [vmem:[#allocation2 + $0x30] sm:$0xf] }
  0xa9   : > { %415 = vst [vmem:[#allocation3 + $0x2d0] sm:$0xf] %v407_v61  ;;  %v443_v0 = vsel %vm5636_vm2, %v4090_v59, %v435_v63  ;;  %v859_v59 = vld [vmem:[#allocation2 + $0x20] sm:$0xf]  ;;  %v857_v61 = vld [vmem:[#allocation2 + $0x8] sm:$0xf] }
  0xaa   : > { %416 = vst [vmem:[#allocation3 + $0x4b0] sm:$0xf] %v408_v62  ;;  %v890_v62 = vld [vmem:[#allocation2 + $0x8] sm:$0xf] }
  0xab   : > { %451 = vst [vmem:[#allocation3 + $0x4c8] sm:$0xf0] %v443_v0  ;;  %v889_v0 = vld [vmem:[#allocation2 + $0x48] sm:$0xf]  ;;  %v900_v4 = vrot.slane %v890_v62, 4 }
  0xac   : > { %755 = vrot.lane.b32.xlu2 %v742_v1, %s5592_s29 }
  0xad   : > { %753 = vrot.lane.b32.xlu1 %v741_v2, %s5592_s29 }
  0xae   : > { %751 = vrot.lane.b32.xlu0 %v740_v3, %s5592_s29  ;;  %v4323_v5 = vpop.permute.xlu2 %4103 }
  0xaf   : > { %v437_v7 = vpop.permute.xlu1 %436  ;;  %v4105_v53 = vunpack.i.l.bf16 %v4323_v5 }
  0xb0   : > { %v444_v8 = vsel %vm5636_vm2, %v435_v63, %v437_v7  ;;  %v445_v9 = vsel %vm5636_vm2, %v437_v7, %v439_v40  ;;  %v441_v10 = vpop.permute.xlu0 %440  ;;  %v899_v7 = vrot.slane %v889_v0, 4  ;;  %v999_v0 = vld [vmem:[#allocation2 + $0x8] sm:$0xf] }
  0xb1   : > { %452 = vst [vmem:[#allocation3 + $0x448] sm:$0xf0] %v444_v8  ;;  %v446_v12 = vsel %vm5636_vm2, %v439_v40, %v441_v10  ;;  %v828_v40 = vrot.slane %v818_v34, 4  ;;  %v893_v10 = vld [vmem:[#allocation2 + $0x50] sm:$0xf] }
  0xb2   : > { %453 = vst [vmem:[#allocation3 + $0x2d0] sm:$0xf0] %v445_v9  ;;  %v860_v9 = vld [vmem:[#allocation2 + $0x50] sm:$0xf]  ;;  %v903_v18 = vrot.slane %v893_v10, 4 }
  0xb3   : > { %454 = vst [vmem:[#allocation3 + $0x4b0] sm:$0xf0] %v446_v12  ;;  %v892_v12 = vld [vmem:[#allocation2 + $0x20] sm:$0xf]  ;;  %v960_v34 = vld [vmem:[#allocation2 + $0x48] sm:$0xf] }
  0xb4   : > { %789 = vrot.lane.b32.xlu2 %v783_v11, %s5590_s30 }
  0xb5   : > { %787 = vrot.lane.b32.xlu1 %v782_v13, %s5590_s30 }
  0xb6   : > { %757 = vrot.lane.b32.xlu0 %v743_v14, %s5592_s29  ;;  %v4331_v17 = vpop.permute.xlu2 %542  ;;  %v891_v14 = vld [vmem:[#allocation2 + $0x30] sm:$0xf]  ;;  %s5651_s29 = smov 88  }
  0xb7   : > { %v472_v19 = vpop.permute.xlu1 %471 }
  0xb8   : > { %v479_v21 = vsel %vm5639_vm0, %v472_v19, %v474_v47  ;;  %v470_v22 = vpop.permute.xlu0 %469 }
  0xb9   : > { %487 = vst [vmem:[#allocation3 + $0x20] sm:$0xf] %v479_v21  ;;  %v477_v24 = vsel %vm5639_vm0, %v4296_v32, %v470_v22  ;;  %v478_v25 = vsel %vm5639_vm0, %v470_v22, %v472_v19  ;;  %v902_v21 = vrot.slane %v892_v12, 4  ;;  %v901_v22 = vrot.slane %v891_v14, 4  ;;  %v1002_v12 = vld [vmem:[#allocation2 + $0x50] sm:$0xf] }
  0xba   : > { %485 = vst [vmem:[#allocation3 + $0x268] sm:$0xf] %v477_v24  ;;  %v1000_v14 = vld [vmem:[#allocation2 + $0x30] sm:$0xf] }
  0xbb   : > { %486 = vst [vmem:[#allocation3 + $0x358] sm:$0xf] %v478_v25 }
  0xbc   : > { %795 = vrot.lane.b32.xlu2 %v786_v23, %s5590_s30 }
  0xbd   : > { %793 = vrot.lane.b32.xlu1 %v785_v26, %s5590_s30 }
  0xbe   : > { %791 = vrot.lane.b32.xlu0 %v784_v27, %s5590_s30  ;;  %v4340_v29 = vpop.permute.xlu2 %576  ;;  %s5641_s30 = smov 106  }
  0xbf   : > { %v506_v33 = vpop.permute.xlu1 %505 }
  0xc0   : > { %v515_v32 = vsel %vm5638_vm3, %v506_v33, %v4314_v58  ;;  %v4344_v35 = vpop.permute.xlu0 %4098 }
  0xc1   : > { %523 = vst [vmem:[#allocation3 + $0x268] sm:$0xf0] %v515_v32  ;;  %v4100_v37 = vunpack.i.l.bf16 %v4344_v35 }
  0xc3   : > { %v514_v41 = vsel %vm5638_vm3, %v4100_v37, %v506_v33  ;;  %v927_v33 = vld [vmem:[#allocation2 + $0x48] sm:$0xf] }
  0xc4   : > { %522 = vst [vmem:[#allocation3 + $0x2c8] sm:$0xf0] %v514_v41  ;;  %837 = vrot.lane.b32.xlu2 %v830_v36, %s5594_s11 }
  0xc5   : > { %835 = vrot.lane.b32.xlu1 %v829_v38, %s5594_s11  ;;  %v970_v38 = vrot.slane %v960_v34, 4  ;;  %v1141_v34 = vld [vmem:[#allocation2 + $0x8] sm:$0xf] }
  0xc6   : > { %833 = vrot.lane.b32.xlu0 %v828_v40, %s5594_s11  ;;  %v583_v42 = vpop.permute.xlu2 %582 }
  0xc7   : > { %v512_v44 = vpop.permute.xlu1 %511 }
  0xc8   : > { %v510_v46 = vpop.permute.xlu0 %509 }
  0xc9   : > { %v516_v47 = vsel %vm5638_vm3, %v4314_v58, %v510_v46  ;;  %v517_v48 = vsel %vm5638_vm3, %v510_v46, %v512_v44  ;;  %v963_v44 = vld [vmem:[#allocation2 + $0x20] sm:$0xf]  ;;  %v962_v46 = vld [vmem:[#allocation2 + $0x30] sm:$0xf] }
  0xca   : > { %524 = vst [vmem:[#allocation3 + $0x358] sm:$0xf0] %v516_v47 }
  0xcb   : > { %525 = vst [vmem:[#allocation3 + $0x20] sm:$0xf0] %v517_v48 }
  0xcc   : > { %866 = vrot.lane.b32.xlu2 %v856_v50, %s5598_s12 }
  0xcd   : > { %841 = vrot.lane.b32.xlu1 %v832_v49, %s5594_s11  ;;  %v961_v49 = vld [vmem:[#allocation2 + $0x8] sm:$0xf] }
  0xce   : > { %839 = vrot.lane.b32.xlu0 %v831_v51, %s5594_s11  ;;  %v4357_v52 = vpop.permute.xlu2 %611  ;;  %s5649_s11 = smov 87  }
  0xcf   : > { %v541_v54 = vpop.permute.xlu1 %540 }
  0xd0   : > { %v549_v55 = vsel %vm546_vm4, %v541_v54, %v4331_v17  ;;  %v539_v56 = vpop.permute.xlu0 %538 }
  0xd1   : > { %557 = vst [vmem:[#allocation3 + $0x120] sm:$0xf] %v549_v55  ;;  %v547_v57 = vsel %vm546_vm4, %v4105_v53, %v539_v56  ;;  %v548_v58 = vsel %vm546_vm4, %v539_v56, %v541_v54  ;;  %v972_v55 = vrot.slane %v962_v46, 4  ;;  %v971_v56 = vrot.slane %v961_v49, 4 }
  0xd2   : > { %555 = vst [vmem:[#allocation3 + $0x98] sm:$0xf] %v547_v57 }
  0xd3   : > { %556 = vst [vmem:[#allocation3 + $0x348] sm:$0xf] %v548_v58 }
  0xd4   : > { %872 = vrot.lane.b32.xlu2 %v859_v59, %s5598_s12  ;;  %v964_v59 = vld [vmem:[#allocation2 + $0x50] sm:$0xf] }
  0xd5   : > { %870 = vrot.lane.b32.xlu1 %v858_v60, %s5598_s12 }
  0xd6   : > { %868 = vrot.lane.b32.xlu0 %v857_v61, %s5598_s12  ;;  %v4367_v63 = vpop.permute.xlu2 %4118 }
  0xd7   : > { %v4369_v1 = vpop.permute.xlu1 %4108  ;;  %v4120_v47 = vunpack.i.l.bf16 %v4367_v63 }
  0xd8   : > { %v4110_v2 = vunpack.i.l.bf16 %v4369_v1  ;;  %v545_v3 = vpop.permute.xlu0 %544 }
  0xd9   : > { %v550_v6 = vsel %vm546_vm4, %v4331_v17, %v545_v3  ;;  %v998_v3 = vld [vmem:[#allocation2 + $0x48] sm:$0xf] }
  0xda   : > { %v585_v8 = vsel %vm5640_vm5, %v4110_v2, %v4340_v29  ;;  %558 = vst [vmem:[#allocation3 + $0x1e0] sm:$0xf] %v550_v6 }
  0xdb   : > { %593 = vst [vmem:[#allocation3 + $0x98] sm:$0xf0] %v585_v8 }
  0xdc   : > { %906 = vrot.lane.b32.xlu2 %v900_v4, %s5596_s16  ;;  %v974_v4 = vrot.slane %v964_v59, 4 }
  0xdd   : > { %904 = vrot.lane.b32.xlu1 %v899_v7, %s5596_s16 }
  0xde   : > { %874 = vrot.lane.b32.xlu0 %v860_v9, %s5598_s12  ;;  %v4379_v11 = vpop.permute.xlu2 %651  ;;  %s5645_s12 = smov 89  }
  0xdf   : > { %v581_v13 = vpop.permute.xlu1 %580 }
  0xe0   : > { %v588_v16 = vsel %vm5640_vm5, %v581_v13, %v583_v42  ;;  %v579_v17 = vpop.permute.xlu0 %578  ;;  %v931_v42 = vld [vmem:[#allocation2 + $0x50] sm:$0xf] }
  0xe1   : > { %596 = vst [vmem:[#allocation3 + $0x1e0] sm:$0xf0] %v588_v16  ;;  %v586_v19 = vsel %vm5640_vm5, %v4340_v29, %v579_v17  ;;  %v587_v20 = vsel %vm5640_vm5, %v579_v17, %v581_v13  ;;  %v928_v29 = vld [vmem:[#allocation2 + $0x8] sm:$0xf]  ;;  %v1001_v13 = vld [vmem:[#allocation2 + $0x20] sm:$0xf] }
  0xe2   : > { %594 = vst [vmem:[#allocation3 + $0x348] sm:$0xf0] %v586_v19 }
  0xe3   : > { %595 = vst [vmem:[#allocation3 + $0x120] sm:$0xf0] %v587_v20 }
  0xe4   : > { %912 = vrot.lane.b32.xlu2 %v903_v18, %s5596_s16  ;;  %v1031_v18 = vld [vmem:[#allocation2 + $0x48] sm:$0xf] }
  0xe5   : > { %910 = vrot.lane.b32.xlu1 %v902_v21, %s5596_s16 }
  0xe6   : > { %908 = vrot.lane.b32.xlu0 %v901_v22, %s5596_s16  ;;  %v4388_v23 = vpop.permute.xlu2 %680  ;;  %v1212_v22 = vld [vmem:[#allocation2 + $0x8] sm:$0xf]  ;;  %s5647_s16 = smov 90  }
  0xe7   : > { %v610_v24 = vpop.permute.xlu1 %609 }
  0xe8   : > { %v619_v25 = vsel %vm617_vm6, %v610_v24, %v4357_v52  ;;  %v4392_v26 = vpop.permute.xlu0 %4113 }
  0xe9   : > { %627 = vst [vmem:[#allocation3 + $0x320] sm:$0xf] %v619_v25  ;;  %v4115_v27 = vunpack.i.l.bf16 %v4392_v26 }
  0xeb   : > { %v618_v31 = vsel %vm617_vm6, %v4115_v27, %v610_v24  ;;  %v1041_v24 = vrot.slane %v1031_v18, 4 }
  0xec   : > { %626 = vst [vmem:[#allocation3 + $0x60] sm:$0xf] %v618_v31  ;;  %941 = vrot.lane.b32.xlu2 %v929_v28, %s5610_s17 }
  0xed   : > { %939 = vrot.lane.b32.xlu1 %v928_v29, %s5610_s17 }
  0xee   : > { %937 = vrot.lane.b32.xlu0 %v927_v33, %s5610_s17  ;;  %v687_v32 = vpop.permute.xlu2 %686 }
  0xef   : > { %v616_v36 = vpop.permute.xlu1 %615 }
  0xf0   : > { %v614_v37 = vpop.permute.xlu0 %613 }
  0xf1   : > { %v620_v40 = vsel %vm617_vm6, %v4357_v52, %v614_v37  ;;  %v621_v41 = vsel %vm617_vm6, %v614_v37, %v616_v36  ;;  %v973_v52 = vrot.slane %v963_v44, 4  ;;  %v810_v36 = vld [vmem:[#allocation2 + $0x48] sm:$0xf]  ;;  %v1213_v37 = vld [vmem:[#allocation2 + $0x30] sm:$0xf] }
  0xf2   : > { %628 = vst [vmem:[#allocation3 + $0x4b8] sm:$0xf] %v620_v40  ;;  %v1174_v40 = vld [vmem:[#allocation2 + $0x8] sm:$0xf] }
  0xf3   : > { %629 = vst [vmem:[#allocation3 + $0x340] sm:$0xf] %v621_v41  ;;  %v1184_v46 = vrot.slane %v1174_v40, 4 }
  0xf4   : > { %975 = vrot.lane.b32.xlu2 %v970_v38, %s5608_s18  ;;  %v811_v38 = vld [vmem:[#allocation2 + $0x8] sm:$0xf]  ;;  %814 = vst [vmem:[#allocation3 + $0x338] sm:$0xf] %v810_v36  ;;  %v1143_v36 = vld [vmem:[#allocation2 + $0x20] sm:$0xf] }
  0xf5   : > { %945 = vrot.lane.b32.xlu1 %v931_v42, %s5610_s17  ;;  %815 = vst [vmem:[#allocation3 + $0x2a0] sm:$0xf] %v811_v38  ;;  %v1173_v42 = vld [vmem:[#allocation2 + $0x48] sm:$0xf]  ;;  %v1034_v38 = vld [vmem:[#allocation2 + $0x20] sm:$0xf] }
  0xf6   : > { %943 = vrot.lane.b32.xlu0 %v930_v43, %s5610_s17  ;;  %v4405_v45 = vpop.permute.xlu2 %720  ;;  %v1183_v49 = vrot.slane %v1173_v42, 4  ;;  %v1105_v42 = vld [vmem:[#allocation2 + $0x20] sm:$0xf]  ;;  %s5658_s17 = smov 109  }
  0xf7   : > { %v650_v48 = vpop.permute.xlu1 %649 }
  0xf8   : > { %v658_v50 = vsel %vm655_vm7, %v650_v48, %v4379_v11  ;;  %v648_v51 = vpop.permute.xlu0 %647 }
  0xf9   : > { %666 = vst [vmem:[#allocation3 + $0x4b8] sm:$0xf0] %v658_v50  ;;  %v656_v53 = vsel %vm655_vm7, %v4120_v47, %v648_v51  ;;  %v657_v54 = vsel %vm655_vm7, %v648_v51, %v650_v48  ;;  %v812_v50 = vld [vmem:[#allocation2 + $0x30] sm:$0xf]  ;;  %v813_v51 = vld [vmem:[#allocation2 + $0x20] sm:$0xf] }
  0xfa   : > { %664 = vst [vmem:[#allocation3 + $0x60] sm:$0xf0] %v656_v53 }
  0xfb   : > { %665 = vst [vmem:[#allocation3 + $0x320] sm:$0xf0] %v657_v54 }
  0xfc   : > { %981 = vrot.lane.b32.xlu2 %v973_v52, %s5608_s18  ;;  %v1142_v52 = vld [vmem:[#allocation2 + $0x30] sm:$0xf]  ;;  %816 = vst [vmem:[#allocation3 + $0x3e8] sm:$0xf] %v812_v50 }
  0xfd   : > { %979 = vrot.lane.b32.xlu1 %v972_v55, %s5608_s18  ;;  %817 = vst [vmem:[#allocation3 + $0x210] sm:$0xf] %v813_v51  ;;  %v1175_v55 = vld [vmem:[#allocation2 + $0x30] sm:$0xf] }
  0xfe   : > { %977 = vrot.lane.b32.xlu0 %v971_v56, %s5608_s18  ;;  %v4415_v57 = vpop.permute.xlu2 %749  ;;  %v1177_v50 = vld [vmem:[#allocation2 + $0x50] sm:$0xf] }
  0xff   : > { %v4417_v58 = vpop.permute.xlu1 %4123 }
 0x100   : > { %v4125_v60 = vunpack.i.l.bf16 %v4417_v58  ;;  %v654_v61 = vpop.permute.xlu0 %653 }
 0x101   : > { %v659_v62 = vsel %vm655_vm7, %v4379_v11, %v654_v61  ;;  %v1069_v61 = vld [vmem:[#allocation2 + $0x48] sm:$0xf] }
 0x102   : > { %v689_v2 = vsel %vm688_vm8, %v4125_v60, %v4388_v23  ;;  %667 = vst [vmem:[#allocation3 + $0x340] sm:$0xf0] %v659_v62  ;;  %v1070_v60 = vld [vmem:[#allocation2 + $0x8] sm:$0xf]  ;;  %v1185_v62 = vrot.slane %v1175_v55, 4  ;;  %v1187_v55 = vrot.slane %v1177_v50, 4 }
 0x103   : > { %697 = vst [vmem:[#allocation3 + $0x418] sm:$0xf] %v689_v2 }
 0x104   : > { %1010 = vrot.lane.b32.xlu2 %v999_v0, %s5643_s15  ;;  %v1103_v0 = vld [vmem:[#allocation2 + $0x8] sm:$0xf] }
 0x105   : > { %1008 = vrot.lane.b32.xlu1 %v998_v3, %s5643_s15  ;;  %v1102_v3 = vld [vmem:[#allocation2 + $0x48] sm:$0xf] }
 0x106   : > { %983 = vrot.lane.b32.xlu0 %v974_v4, %s5608_s18  ;;  %v4427_v6 = vpop.permute.xlu2 %755  ;;  %s5659_s18 = smov 108  }
 0x107   : > { %v685_v7 = vpop.permute.xlu1 %684 }
 0x108   : > { %v692_v8 = vsel %vm688_vm8, %v685_v7, %v687_v32  ;;  %v683_v9 = vpop.permute.xlu0 %682  ;;  %v1140_v32 = vld [vmem:[#allocation2 + $0x48] sm:$0xf] }
 0x109   : > { %700 = vst [vmem:[#allocation3 + $0x78] sm:$0xf] %v692_v8  ;;  %v690_v10 = vsel %vm688_vm8, %v4388_v23, %v683_v9  ;;  %v691_v11 = vsel %vm688_vm8, %v683_v9, %v685_v7  ;;  %v1211_v23 = vld [vmem:[#allocation2 + $0x48] sm:$0xf] }
 0x10a   : > { %698 = vst [vmem:[#allocation3 + $0x460] sm:$0xf] %v690_v10 }
 0x10b   : > { %699 = vst [vmem:[#allocation3 + $0x350] sm:$0xf] %v691_v11  ;;  %v1112_v11 = vrot.slane %v1102_v3, 4 }
 0x10c   : > { %1016 = vrot.lane.b32.xlu2 %v1002_v12, %s5643_s15  ;;  %v1071_v12 = vld [vmem:[#allocation2 + $0x30] sm:$0xf] }
 0x10d   : > { %1014 = vrot.lane.b32.xlu1 %v1001_v13, %s5643_s15  ;;  %v1033_v13 = vld [vmem:[#allocation2 + $0x30] sm:$0xf] }
 0x10e   : > { %1012 = vrot.lane.b32.xlu0 %v1000_v14, %s5643_s15  ;;  %v4436_v16 = vpop.permute.xlu2 %789 }
 0x10f   : > { %v719_v17 = vpop.permute.xlu1 %718 }
 0x110   : > { %v728_v19 = vsel %vm5600_vm9, %v719_v17, %v4405_v45  ;;  %v4440_v20 = vpop.permute.xlu0 %4128 }
 0x111   : > { %5653 = vst [vmem:[#allocation4_spill] sm:$0xff] %v4440_v20  ;;  %v4130_v21 = vunpack.i.l.bf16 %v4440_v20 }
 0x112   : > { %736 = vst [vmem:[#allocation3 + $0x460] sm:$0xf0] %v728_v19 }
 0x113   : > { %v727_v25 = vsel %vm5600_vm9, %v4130_v21, %v719_v17  ;;  %v1032_v17 = vld [vmem:[#allocation2 + $0x8] sm:$0xf] }
 0x114   : > { %735 = vst [vmem:[#allocation3 + $0x418] sm:$0xf0] %v727_v25  ;;  %1223 = vrot.lane.b32.xlu2 %v1212_v22, %s4171_s28  ;;  %v1043_v22 = vrot.slane %v1033_v13, 4 }
 0x115   : > { %1221 = vrot.lane.b32.xlu1 %v1211_v23, %s4171_s28 }
 0x116   : > { %1046 = vrot.lane.b32.xlu0 %v1041_v24, %s5641_s30  ;;  %v796_v27 = vpop.permute.xlu2 %795  ;;  %v1042_v24 = vrot.slane %v1032_v17, 4 }
 0x117   : > { %v725_v28 = vpop.permute.xlu1 %724 }
 0x118   : > { %v723_v29 = vpop.permute.xlu0 %722 }
 0x119   : > { %v729_v31 = vsel %vm5600_vm9, %v4405_v45, %v723_v29  ;;  %v730_v33 = vsel %vm5600_vm9, %v723_v29, %v725_v28  ;;  %vm5606_vm9 = vcmask 883712  }
 0x11a   : > { %737 = vst [vmem:[#allocation3 + $0x350] sm:$0xf0] %v729_v31 }
 0x11b   : > { %738 = vst [vmem:[#allocation3 + $0x78] sm:$0xf0] %v730_v33 }
 0x11c   : > { %1152 = vrot.lane.b32.xlu2 %v1141_v34, %s5651_s29 }
 0x11d   : > { %1150 = vrot.lane.b32.xlu1 %v1140_v32, %s5651_s29 }
 0x11e   : > { %1225 = vrot.lane.b32.xlu0 %v1213_v37, %s4171_s28  ;;  %v4453_v41 = vpop.permute.xlu2 %837  ;;  %v1214_v37 = vld [vmem:[#allocation2 + $0x20] sm:$0xf] }
 0x11f   : > { %v754_v43 = vpop.permute.xlu1 %753 }
 0x120   : > { %v762_v44 = vsel %vm5602_vm10, %v754_v43, %v4427_v6  ;;  %v752_v45 = vpop.permute.xlu0 %751 }
 0x121   : > { %770 = vst [vmem:[#allocation3 + $0x168] sm:$0xf] %v762_v44  ;;  %v760_v47 = vsel %vm5602_vm10, %v4415_v57, %v752_v45  ;;  %v761_v48 = vsel %vm5602_vm10, %v752_v45, %v754_v43  ;;  %v1044_v45 = vrot.slane %v1034_v38, 4 }
 0x122   : > { %768 = vst [vmem:[#allocation3 + $0x230] sm:$0xf] %v760_v47 }
 0x123   : > { %769 = vst [vmem:[#allocation3 + $0x440] sm:$0xf] %v761_v48  ;;  %v1115_v48 = vrot.slane %v1105_v42, 4 }
 0x124   : > { %1190 = vrot.lane.b32.xlu2 %v1184_v46, %s5649_s11 }
 0x125   : > { %1188 = vrot.lane.b32.xlu1 %v1183_v49, %s5649_s11  ;;  %v1072_v49 = vld [vmem:[#allocation2 + $0x20] sm:$0xf] }
 0x126   : > { %1154 = vrot.lane.b32.xlu0 %v1142_v52, %s5651_s29  ;;  %v4463_v53 = vpop.permute.xlu2 %866 }
 0x127   : > { %v788_v54 = vpop.permute.xlu1 %787 }
 0x128   : > { %v798_v56 = vsel %vm5601_vm11, %v788_v54, %v4436_v16  ;;  %v758_v57 = vpop.permute.xlu0 %757 }
 0x129   : > { %806 = vst [vmem:[#allocation3 + $0x230] sm:$0xf0] %v798_v56  ;;  %v763_v59 = vsel %vm5602_vm10, %v4427_v6, %v758_v57  ;;  %v1113_v6 = vrot.slane %v1103_v0, 4  ;;  %v1144_v57 = vld [vmem:[#allocation2 + $0x50] sm:$0xf]  ;;  %vm1231_vm10 = vcmask 703488  }
 0x12a   : > { %771 = vst [vmem:[#allocation3 + $0x260] sm:$0xf] %v763_v59  ;;  %v1215_v59 = vld [vmem:[#allocation2 + $0x50] sm:$0xf] }
 0x12c   : > { %1081 = vrot.lane.b32.xlu2 %v1070_v60, %s5647_s16  ;;  %v1035_v60 = vld [vmem:[#allocation2 + $0x50] sm:$0xf] }
 0x12d   : > { %1079 = vrot.lane.b32.xlu1 %v1069_v61, %s5647_s16 }
 0x12e   : > { %1192 = vrot.lane.b32.xlu0 %v1185_v62, %s5649_s11  ;;  %v4472_v2 = vpop.permute.xlu2 %872  ;;  %v1106_v62 = vld [vmem:[#allocation2 + $0x50] sm:$0xf] }
 0x12f   : > { %v794_v4 = vpop.permute.xlu1 %793 }
 0x130   : > { %v801_v7 = vsel %vm5601_vm11, %v794_v4, %v796_v27  ;;  %v792_v8 = vpop.permute.xlu0 %791  ;;  %v1176_v27 = vld [vmem:[#allocation2 + $0x20] sm:$0xf] }
 0x131   : > { %809 = vst [vmem:[#allocation3 + $0x260] sm:$0xf0] %v801_v7  ;;  %v799_v9 = vsel %vm5601_vm11, %v4436_v16, %v792_v8  ;;  %v800_v10 = vsel %vm5601_vm11, %v792_v8, %v794_v4  ;;  %v1104_v16 = vld [vmem:[#allocation2 + $0x30] sm:$0xf]  ;;  %v1186_v33 = vrot.slane %v1176_v27, 4  ;;  %v1045_v7 = vrot.slane %v1035_v60, 4 }
 0x132   : > { %807 = vst [vmem:[#allocation3 + $0x440] sm:$0xf0] %v799_v9  ;;  %v1114_v25 = vrot.slane %v1104_v16, 4  ;;  %v1073_v9 = vld [vmem:[#allocation2 + $0x50] sm:$0xf]  ;;  %vm1018_vm11 = vcmask 875520  }
 0x133   : > { %808 = vst [vmem:[#allocation3 + $0x168] sm:$0xf0] %v800_v10 }
 0x134   : > { %1119 = vrot.lane.b32.xlu2 %v1113_v6, %s5645_s12  ;;  %v1116_v6 = vrot.slane %v1106_v62, 4 }
 0x135   : > { %1117 = vrot.lane.b32.xlu1 %v1112_v11, %s5645_s12 }
 0x136   : > { %1083 = vrot.lane.b32.xlu0 %v1071_v12, %s5647_s16  ;;  %v4481_v14 = vpop.permute.xlu2 %906 }
 0x137   : > { %v836_v18 = vpop.permute.xlu1 %835 }
 0x138   : > { %v845_v19 = vsel %vm5603_vm12, %v836_v18, %v4453_v41  ;;  %v834_v21 = vpop.permute.xlu0 %833 }
 0x139   : > { %853 = vst [vmem:[#allocation3 + $0x2a0] sm:$0xf0] %v845_v19  ;;  %v844_v23 = vsel %vm5603_vm12, %v834_v21, %v836_v18 }
 0x13a   : > { %852 = vst [vmem:[#allocation3 + $0x338] sm:$0xf0] %v844_v23 }
 0x13c   : > { %1050 = vrot.lane.b32.xlu2 %v1043_v22, %s5641_s30 }
 0x13d   : > { %1048 = vrot.lane.b32.xlu1 %v1042_v24, %s5641_s30 }
 0x13e   : > { %1121 = vrot.lane.b32.xlu0 %v1114_v25, %s5645_s12  ;;  %v913_v28 = vpop.permute.xlu2 %912 }
 0x13f   : > { %v842_v29 = vpop.permute.xlu1 %841 }
 0x140   : > { %v840_v31 = vpop.permute.xlu0 %839 }
 0x141   : > { %v846_v34 = vsel %vm5603_vm12, %v4453_v41, %v840_v31  ;;  %v847_v32 = vsel %vm5603_vm12, %v840_v31, %v842_v29  ;;  %vm1160_vm12 = vcmask 719872  }
 0x142   : > { %854 = vst [vmem:[#allocation3 + $0x3e8] sm:$0xf0] %v846_v34 }
 0x143   : > { %855 = vst [vmem:[#allocation3 + $0x210] sm:$0xf0] %v847_v32 }
 0x144   : > { %1194 = vrot.lane.b32.xlu2 %v1186_v33, %s5649_s11 }
 0x145   : > { %1156 = vrot.lane.b32.xlu1 %v1143_v36, %s5651_s29 }
 0x146   : > { %1227 = vrot.lane.b32.xlu0 %v1214_v37, %s4171_s28  ;;  %v942_v40 = vpop.permute.xlu2 %941 }
 0x147   : > { %v871_v43 = vpop.permute.xlu1 %870 }
 0x148   : > { %v879_v41 = vsel %vm5605_vm13, %v871_v43, %v4472_v2  ;;  %v869_v44 = vpop.permute.xlu0 %868 }
 0x149   : > { %887 = vst [vmem:[#allocation3 + $0x80] sm:$0xf] %v879_v41  ;;  %v877_v46 = vsel %vm5605_vm13, %v4463_v53, %v869_v44  ;;  %v878_v47 = vsel %vm5605_vm13, %v869_v44, %v871_v43 }
 0x14a   : > { %885 = vst [vmem:[#allocation3 + $0x48] sm:$0xf] %v877_v46 }
 0x14b   : > { %886 = vst [vmem:[#allocation3 + $0x40] sm:$0xf] %v878_v47 }
 0x14c   : > { %1052 = vrot.lane.b32.xlu2 %v1044_v45, %s5641_s30 }
 0x14d   : > { %1123 = vrot.lane.b32.xlu1 %v1115_v48, %s5645_s12 }
 0x14e   : > { %1085 = vrot.lane.b32.xlu0 %v1072_v49, %s5647_s16  ;;  %v976_v51 = vpop.permute.xlu2 %975 }
 0x14f   : > { %v905_v52 = vpop.permute.xlu1 %904 }
 0x150   : > { %v915_v54 = vsel %vm5604_vm14, %v905_v52, %v4481_v14  ;;  %v875_v53 = vpop.permute.xlu0 %874 }
 0x151   : > { %923 = vst [vmem:[#allocation3 + $0x48] sm:$0xf0] %v915_v54  ;;  %v880_v56 = vsel %vm5605_vm13, %v4472_v2, %v875_v53  ;;  %vm1089_vm13 = vcmask 736256  }
 0x152   : > { %888 = vst [vmem:[#allocation3 + $0x290] sm:$0xf] %v880_v56 }
 0x154   : > { %1196 = vrot.lane.b32.xlu2 %v1187_v55, %s5649_s11 }
 0x155   : > { %1158 = vrot.lane.b32.xlu1 %v1144_v57, %s5651_s29 }
 0x156   : > { %1229 = vrot.lane.b32.xlu0 %v1215_v59, %s4171_s28  ;;  %v982_v61 = vpop.permute.xlu2 %981 }
 0x157   : > { %v911_v0 = vpop.permute.xlu1 %910 }
 0x158   : > { %v918_v3 = vsel %vm5604_vm14, %v911_v0, %v913_v28  ;;  %v909_v4 = vpop.permute.xlu0 %908 }
 0x159   : > { %926 = vst [vmem:[#allocation3 + $0x290] sm:$0xf0] %v918_v3  ;;  %v916_v2 = vsel %vm5604_vm14, %v4481_v14, %v909_v4  ;;  %v917_v8 = vsel %vm5604_vm14, %v909_v4, %v911_v0  ;;  %vm1198_vm14 = vcmask 711680  }
 0x15a   : > { %924 = vst [vmem:[#allocation3 + $0x40] sm:$0xf0] %v916_v2 }
 0x15b   : > { %925 = vst [vmem:[#allocation3 + $0x80] sm:$0xf0] %v917_v8 }
 0x15c   : > { %1054 = vrot.lane.b32.xlu2 %v1045_v7, %s5641_s30 }
 0x15d   : > { %1125 = vrot.lane.b32.xlu1 %v1116_v6, %s5645_s12 }
 0x15e   : > { %1087 = vrot.lane.b32.xlu0 %v1073_v9, %s5647_s16  ;;  %v1011_v10 = vpop.permute.xlu2 %1010 }
 0x15f   : > { %v940_v11 = vpop.permute.xlu1 %939 }
 0x160   : > { %v949_v12 = vsel %vm5607_vm15, %v940_v11, %v942_v40  ;;  %v938_v13 = vpop.permute.xlu0 %937 }
 0x161   : > { %957 = vst [vmem:[#allocation3 + $0x1a8] sm:$0xf] %v949_v12  ;;  %v948_v14 = vsel %vm5607_vm15, %v938_v13, %v940_v11 }
 0x162   : > { %956 = vst [vmem:[#allocation3 + $0x438] sm:$0xf] %v948_v14 }
 0x166   : > { %v1017_v17 = vpop.permute.xlu2 %1016 }
 0x167   : > { %v946_v18 = vpop.permute.xlu1 %945 }
 0x168   : > { %v944_v16 = vpop.permute.xlu0 %943 }
 0x169   : > { %v950_v19 = vsel %vm5607_vm15, %v942_v40, %v944_v16  ;;  %v951_v21 = vsel %vm5607_vm15, %v944_v16, %v946_v18  ;;  %vm1127_vm15 = vcmask 728064  }
 0x16a   : > { %958 = vst [vmem:[#allocation3 + $0xf8] sm:$0xf] %v950_v19 }
 0x16b   : > { %959 = vst [vmem:[#allocation3 + $0x180] sm:$0xf] %v951_v21 }
 0x16e   : > { %v1224_v22 = vpop.permute.xlu2 %1223 }
 0x16f   : > { %v980_v23 = vpop.permute.xlu1 %979 }
 0x170   : > { %v988_v24 = vsel %vm5606_vm9, %v980_v23, %v982_v61  ;;  %v978_v25 = vpop.permute.xlu0 %977 }
 0x171   : > { %996 = vst [vmem:[#allocation3 + $0xf8] sm:$0xf0] %v988_v24  ;;  %v986_v27 = vsel %vm5606_vm9, %v976_v51, %v978_v25  ;;  %v987_v28 = vsel %vm5606_vm9, %v978_v25, %v980_v23  ;;  %v1301_v24 = vld [vmem:[%s5579_s3] sm:$0xf] }
 0x172   : > { %994 = vst [vmem:[#allocation3 + $0x438] sm:$0xf0] %v986_v27 }
 0x173   : > { %995 = vst [vmem:[#allocation3 + $0x1a8] sm:$0xf0] %v987_v28  ;;  %v4177_v28 = vmov 0  }
 0x174   : > { %4132 = vset.pattern.permute.xlu0 %v4177_v28  ;;  %4143 = vset.pattern.permute.xlu1 %v4177_v28  ;;  %v1263_v28 = vld [vmem:[#allocation3 + $0x4b8] sm:$0xff] }
 0x175   : > { %1304 = vperm.xlu0 %4132, %v1301_v24   ;;  %v1271_v24 = vld [vmem:[#allocation3 + $0x168] sm:$0xff] }
 0x176   : > { %v1153_v29 = vpop.permute.xlu2 %1152 }
 0x177   : > { %v1009_v31 = vpop.permute.xlu1 %1008 }
 0x178   : > { %v1019_v33 = vsel %vm1018_vm11, %v1009_v31, %v1011_v10  ;;  %v984_v34 = vpop.permute.xlu0 %983 }
 0x179   : > { %1027 = vst [vmem:[#allocation3 + $0x468] sm:$0xf] %v1019_v33  ;;  %v989_v32 = vsel %vm5606_vm9, %v982_v61, %v984_v34  ;;  %vm5612_vm9 = vcmask 867328  }
 0x17a   : > { %997 = vst [vmem:[#allocation3 + $0x180] sm:$0xf0] %v989_v32 }
 0x17e   : > { %v1191_v36 = vpop.permute.xlu2 %1190 }
 0x17f   : > { %v1015_v37 = vpop.permute.xlu1 %1014 }
 0x180   : > { %v1022_v38 = vsel %vm1018_vm11, %v1015_v37, %v1017_v17  ;;  %v1013_v40 = vpop.permute.xlu0 %1012 }
 0x181   : > { %1030 = vst [vmem:[#allocation3 + $0x1e8] sm:$0xf] %v1022_v38  ;;  %v1020_v42 = vsel %vm1018_vm11, %v1011_v10, %v1013_v40  ;;  %v1021_v43 = vsel %vm1018_vm11, %v1013_v40, %v1015_v37  ;;  %v4580_v38 = vld [vmem:[#allocation3 + $0x48] sm:$0xff] }
 0x182   : > { %1028 = vst [vmem:[#allocation3 + $0x188] sm:$0xf] %v1020_v42  ;;  %v4584_v40 = vld [vmem:[#allocation3 + $0x1a8] sm:$0xff]  ;;  %v4586_v42 = vld [vmem:[#allocation3 + $0x338] sm:$0xff] }
 0x183   : > { %1029 = vst [vmem:[#allocation3 + $0x278] sm:$0xf] %v1021_v43 }
 0x186   : > { %v1082_v41 = vpop.permute.xlu2 %1081 }
 0x187   : > { %v1222_v44 = vpop.permute.xlu1 %1221 }
 0x188   : > { %v1232_v45 = vsel %vm1231_vm10, %v1222_v44, %v1224_v22  ;;  %v1047_v46 = vpop.permute.xlu0 %1046  ;;  %v4591_v44 = vld [vmem:[#allocation3 + $0x40] sm:$0xff] }
 0x189   : > { %1240 = vst [vmem:[#allocation3 + $0x2e8] sm:$0xf] %v1232_v45 }
 0x18e   : > { %v1120_v47 = vpop.permute.xlu2 %1119 }
 0x18f   : > { %v1151_v48 = vpop.permute.xlu1 %1150 }
 0x190   : > { %v1161_v49 = vsel %vm1160_vm12, %v1151_v48, %v1153_v29  ;;  %v4531_v50 = vpop.permute.xlu0 %1225  ;;  %v4533_v51 = vld [vmem:[#allocation3 + $0x2e8] sm:$0xff] }
 0x191   : > { %1169 = vst [vmem:[#allocation3 + $0x328] sm:$0xf] %v1161_v49  ;;  %v1233_v52 = vsel %vm1231_vm10, %v1224_v22, %v4531_v50  ;;  %1314 = vmatpush.msra.mxu0 %v4533_v51  ;;  %v4598_v49 = vld [vmem:[#allocation3 + $0x2a0] sm:$0xff] }
 0x192   : > { %1241 = vst [vmem:[#allocation3 + $0x138] sm:$0xf] %v1233_v52 }
 0x196   : > { %v1051_v54 = vpop.permute.xlu2 %1050 }
 0x197   : > { %v1189_v53 = vpop.permute.xlu1 %1188 }
 0x198   : > { %v1199_v55 = vsel %vm1198_vm14, %v1189_v53, %v1191_v36  ;;  %v1155_v56 = vpop.permute.xlu0 %1154  ;;  %v4606_v53 = vld [vmem:[#allocation3 + $0x60] sm:$0xff] }
 0x199   : > { %1207 = vst [vmem:[#allocation3 + $0x328] sm:$0xf0] %v1199_v55  ;;  %v1162_v57 = vsel %vm1160_vm12, %v1153_v29, %v1155_v56  ;;  %v4540_v59 = vld [vmem:[#allocation3 + $0x138] sm:$0xff]  ;;  %v4610_v55 = vld [vmem:[#allocation3 + $0x460] sm:$0xff] }
 0x19a   : > { %1170 = vst [vmem:[#allocation3 + $0x498] sm:$0xf] %v1162_v57  ;;  %1334 = vmatpush.msra.mxu1 %v4540_v59 }
 0x19e   : > { %v1195_v60 = vpop.permute.xlu2 %1194 }
 0x19f   : > { %v1080_v61 = vpop.permute.xlu1 %1079 }
 0x1a0   : > { %v1090_v62 = vsel %vm1089_vm13, %v1080_v61, %v1082_v41  ;;  %v1193_v0 = vpop.permute.xlu0 %1192  ;;  %v4544_v3 = vld [vmem:[#allocation3 + $0x328] sm:$0xff]  ;;  %v4617_v61 = vld [vmem:[#allocation3 + $0x320] sm:$0xff] }
 0x1a1   : > { %1098 = vst [vmem:[#allocation3 + $0x1f0] sm:$0xf] %v1090_v62  ;;  %v1200_v4 = vsel %vm1198_vm14, %v1191_v36, %v1193_v0  ;;  %v1201_v7 = vsel %vm1198_vm14, %v1193_v0, %v1195_v60  ;;  %1315 = vmatpush.msra.mxu0 %v4544_v3  ;;  %v4574_v36 = vld [vmem:[#allocation3 + $0x438] sm:$0xff]  ;;  %v4619_v0 = vld [vmem:[#allocation3 + $0x2c8] sm:$0xff] }
 0x1a2   : > { %1208 = vst [vmem:[#allocation3 + $0x498] sm:$0xf0] %v1200_v4 }
 0x1a3   : > { %1209 = vst [vmem:[#allocation3 + $0x458] sm:$0xf0] %v1201_v7 }
 0x1a6   : > { %v1053_v2 = vpop.permute.xlu2 %1052 }
 0x1a7   : > { %v1118_v8 = vpop.permute.xlu1 %1117  ;;  %v1059_v6 = vsel %vm5612_vm9, %v1051_v54, %v1053_v2 }
 0x1a8   : > { %v1128_v9 = vsel %vm1127_vm15, %v1118_v8, %v1120_v47  ;;  %1067 = vst [vmem:[#allocation3 + $0x278] sm:$0xf0] %v1059_v6  ;;  %v1084_v10 = vpop.permute.xlu0 %1083  ;;  %v4629_v8 = vld [vmem:[#allocation3 + $0x348] sm:$0xff] }
 0x1a9   : > { %1136 = vst [vmem:[#allocation3 + $0x1f0] sm:$0xf0] %v1128_v9  ;;  %v1091_v11 = vsel %vm1089_vm13, %v1082_v41, %v1084_v10  ;;  %v4552_v12 = vld [vmem:[#allocation3 + $0x498] sm:$0xff]  ;;  %v4631_v6 = vld [vmem:[#allocation3 + $0x4c8] sm:$0xff] }
 0x1aa   : > { %1099 = vst [vmem:[#allocation3 + $0x250] sm:$0xf] %v1091_v11  ;;  %1335 = vmatpush.msra.mxu1 %v4552_v12  ;;  %v1283_v11 = vld [vmem:[#allocation3 + $0xf8] sm:$0xff] }
 0x1ae   : > { %v1197_v13 = vpop.permute.xlu2 %1196 }
 0x1af   : > { %v1049_v14 = vpop.permute.xlu1 %1048  ;;  %v1202_v17 = vsel %vm1198_vm14, %v1195_v60, %v1197_v13  ;;  %v1287_v9 = vld [vmem:[#allocation3 + $0x278] sm:$0xff]  ;;  %v4640_v13 = vld [vmem:[#allocation3 + $0x448] sm:$0xff] }
 0x1b0   : > { %v1057_v18 = vsel %vm5612_vm9, %v1047_v46, %v1049_v14  ;;  %v1058_v16 = vsel %vm5612_vm9, %v1049_v14, %v1051_v54  ;;  %1210 = vst [vmem:[#allocation3 + $0x390] sm:$0xf0] %v1202_v17  ;;  %v1122_v19 = vpop.permute.xlu0 %1121  ;;  %v4558_v21 = vld [vmem:[#allocation3 + $0x1f0] sm:$0xff]  ;;  %v4604_v54 = vld [vmem:[#allocation3 + $0x440] sm:$0xff] }
 0x1b1   : > { %1065 = vst [vmem:[#allocation3 + $0x468] sm:$0xf0] %v1057_v18  ;;  %v1129_v22 = vsel %vm1127_vm15, %v1120_v47, %v1122_v19  ;;  %1316 = vmatpush.msra.mxu0 %v4558_v21  ;;  %v4593_v46 = vld [vmem:[#allocation3 + $0x230] sm:$0xff]  ;;  %v1279_v17 = vld [vmem:[#allocation3 + $0x80] sm:$0xff] }
 0x1b2   : > { %1066 = vst [vmem:[#allocation3 + $0x188] sm:$0xf0] %v1058_v16 }
 0x1b3   : > { %1137 = vst [vmem:[#allocation3 + $0x250] sm:$0xf0] %v1129_v22  ;;  %v1275_v22 = vld [vmem:[#allocation3 + $0x3e8] sm:$0xff] }
 0x1b6   : > { %v1055_v23 = vpop.permute.xlu2 %1054 }
 0x1b7   : > { %v1157_v25 = vpop.permute.xlu1 %1156  ;;  %v1060_v27 = vsel %vm5612_vm9, %v1053_v2, %v1055_v23  ;;  %v4627_v2 = vld [vmem:[%s5578_s2] sm:$0xf]  ;;  %vm1307_vm9 = vcmask 850944  }
 0x1b8   : > { %v1163_v29 = vsel %vm1160_vm12, %v1155_v56, %v1157_v25  ;;  %1068 = vst [vmem:[#allocation3 + $0x1e8] sm:$0xf0] %v1060_v27  ;;  %v1228_v31 = vpop.permute.xlu0 %1227  ;;  %v4567_v33 = vld [vmem:[#allocation3 + $0x468] sm:$0xff]  ;;  %v4612_v56 = vld [vmem:[#allocation3 + $0x98] sm:$0xff]  ;;  %v1267_v27 = vld [vmem:[#allocation3 + $0x350] sm:$0xff] }
 0x1b9   : > { %1171 = vst [vmem:[#allocation3 + $0x458] sm:$0xf] %v1163_v29  ;;  %v1234_v34 = vsel %vm1231_vm10, %v4531_v50, %v1228_v31  ;;  %1317 = vmatpush.msra.mxu0 %v4567_v33  ;;  %v4578_v37 = vld [vmem:[#allocation3 + $0x188] sm:$0xff]  ;;  %v4600_v50 = vld [vmem:[#allocation3 + $0x418] sm:$0xff]  ;;  %v1259_v29 = vld [vmem:[#allocation3 + $0x120] sm:$0xff] }
 0x1ba   : > { %1242 = vst [vmem:[#allocation3 + $0x178] sm:$0xf] %v1234_v34  ;;  %v4572_v32 = vld [vmem:[#allocation3 + $0x250] sm:$0xff]  ;;  %v1255_v34 = vld [vmem:[#allocation3 + $0x358] sm:$0xff] }
 0x1bb   : > { %1336 = vmatpush.msra.mxu1 %v4572_v32  ;;  %1318 = vmatpush.msra.mxu0 %v4574_v36 }
 0x1bd   : > { %1337 = vmatpush.msra.mxu1 %v4578_v37  ;;  %1319 = vmatpush.msra.mxu0 %v4580_v38 }
 0x1bf   : > { %1338 = vmatpush.msra.mxu1 %v4584_v40  ;;  %v1124_v43 = vpop.permute.xlu1 %1123  ;;  %1320 = vmatpush.msra.mxu0 %v4586_v42 }
 0x1c0   : > { %v1130_v41 = vsel %vm1127_vm15, %v1122_v19, %v1124_v43  ;;  %v1086_v45 = vpop.permute.xlu0 %1085  ;;  %v1295_v52 = vld [vmem:[#allocation3 + $0x458] sm:$0xff] }
 0x1c1   : > { %1138 = vst [vmem:[#allocation3 + $0x30] sm:$0xf0] %v1130_v41  ;;  %1339 = vmatpush.msra.mxu1 %v4591_v44  ;;  %v1092_v47 = vsel %vm1089_vm13, %v1084_v10, %v1086_v45  ;;  %1321 = vmatpush.msra.mxu0 %v4593_v46  ;;  %v1299_v48 = vld [vmem:[#allocation3 + $0x178] sm:$0xff]  ;;  %v4635_v10 = vld [vmem:[#allocation3 + $0x268] sm:$0xff]  ;;  %v1251_v41 = vld [vmem:[#allocation3 + $0x2d0] sm:$0xff] }
 0x1c2   : > { %1100 = vst [vmem:[#allocation3 + $0x30] sm:$0xf] %v1092_v47  ;;  %1354 = vmatpush.msra.mxu2 %v1299_v48  ;;  %v4664_v47 = vld [vmem:[#allocation3 + $0x290] sm:$0xff] }
 0x1c3   : > { %1340 = vmatpush.msra.mxu1 %v4598_v49  ;;  %1322 = vmatpush.msra.mxu0 %v4600_v50  ;;  %v4667_v48 = vld [vmem:[#allocation3 + $0x210] sm:$0xff] }
 0x1c4   : > { %1355 = vmatpush.msra.mxu2 %v1295_v52  ;;  %v4670_v52 = vld [vmem:[#allocation3 + $0x260] sm:$0xff] }
 0x1c5   : > { %1341 = vmatpush.msra.mxu1 %v4604_v54  ;;  %1323 = vmatpush.msra.mxu0 %v4606_v53 }
 0x1c7   : > { %1342 = vmatpush.msra.mxu1 %v4610_v55  ;;  %v1159_v57 = vpop.permute.xlu1 %1158  ;;  %1324 = vmatpush.msra.mxu0 %v4612_v56 }
 0x1c8   : > { %v1164_v60 = vsel %vm1160_vm12, %v1157_v25, %v1159_v57  ;;  %v1230_v62 = vpop.permute.xlu0 %1229  ;;  %v4673_v57 = vld [vmem:[#allocation3 + $0x78] sm:$0xff] }
 0x1c9   : > { %1172 = vst [vmem:[#allocation3 + $0x390] sm:$0xf] %v1164_v60  ;;  %1343 = vmatpush.msra.mxu1 %v4617_v61  ;;  %v1235_v4 = vsel %vm1231_vm10, %v1228_v31, %v1230_v62  ;;  %1325 = vmatpush.msra.mxu0 %v4619_v0  ;;  %v1291_v7 = vld [vmem:[#allocation3 + $0x30] sm:$0xff]  ;;  %v4676_v60 = vld [vmem:[#allocation3 + $0x340] sm:$0xff] }
 0x1ca   : > { %1243 = vst [vmem:[#allocation3 + $0x2b0] sm:$0xf] %v1235_v4  ;;  %1356 = vmatpush.msra.mxu2 %v1291_v7  ;;  %v4679_v62 = vld [vmem:[#allocation3 + $0x1e0] sm:$0xff]  ;;  %v4685_v7 = vld [vmem:[#allocation3 + $0x4b0] sm:$0xff] }
 0x1cb   : > { %1344 = vmatpush.msra.mxu1 %v4629_v8  ;;  %1326 = vmatpush.msra.mxu0 %v4631_v6  ;;  %v4682_v4 = vld [vmem:[#allocation3 + $0x20] sm:$0xff]  ;;  %5655 = vst [vmem:[#allocation6_spill] sm:$0xff] %v4685_v7 }
 0x1cc   : > { %1357 = vmatpush.msra.mxu2 %v1287_v9  ;;  %4028 = vmatmul.msk.f32.vlgmr.msra.gmra.mxu0 %vm1307_vm9, %v4627_v2  ;;  %5654 = vst [vmem:[#allocation5_spill] sm:$0xff] %v4682_v4 }
 0x1cd   : > { %1345 = vmatpush.msra.mxu1 %v4635_v10 }
 0x1ce   : > { %1358 = vmatpush.msra.mxu2 %v1283_v11  ;;  %v383_v11 = vld [vmem:[%s5577_s1] sm:$0xf] }
 0x1cf   : > { %1346 = vmatpush.msra.mxu1 %v4640_v13  ;;  %v1126_v14 = vpop.permute.xlu1 %1125 }
 0x1d0   : > { %v1131_v18 = vsel %vm1127_vm15, %v1124_v43, %v1126_v14  ;;  %1359 = vmatpush.msra.mxu2 %v1279_v17  ;;  %v1088_v16 = vpop.permute.xlu0 %1087  ;;  %4029 = vmatmul.msk.f32.vlgmr.msra.gmra.mxu1 %vm1307_vm9, %v4627_v2  ;;  %v4650_v25 = vld [vmem:[#allocation3 + $0x390] sm:$0xff]  ;;  %v4656_v43 = vld [vmem:[#allocation3 + $0x1e8] sm:$0xff] }
 0x1d1   : > { %1139 = vst [vmem:[#allocation3 + $0xa0] sm:$0xf0] %v1131_v18  ;;  %v1093_v19 = vsel %vm1089_vm13, %v1086_v45, %v1088_v16  ;;  %v4647_v23 = vld [vmem:[#allocation3 + $0x2b0] sm:$0xff]  ;;  %v4659_v45 = vld [vmem:[#allocation3 + $0x180] sm:$0xff]  ;;  %v4693_v18 = vperm.slane %v383_v11, 0 }
 0x1d2   : > { %1101 = vst [vmem:[#allocation3 + $0xa0] sm:$0xf] %v1093_v19  ;;  %1360 = vmatpush.msra.mxu2 %v1275_v22  ;;  %1374 = vmatpush.msra.mxu3 %v4647_v23 }
 0x1d3   : > { %5656 = vst [vmem:[#allocation7_spill] sm:$0xff] %v4693_v18 }
 0x1d4   : > { %1361 = vmatpush.msra.mxu2 %v1271_v24  ;;  %1375 = vmatpush.msra.mxu3 %v4650_v25 }
 0x1d6   : > { %1362 = vmatpush.msra.mxu2 %v1267_v27  ;;  %v4696_v27 = vperm.slane %v383_v11, 1 }
 0x1d8   : > { %1363 = vmatpush.msra.mxu2 %v1263_v28  ;;  %5657 = vst [vmem:[#allocation8_spill] sm:$0xff] %v4696_v27 }
 0x1d9   : > { %v4653_v31 = vld [vmem:[#allocation3 + $0xa0] sm:$0xff] }
 0x1da   : > { %1364 = vmatpush.msra.mxu2 %v1259_v29  ;;  %1376 = vmatpush.msra.mxu3 %v4653_v31 }
 0x1dc   : > { %1365 = vmatpush.msra.mxu2 %v1255_v34  ;;  %1377 = vmatpush.msra.mxu3 %v4656_v43 }
 0x1de   : > { %1366 = vmatpush.msra.mxu2 %v1251_v41  ;;  %1378 = vmatpush.msra.mxu3 %v4659_v45 }
 0x1df   : > { %4030 = vmatmul.msk.f32.vlgmr.msra.gmra.mxu2 %vm1307_vm9, %v4627_v2 }
 0x1e0   : > { %1379 = vmatpush.msra.mxu3 %v4664_v47 }
 0x1e2   : > { %1380 = vmatpush.msra.mxu3 %v4667_v48 }
 0x1e4   : > { %1381 = vmatpush.msra.mxu3 %v4670_v52 }
 0x1e6   : > { %1382 = vmatpush.msra.mxu3 %v4673_v57 }
 0x1e7   : > { %v1305_v9 = vpop.permute.xlu0 %1304 }
 0x1e8   : > { %1383 = vmatpush.msra.mxu3 %v4676_v60 }
 0x1ea   : > { %1384 = vmatpush.msra.mxu3 %v4679_v62 }
 0x1ec   : > { %1385 = vmatpush.msra.mxu3 %v4682_v4 }
 0x1ee   : > { %1386 = vmatpush.msra.mxu3 %v4685_v7 }
 0x1ef   : > { %4031 = vmatmul.msk.f32.vlgmr.msra.gmra.mxu3 %vm1307_vm9, %v4627_v2  ;;  %vm5668_vm9 = vcmask 867328  }
 0x249   : > { %v1328_v14 = vpop.f32.mrf.mxu0 }
 0x24a   : > { %v1329_v17 = vadd.f32 %v1328_v14, %v1305_v9 }
 0x24c   : > { %v1391_v16 = vmax.f32 %v1329_v17, 0.0 }
 0x24d   : > { %v1348_v19 = vpop.f32.mrf.mxu1 }
 0x24e   : > { %v1404_v22 = vmul.f32 %v4693_v18, %v1391_v16  ;;  %v1349_v24 = vadd.f32 %v1348_v19, %v1305_v9 }
 0x250   : > { %v1412_v28 = vrot.slane %v1404_v22, 4  ;;  %v1392_v29 = vmax.f32 %v1349_v24, 0.0  ;;  %v4702_v22 = vperm.slane %v383_v11, 2 }
 0x252   : > { %1420 = vst [vmem:[#allocation2 + $0x48] sm:$0xf0] %v1412_v28  ;;  %v1405_v2 = vmul.f32 %v4696_v27, %v1392_v29 }
 0x254   : > { %v1413_v34 = vrot.slane %v1405_v2, 4 }
 0x256   : > { %1421 = vst [vmem:[#allocation2 + $0x8] sm:$0xf0] %v1413_v34 }
 0x259   : > { %v1462_v41 = vld [vmem:[#allocation2 + $0x48] sm:$0xf0] }
 0x25a   : > { %v1425_v20 = vld [vmem:[#allocation2 + $0x48] sm:$0xf0]  ;;  %1473 = vrot.lane.b32.xlu0 %v1462_v41, %s5620_s20 }
 0x25b   : > { %v1435_v14 = vrot.slane %v1425_v20, 4 }
 0x25d   : > { %1441 = vrot.lane.b32.xlu1 %v1435_v14, %s5622_s21  ;;  %v1426_v17 = vld [vmem:[#allocation2 + $0x8] sm:$0xf0]  ;;  %v4705_v14 = vperm.slane %v383_v11, 3 }
 0x25e   : > { %v1436_v7 = vrot.slane %v1426_v17, 4  ;;  %v1839_v2 = vld [vmem:[#allocation2 + $0x8] sm:$0xf0] }
 0x25f   : > { %v1847_v34 = vrot.slane %v1839_v2, 4  ;;  %v1494_v2 = vld [vmem:[#allocation2 + $0x48] sm:$0xf0] }
 0x260   : > { %1443 = vrot.lane.b32.xlu2 %v1436_v7, %s5622_s21  ;;  %v1838_v7 = vld [vmem:[#allocation2 + $0x48] sm:$0xf0] }
 0x261   : > { %1855 = vst [vmem:[#allocation3 + $0x208] sm:$0xf] %v1847_v34  ;;  %v1846_v4 = vrot.slane %v1838_v7, 4  ;;  %v1504_v34 = vrot.slane %v1494_v2, 4  ;;  %v1563_v2 = vld [vmem:[#allocation2 + $0x48] sm:$0xf0] }
 0x262   : > { %v1368_v16 = vpop.f32.mrf.mxu2 }
 0x263   : > { %v1369_v19 = vadd.f32 %v1368_v16, %v1305_v9  ;;  %1854 = vst [vmem:[#allocation3 + $0x130] sm:$0xf] %v1846_v4 }
 0x265   : > { %v1393_v24 = vmax.f32 %v1369_v19, 0.0 }
 0x267   : > { %v1406_v28 = vmul.f32 %v4702_v22, %v1393_v24  ;;  %v1463_v24 = vld [vmem:[#allocation2 + $0x8] sm:$0xf0] }
 0x269   : > { %v1414_v29 = vrot.slane %v1406_v28, 4 }
 0x26b   : > { %1422 = vst [vmem:[#allocation2 + $0x30] sm:$0xf0] %v1414_v29 }
 0x272   : > { %v1388_v41 = vpop.f32.mrf.mxu3  ;;  %v1427_v20 = vld [vmem:[#allocation2 + $0x30] sm:$0xf0] }
 0x273   : > { %v1389_v18 = vadd.f32 %v1388_v41, %v1305_v9  ;;  %v1437_v17 = vrot.slane %v1427_v20, 4  ;;  %v1840_v28 = vld [vmem:[#allocation2 + $0x30] sm:$0xf0] }
 0x274   : > { %v1848_v29 = vrot.slane %v1840_v28, 4 }
 0x275   : > { %v1394_v27 = vmax.f32 %v1389_v18, 0.0  ;;  %1445 = vrot.lane.b32.xlu1 %v1437_v17, %s5622_s21  ;;  %v1464_v17 = vld [vmem:[#allocation2 + $0x30] sm:$0xf0] }
 0x276   : > { %1856 = vst [vmem:[#allocation3 + $0x420] sm:$0xf] %v1848_v29  ;;  %v1533_v29 = vld [vmem:[#allocation2 + $0x30] sm:$0xf0] }
 0x277   : > { %v1407_v16 = vmul.f32 %v4705_v14, %v1394_v27  ;;  %v1496_v27 = vld [vmem:[#allocation2 + $0x30] sm:$0xf0] }
 0x278   : > { %v1506_v20 = vrot.slane %v1496_v27, 4 }
 0x279   : > { %v1415_v19 = vrot.slane %v1407_v16, 4 }
 0x27b   : > { %1423 = vst [vmem:[#allocation2 + $0x20] sm:$0xf0] %v1415_v19  ;;  %v1495_v19 = vld [vmem:[#allocation2 + $0x8] sm:$0xf0] }
 0x27c   : > { %v1505_v28 = vrot.slane %v1495_v19, 4 }
 0x27d   : > { %1475 = vrot.lane.b32.xlu1 %v1463_v24, %s5620_s20  ;;  %v1532_v24 = vld [vmem:[#allocation2 + $0x8] sm:$0xf0] }
 0x282   : > { %v1465_v9 = vld [vmem:[#allocation2 + $0x20] sm:$0xf0] }
 0x283   : > { %v1428_v11 = vld [vmem:[#allocation2 + $0x20] sm:$0xf0]  ;;  %1479 = vrot.lane.b32.xlu0 %v1465_v9, %s5620_s20  ;;  %v1564_v9 = vld [vmem:[#allocation2 + $0x8] sm:$0xf0] }
 0x284   : > { %v1438_v18 = vrot.slane %v1428_v11, 4  ;;  %v1497_v41 = vld [vmem:[#allocation2 + $0x20] sm:$0xf0]  ;;  %v1573_v11 = vrot.slane %v1563_v2, 4 }
 0x285   : > { %1510 = vrot.lane.b32.xlu1 %v1504_v34, %s5626_s19  ;;  %v1507_v4 = vrot.slane %v1497_v41, 4  ;;  %v1841_v7 = vld [vmem:[#allocation2 + $0x20] sm:$0xf0]  ;;  %v1531_v34 = vld [vmem:[#allocation2 + $0x48] sm:$0xf0] }
 0x286   : > { %1447 = vrot.lane.b32.xlu2 %v1438_v18, %s5622_s21  ;;  %v1849_v16 = vrot.slane %v1841_v7, 4  ;;  %v1574_v18 = vrot.slane %v1564_v9, 4  ;;  %v1566_v27 = vld [vmem:[#allocation2 + $0x20] sm:$0xf0]  ;;  %v1602_v7 = vld [vmem:[#allocation2 + $0x30] sm:$0xf0] }
 0x287   : > { %v1576_v41 = vrot.slane %v1566_v27, 4  ;;  %v1603_v19 = vld [vmem:[#allocation2 + $0x20] sm:$0xf0]  ;;  %v1601_v9 = vld [vmem:[#allocation2 + $0x8] sm:$0xf0]  ;;  %s5661_s21 = smov 110  }
 0x288   : > { %1857 = vst [vmem:[#allocation3 + $0x430] sm:$0xf] %v1849_v16  ;;  %v1670_v27 = vld [vmem:[#allocation2 + $0x8] sm:$0xf0] }
 0x28b   : > { %1514 = vrot.lane.b32.xlu0 %v1506_v20, %s5626_s19  ;;  %v1534_v20 = vld [vmem:[#allocation2 + $0x20] sm:$0xf0] }
 0x28d   : > { %1516 = vrot.lane.b32.xlu1 %v1507_v4, %s5626_s19  ;;  %v1600_v4 = vld [vmem:[#allocation2 + $0x48] sm:$0xf0] }
 0x28e   : > { %1477 = vrot.lane.b32.xlu2 %v1464_v17, %s5620_s20  ;;  %v1565_v17 = vld [vmem:[#allocation2 + $0x30] sm:$0xf0]  ;;  %s5660_s20 = smov 126  }
 0x28f   : > { %v1575_v16 = vrot.slane %v1565_v17, 4 }
 0x293   : > { %1544 = vrot.lane.b32.xlu0 %v1532_v24, %s5624_s22  ;;  %v1633_v24 = vld [vmem:[#allocation2 + $0x8] sm:$0xf0] }
 0x295   : > { %1546 = vrot.lane.b32.xlu1 %v1533_v29, %s5624_s22  ;;  %v1643_v29 = vrot.slane %v1633_v24, 4 }
 0x296   : > { %1512 = vrot.lane.b32.xlu2 %v1505_v28, %s5626_s19  ;;  %v1634_v28 = vld [vmem:[#allocation2 + $0x30] sm:$0xf0]  ;;  %s5663_s19 = smov 2  }
 0x297   : > { %v1644_v2 = vrot.slane %v1634_v28, 4  ;;  %v4091_v28 = vunpack.i.h.bf16 %v4283_v15 }
 0x29b   : > { %1579 = vrot.lane.b32.xlu0 %v1573_v11, %s5630_s23  ;;  %v1632_v11 = vld [vmem:[#allocation2 + $0x48] sm:$0xf0] }
 0x29d   : > { %1581 = vrot.lane.b32.xlu1 %v1574_v18, %s5630_s23  ;;  %v1669_v18 = vld [vmem:[#allocation2 + $0x48] sm:$0xf0] }
 0x29e   : > { %1542 = vrot.lane.b32.xlu2 %v1531_v34, %s5624_s22  ;;  %v1642_v34 = vrot.slane %v1632_v11, 4  ;;  %v4086_v11 = vunpack.i.h.bf16 %v4303_v39 }
 0x2a3   : > { %1585 = vrot.lane.b32.xlu0 %v1576_v41, %s5630_s23  ;;  %v1635_v41 = vld [vmem:[#allocation2 + $0x20] sm:$0xf0] }
 0x2a4   : > { %v1645_v17 = vrot.slane %v1635_v41, 4  ;;  %v2237_v41 = vld [vmem:[#allocation2 + $0x30] sm:$0xf0] }
 0x2a5   : > { %1611 = vrot.lane.b32.xlu1 %v1600_v4, %s5628_s24  ;;  %v1672_v4 = vld [vmem:[#allocation2 + $0x20] sm:$0xf0] }
 0x2a6   : > { %1548 = vrot.lane.b32.xlu2 %v1534_v20, %s5624_s22  ;;  %v1701_v20 = vld [vmem:[#allocation2 + $0x48] sm:$0xf0]  ;;  %s5662_s22 = smov 127  }
 0x2ab   : > { %1615 = vrot.lane.b32.xlu0 %v1602_v7, %s5628_s24  ;;  %v1711_v7 = vrot.slane %v1701_v20, 4 }
 0x2ad   : > { %1617 = vrot.lane.b32.xlu1 %v1603_v19, %s5628_s24  ;;  %v1704_v19 = vld [vmem:[#allocation2 + $0x20] sm:$0xf0] }
 0x2ae   : > { %1583 = vrot.lane.b32.xlu2 %v1575_v16, %s5630_s23  ;;  %v1703_v16 = vld [vmem:[#allocation2 + $0x30] sm:$0xf0]  ;;  %s5665_s23 = smov 18  }
 0x2af   : > { %v1713_v24 = vrot.slane %v1703_v16, 4 }
 0x2b3   : > { %1650 = vrot.lane.b32.xlu0 %v1643_v29, %s5634_s25  ;;  %v1714_v29 = vrot.slane %v1704_v19, 4  ;;  %v2236_v19 = vld [vmem:[#allocation2 + $0x8] sm:$0xf0] }
 0x2b5   : > { %1652 = vrot.lane.b32.xlu1 %v1644_v2, %s5634_s25  ;;  %v1671_v2 = vld [vmem:[#allocation2 + $0x30] sm:$0xf0] }
 0x2b6   : > { %1613 = vrot.lane.b32.xlu2 %v1601_v9, %s5628_s24  ;;  %s5664_s24 = smov 1  }
 0x2bb   : > { %1680 = vrot.lane.b32.xlu0 %v1669_v18, %s5632_s26 }
 0x2bd   : > { %1682 = vrot.lane.b32.xlu1 %v1670_v27, %s5632_s26 }
 0x2be   : > { %1648 = vrot.lane.b32.xlu2 %v1642_v34, %s5634_s25  ;;  %v1444_v34 = vpop.permute.xlu2 %1443 }
 0x2c3   : > { %1686 = vrot.lane.b32.xlu0 %v1672_v4, %s5632_s26  ;;  %v1702_v4 = vld [vmem:[#allocation2 + $0x8] sm:$0xf0] }
 0x2c4   : > { %v1712_v39 = vrot.slane %v1702_v4, 4 }
 0x2c5   : > { %1717 = vrot.lane.b32.xlu1 %v1711_v7, %s4161_s27  ;;  %v2247_v7 = vrot.slane %v2237_v41, 4 }
 0x2c6   : > { %1654 = vrot.lane.b32.xlu2 %v1645_v17, %s5634_s25  ;;  %v2167_v17 = vld [vmem:[#allocation2 + $0x8] sm:$0xf0]  ;;  %s5705_s25 = smov 21  }
 0x2c7   : > { %v2177_v16 = vrot.slane %v2167_v17, 4 }
 0x2cb   : > { %1721 = vrot.lane.b32.xlu0 %v1713_v24, %s4161_s27  ;;  %v2204_v24 = vld [vmem:[#allocation2 + $0x8] sm:$0xf0] }
 0x2cc   : > { %v1474_v9 = vpop.permute.xlu0 %1473 }
 0x2cd   : > { %v1481_v18 = vsel %vm5636_vm2, %v4091_v28, %v1474_v9  ;;  %1723 = vrot.lane.b32.xlu1 %v1714_v29, %s4161_s27  ;;  %v2246_v28 = vrot.slane %v2236_v19, 4  ;;  %v2205_v29 = vld [vmem:[#allocation2 + $0x30] sm:$0xf0] }
 0x2ce   : > { %1684 = vrot.lane.b32.xlu2 %v1671_v2, %s5632_s26  ;;  %1489 = vst [vmem:[#allocation3 + $0xc0] sm:$0xf0] %v1481_v18  ;;  %v2099_v2 = vld [vmem:[#allocation2 + $0x30] sm:$0xf0]  ;;  %s5706_s26 = smov 20  }
 0x2cf   : > { %v1442_v27 = vpop.permute.xlu1 %1441  ;;  %v2168_v18 = vld [vmem:[#allocation2 + $0x30] sm:$0xf0] }
 0x2d0   : > { %v1449_v20 = vsel %vm5637_vm1, %v4086_v11, %v1442_v27  ;;  %v1450_v15 = vsel %vm5637_vm1, %v1442_v27, %v1444_v34  ;;  %v2109_v27 = vrot.slane %v2099_v2, 4  ;;  %v2178_v41 = vrot.slane %v2168_v18, 4  ;;  %v2030_v19 = vld [vmem:[#allocation2 + $0x30] sm:$0xf0] }
 0x2d1   : > { %1457 = vst [vmem:[#allocation3 + $0xc0] sm:$0xf] %v1449_v20  ;;  %v2135_v20 = vld [vmem:[#allocation2 + $0x8] sm:$0xf0] }
 0x2d2   : > { %1458 = vst [vmem:[#allocation3 + $0x318] sm:$0xf] %v1450_v15  ;;  %v2029_v15 = vld [vmem:[#allocation2 + $0x8] sm:$0xf0] }
 0x2d3   : > { %2254 = vrot.lane.b32.xlu0 %v2247_v7, %s4171_s28 }
 0x2d5   : > { %2183 = vrot.lane.b32.xlu1 %v2177_v16, %s5651_s29  ;;  %v2098_v16 = vld [vmem:[#allocation2 + $0x8] sm:$0xf0] }
 0x2d6   : > { %1719 = vrot.lane.b32.xlu2 %v1712_v39, %s4161_s27 }
 0x2db   : > { %2215 = vrot.lane.b32.xlu0 %v2204_v24, %s5649_s11  ;;  %v2039_v24 = vrot.slane %v2029_v15, 4  ;;  %v2136_v15 = vld [vmem:[#allocation2 + $0x30] sm:$0xf0] }
 0x2dd   : > { %2217 = vrot.lane.b32.xlu1 %v2205_v29, %s5649_s11  ;;  %v2040_v29 = vrot.slane %v2030_v19, 4 }
 0x2de   : > { %2252 = vrot.lane.b32.xlu2 %v2246_v28, %s4171_s28  ;;  %v2108_v28 = vrot.slane %v2098_v16, 4  ;;  %v1961_v16 = vld [vmem:[#allocation2 + $0x30] sm:$0xf0] }
 0x2e0   : > { %v1448_v11 = vpop.permute.xlu2 %1447 }
 0x2e3   : > { %2116 = vrot.lane.b32.xlu0 %v2109_v27, %s5647_s16 }
 0x2e5   : > { %2146 = vrot.lane.b32.xlu1 %v2135_v20, %s5645_s12 }
 0x2e6   : > { %2185 = vrot.lane.b32.xlu2 %v2178_v41, %s5651_s29  ;;  %v2067_v41 = vld [vmem:[#allocation2 + $0x30] sm:$0xf0] }
 0x2e7   : > { %v1446_v17 = vpop.permute.xlu1 %1445 }
 0x2e8   : > { %v1478_v4 = vpop.permute.xlu2 %1477  ;;  %v1451_v7 = vsel %vm5637_vm1, %v1444_v34, %v1446_v17  ;;  %v1452_v39 = vsel %vm5637_vm1, %v1446_v17, %v1448_v11  ;;  %v2235_v11 = vld [vmem:[#allocation2 + $0x48] sm:$0xf0]  ;;  %vm5677_vm1 = vcmask 7168  }
 0x2e9   : > { %1459 = vst [vmem:[#allocation3 + $0x398] sm:$0xf] %v1451_v7  ;;  %v2245_v20 = vrot.slane %v2235_v11, 4  ;;  %v4096_v7 = vunpack.i.h.bf16 %v4290_v30  ;;  %v2066_v30 = vld [vmem:[#allocation2 + $0x8] sm:$0xf0] }
 0x2ea   : > { %1460 = vst [vmem:[#allocation3 + $0x1c0] sm:$0xf] %v1452_v39  ;;  %v4101_v39 = vunpack.i.h.bf16 %v4344_v35  ;;  %v1997_v35 = vld [vmem:[#allocation2 + $0x8] sm:$0xf0] }
 0x2eb   : > { %2045 = vrot.lane.b32.xlu0 %v2039_v24, %s5643_s15  ;;  %v2166_v11 = vld [vmem:[#allocation2 + $0x48] sm:$0xf0] }
 0x2ed   : > { %2047 = vrot.lane.b32.xlu1 %v2040_v29, %s5643_s15 }
 0x2ee   : > { %2114 = vrot.lane.b32.xlu2 %v2108_v28, %s5647_s16 }
 0x2ef   : > { %v1476_v18 = vpop.permute.xlu1 %1475 }
 0x2f0   : > { %v1513_v2 = vpop.permute.xlu2 %1512  ;;  %v1482_v27 = vsel %vm5636_vm2, %v1474_v9, %v1476_v18  ;;  %v1483_v34 = vsel %vm5636_vm2, %v1476_v18, %v1478_v4 }
 0x2f1   : > { %1490 = vst [vmem:[#allocation3 + $0x318] sm:$0xf0] %v1482_v27  ;;  %v1971_v27 = vrot.slane %v1961_v16, 4 }
 0x2f2   : > { %1491 = vst [vmem:[#allocation3 + $0x398] sm:$0xf0] %v1483_v34 }
 0x2f3   : > { %2079 = vrot.lane.b32.xlu0 %v2067_v41, %s5641_s30 }
 0x2f5   : > { %v1480_v17 = vpop.permute.xlu0 %1479  ;;  %2250 = vrot.lane.b32.xlu1 %v2245_v20, %s4171_s28 }
 0x2f6   : > { %2148 = vrot.lane.b32.xlu2 %v2136_v15, %s5645_s12  ;;  %v1484_v9 = vsel %vm5636_vm2, %v1478_v4, %v1480_v17  ;;  %v1960_v17 = vld [vmem:[#allocation2 + $0x8] sm:$0xf0]  ;;  %vm5670_vm2 = vcmask 883712  }
 0x2f7   : > { %1492 = vst [vmem:[#allocation3 + $0x1c0] sm:$0xf0] %v1484_v9  ;;  %v1511_v24 = vpop.permute.xlu1 %1510  ;;  %v2203_v9 = vld [vmem:[#allocation2 + $0x48] sm:$0xf0] }
 0x2f8   : > { %v1543_v19 = vpop.permute.xlu2 %1542  ;;  %v1518_v29 = vsel %vm5639_vm0, %v4096_v7, %v1511_v24  ;;  %v1519_v18 = vsel %vm5639_vm0, %v1511_v24, %v1513_v2  ;;  %v2176_v7 = vrot.slane %v2166_v11, 4  ;;  %v1892_v24 = vld [vmem:[#allocation2 + $0x30] sm:$0xf0] }
 0x2f9   : > { %v1550_v28 = vsel %vm5638_vm3, %v4101_v39, %v1543_v19  ;;  %1526 = vst [vmem:[#allocation3 + $0x2e0] sm:$0xf] %v1518_v29  ;;  %v1970_v39 = vrot.slane %v1960_v17, 4 }
 0x2fa   : > { %1558 = vst [vmem:[#allocation3 + $0x2e0] sm:$0xf0] %v1550_v28 }
 0x2fb   : > { %1527 = vst [vmem:[#allocation3 + $0x220] sm:$0xf] %v1519_v18  ;;  %1978 = vrot.lane.b32.xlu0 %v1971_v27, %s5658_s17 }
 0x2fd   : > { %v1515_v4 = vpop.permute.xlu0 %1514  ;;  %2008 = vrot.lane.b32.xlu1 %v1997_v35, %s5659_s18  ;;  %v4106_v35 = vunpack.i.h.bf16 %v4323_v5 }
 0x2fe   : > { %2077 = vrot.lane.b32.xlu2 %v2066_v30, %s5641_s30  ;;  %v1520_v34 = vsel %vm5639_vm0, %v1513_v2, %v1515_v4  ;;  %v1902_v30 = vrot.slane %v1892_v24, 4  ;;  %v4111_v24 = vunpack.i.h.bf16 %v4369_v1 }
 0x2ff   : > { %1528 = vst [vmem:[#allocation3 + $0x3f8] sm:$0xf] %v1520_v34  ;;  %v1517_v20 = vpop.permute.xlu1 %1516  ;;  %v1928_v34 = vld [vmem:[#allocation2 + $0x8] sm:$0xf0] }
 0x300   : > { %v1549_v41 = vpop.permute.xlu2 %1548  ;;  %v1521_v15 = vsel %vm5639_vm0, %v1515_v4, %v1517_v20  ;;  %v1998_v4 = vld [vmem:[#allocation2 + $0x30] sm:$0xf0]  ;;  %v2097_v20 = vld [vmem:[#allocation2 + $0x48] sm:$0xf0] }
 0x301   : > { %1529 = vst [vmem:[#allocation3 + $0x8] sm:$0xf] %v1521_v15  ;;  %v2107_v5 = vrot.slane %v2097_v20, 4 }
 0x303   : > { %2181 = vrot.lane.b32.xlu0 %v2176_v7, %s5651_s29 }
 0x305   : > { %v1545_v16 = vpop.permute.xlu0 %1544  ;;  %2213 = vrot.lane.b32.xlu1 %v2203_v9, %s5649_s11 }
 0x306   : > { %1976 = vrot.lane.b32.xlu2 %v1970_v39, %s5658_s17  ;;  %v1551_v2 = vsel %vm5638_vm3, %v1543_v19, %v1545_v16  ;;  %v1891_v39 = vld [vmem:[#allocation2 + $0x8] sm:$0xf0] }
 0x307   : > { %1559 = vst [vmem:[#allocation3 + $0x220] sm:$0xf0] %v1551_v2  ;;  %v1547_v29 = vpop.permute.xlu1 %1546  ;;  %v1901_v9 = vrot.slane %v1891_v39, 4 }
 0x308   : > { %v1584_v28 = vpop.permute.xlu2 %1583  ;;  %v1552_v18 = vsel %vm5638_vm3, %v1545_v16, %v1547_v29  ;;  %v1553_v27 = vsel %vm5638_vm3, %v1547_v29, %v1549_v41  ;;  %v2134_v16 = vld [vmem:[#allocation2 + $0x48] sm:$0xf0]  ;;  %v4116_v29 = vunpack.i.h.bf16 %v4392_v26  ;;  %v1929_v26 = vld [vmem:[#allocation2 + $0x30] sm:$0xf0]  ;;  %vm5685_vm3 = vcmask 1039360  }
 0x309   : > { %1560 = vst [vmem:[#allocation3 + $0x3f8] sm:$0xf0] %v1552_v18 }
 0x30a   : > { %1561 = vst [vmem:[#allocation3 + $0x8] sm:$0xf0] %v1553_v27 }
 0x30b   : > { %1909 = vrot.lane.b32.xlu0 %v1902_v30, %s5660_s20 }
 0x30d   : > { %v1580_v19 = vpop.permute.xlu0 %1579  ;;  %1939 = vrot.lane.b32.xlu1 %v1928_v34, %s5661_s21 }
 0x30e   : > { %2010 = vrot.lane.b32.xlu2 %v1998_v4, %s5659_s18  ;;  %v1587_v11 = vsel %vm546_vm4, %v4106_v35, %v1580_v19 }
 0x30f   : > { %1595 = vst [vmem:[#allocation3 + $0x170] sm:$0xf] %v1587_v11  ;;  %v1582_v41 = vpop.permute.xlu1 %1581  ;;  %v1860_v11 = vld [vmem:[#allocation2 + $0x30] sm:$0xf0] }
 0x310   : > { %v1614_v15 = vpop.permute.xlu2 %1613  ;;  %v1588_v17 = vsel %vm546_vm4, %v1580_v19, %v1582_v41  ;;  %v1589_v7 = vsel %vm546_vm4, %v1582_v41, %v1584_v28  ;;  %v2028_v19 = vld [vmem:[#allocation2 + $0x48] sm:$0xf0] }
 0x311   : > { %1596 = vst [vmem:[#allocation3 + $0x198] sm:$0xf] %v1588_v17  ;;  %v2038_v1 = vrot.slane %v2028_v19, 4  ;;  %v1770_v41 = vld [vmem:[#allocation2 + $0x48] sm:$0xf0] }
 0x312   : > { %1597 = vst [vmem:[#allocation3 + $0x2a8] sm:$0xf] %v1589_v7 }
 0x313   : > { %2112 = vrot.lane.b32.xlu0 %v2107_v5, %s5647_s16 }
 0x315   : > { %v1586_v2 = vpop.permute.xlu0 %1585  ;;  %2144 = vrot.lane.b32.xlu1 %v2134_v16, %s5645_s12  ;;  %v1771_v16 = vld [vmem:[#allocation2 + $0x8] sm:$0xf0] }
 0x316   : > { %1907 = vrot.lane.b32.xlu2 %v1901_v9, %s5660_s20  ;;  %v1590_v18 = vsel %vm546_vm4, %v1584_v28, %v1586_v2  ;;  %v1780_v9 = vrot.slane %v1770_v41, 4 }
 0x317   : > { %1598 = vst [vmem:[#allocation3 + $0x1f8] sm:$0xf] %v1590_v18  ;;  %v1612_v30 = vpop.permute.xlu1 %1611  ;;  %v1781_v18 = vrot.slane %v1771_v16, 4 }
 0x318   : > { %v1649_v27 = vpop.permute.xlu2 %1648  ;;  %v1619_v4 = vsel %vm5640_vm5, %v4111_v24, %v1612_v30  ;;  %v1620_v34 = vsel %vm5640_vm5, %v1612_v30, %v1614_v15  ;;  %v2333_v24 = vld [vmem:[#allocation3 + $0x2e0] sm:$0xff] }
 0x319   : > { %v1656_v35 = vsel %vm617_vm6, %v4116_v29, %v1649_v27  ;;  %1627 = vst [vmem:[#allocation3 + $0x170] sm:$0xf0] %v1619_v4  ;;  %v1859_v29 = vld [vmem:[#allocation2 + $0x8] sm:$0xf0] }
 0x31a   : > { %1664 = vst [vmem:[#allocation3 + $0x90] sm:$0xf] %v1656_v35  ;;  %v2329_v35 = vld [vmem:[#allocation3 + $0xc0] sm:$0xff] }
 0x31b   : > { %1628 = vst [vmem:[#allocation3 + $0x198] sm:$0xf0] %v1620_v34  ;;  %1872 = vrot.lane.b32.xlu0 %v1860_v11, %s5662_s22  ;;  %v4812_v34 = vld [vmem:[#allocation3 + $0x318] sm:$0xff] }
 0x31d   : > { %v1616_v28 = vpop.permute.xlu0 %1615  ;;  %2043 = vrot.lane.b32.xlu1 %v2038_v1, %s5643_s15 }
 0x31e   : > { %1941 = vrot.lane.b32.xlu2 %v1929_v26, %s5661_s21  ;;  %v1621_v20 = vsel %vm5640_vm5, %v1614_v15, %v1616_v28  ;;  %v4806_v15 = vld [vmem:[#allocation3 + $0x220] sm:$0xff] }
 0x31f   : > { %1629 = vst [vmem:[#allocation3 + $0x2a8] sm:$0xf0] %v1621_v20  ;;  %v1618_v7 = vpop.permute.xlu1 %1617  ;;  %v4121_v20 = vunpack.i.h.bf16 %v4367_v63 }
 0x320   : > { %v1655_v17 = vpop.permute.xlu2 %1654  ;;  %v1622_v39 = vsel %vm5640_vm5, %v1616_v28, %v1618_v7  ;;  %v2337_v5 = vld [vmem:[#allocation3 + $0x170] sm:$0xff]  ;;  %v1808_v28 = vld [vmem:[#allocation2 + $0x8] sm:$0xf0] }
 0x321   : > { %1630 = vst [vmem:[#allocation3 + $0x1f8] sm:$0xf0] %v1622_v39  ;;  %2395 = vmatpush.msrb.mxu0 %v2337_v5  ;;  %v2944_v39 = vld [vmem:[#allocation2] sm:$0xf] }
 0x322   : > { %v4802_v2 = vld [vmem:[#allocation3 + $0x198] sm:$0xff] }
 0x323   : > { %2435 = vmatpush.msrb.mxu2 %v4802_v2  ;;  %1786 = vrot.lane.b32.xlu0 %v1780_v9, %s5663_s19 }
 0x324   : > { %2396 = vmatpush.msrb.mxu0 %v2333_v24 }
 0x325   : > { %2436 = vmatpush.msrb.mxu2 %v4806_v15  ;;  %v1651_v30 = vpop.permute.xlu0 %1650  ;;  %1788 = vrot.lane.b32.xlu1 %v1781_v18, %s5663_s19  ;;  %v1769_v18 = vld [vmem:[#allocation2 + $0x18] sm:$0xf0] }
 0x326   : > { %1870 = vrot.lane.b32.xlu2 %v1859_v29, %s5662_s22  ;;  %v1657_v4 = vsel %vm617_vm6, %v1649_v27, %v1651_v30  ;;  %2397 = vmatpush.msrb.mxu0 %v2329_v35  ;;  %v1959_v27 = vld [vmem:[#allocation2 + $0x48] sm:$0xf0]  ;;  %v2332_v35 = vld [vmem:[#allocation3 + $0x1c0] sm:$0xff] }
 0x327   : > { %1665 = vst [vmem:[#allocation3 + $0x480] sm:$0xf] %v1657_v4  ;;  %2437 = vmatpush.msrb.mxu2 %v4812_v34  ;;  %v1653_v11 = vpop.permute.xlu1 %1652  ;;  %v1969_v41 = vrot.slane %v1959_v27, 4  ;;  %v1890_v29 = vld [vmem:[#allocation2 + $0x48] sm:$0xf0] }
 0x328   : > { %v1685_v19 = vpop.permute.xlu2 %1684  ;;  %2398 = vmatpush.msrb.mxu0 %v4533_v51  ;;  %v1658_v1 = vsel %vm617_vm6, %v1651_v30, %v1653_v11  ;;  %v1659_v26 = vsel %vm617_vm6, %v1653_v11, %v1655_v17  ;;  %v2065_v51 = vld [vmem:[#allocation2 + $0x48] sm:$0xf0]  ;;  %v2340_v24 = vld [vmem:[#allocation3 + $0x1f8] sm:$0xff]  ;;  %v1900_v30 = vrot.slane %v1890_v29, 4  ;;  %v2169_v11 = vld [vmem:[#allocation2 + $0x20] sm:$0xf0] }
 0x329   : > { %2438 = vmatpush.msrb.mxu2 %v4540_v59  ;;  %1666 = vst [vmem:[#allocation3 + $0x470] sm:$0xf] %v1658_v1  ;;  %v2912_v1 = vld [vmem:[#allocation2] sm:$0xf]  ;;  %v2031_v29 = vld [vmem:[#allocation2 + $0x20] sm:$0xf0] }
 0x32a   : > { %1667 = vst [vmem:[#allocation3 + $0x3b0] sm:$0xf] %v1659_v26  ;;  %2399 = vmatpush.msrb.mxu0 %v4544_v3  ;;  %v2170_v26 = vld [vmem:[#allocation2 + $0x50] sm:$0xf0] }
 0x32b   : > { %2439 = vmatpush.msrb.mxu2 %v4552_v12  ;;  %1820 = vrot.lane.b32.xlu0 %v1808_v28, %s5664_s24 }
 0x32c   : > { %2400 = vmatpush.msrb.mxu0 %v4558_v21 }
 0x32d   : > { %2440 = vmatpush.msrb.mxu2 %v4572_v32  ;;  %v1681_v59 = vpop.permute.xlu0 %1680  ;;  %1974 = vrot.lane.b32.xlu1 %v1969_v41, %s5658_s17  ;;  %v1738_v32 = vld [vmem:[#allocation2 + $0x48] sm:$0xf0]  ;;  %v2179_v41 = vrot.slane %v2169_v11, 4 }
 0x32e   : > { %2075 = vrot.lane.b32.xlu2 %v2065_v51, %s5641_s30  ;;  %v1688_v17 = vsel %vm655_vm7, %v4121_v20, %v1681_v59  ;;  %2401 = vmatpush.msrb.mxu0 %v4567_v33  ;;  %v1807_v33 = vld [vmem:[#allocation2 + $0x48] sm:$0xf0] }
 0x32f   : > { %1696 = vst [vmem:[#allocation3 + $0x90] sm:$0xf0] %v1688_v17  ;;  %2441 = vmatpush.msrb.mxu2 %v4578_v37  ;;  %v1683_v63 = vpop.permute.xlu1 %1682  ;;  %v1739_v37 = vld [vmem:[#allocation2 + $0x8] sm:$0xf0] }
 0x330   : > { %v1720_v3 = vpop.permute.xlu2 %1719  ;;  %2402 = vmatpush.msrb.mxu0 %v4574_v36  ;;  %v1689_v12 = vsel %vm655_vm7, %v1681_v59, %v1683_v63  ;;  %v1690_v21 = vsel %vm655_vm7, %v1683_v63, %v1685_v19  ;;  %v2239_v63 = vld [vmem:[#allocation2 + $0x50] sm:$0xf0] }
 0x331   : > { %2442 = vmatpush.msrb.mxu2 %v4584_v40  ;;  %1697 = vst [vmem:[#allocation3 + $0x480] sm:$0xf0] %v1689_v12  ;;  %v4126_v40 = vunpack.i.h.bf16 %v4417_v58  ;;  %v1927_v58 = vld [vmem:[#allocation2 + $0x48] sm:$0xf0] }
 0x332   : > { %1698 = vst [vmem:[#allocation3 + $0x470] sm:$0xf0] %v1690_v21  ;;  %2403 = vmatpush.msrb.mxu0 %v4580_v38  ;;  %v2249_v21 = vrot.slane %v2239_v63, 4  ;;  %v2069_v63 = vld [vmem:[#allocation2 + $0x50] sm:$0xf0] }
 0x333   : > { %2443 = vmatpush.msrb.mxu2 %v4591_v44  ;;  %1749 = vrot.lane.b32.xlu0 %v1738_v32, %s5665_s23  ;;  %v2100_v32 = vld [vmem:[#allocation2 + $0x20] sm:$0xf0] }
 0x334   : > { %2404 = vmatpush.msrb.mxu0 %v4586_v42 }
 0x335   : > { %2444 = vmatpush.msrb.mxu2 %v4598_v49  ;;  %v1687_v36 = vpop.permute.xlu0 %1686  ;;  %1751 = vrot.lane.b32.xlu1 %v1739_v37, %s5665_s23 }
 0x336   : > { %1818 = vrot.lane.b32.xlu2 %v1807_v33, %s5664_s24  ;;  %v1691_v7 = vsel %vm655_vm7, %v1685_v19, %v1687_v36  ;;  %2405 = vmatpush.msrb.mxu0 %v4593_v46  ;;  %v2954_v46 = vrot.slane %v2944_v39, 4  ;;  %v1779_v19 = vrot.slane %v1769_v18, 4  ;;  %v2101_v39 = vld [vmem:[#allocation2 + $0x50] sm:$0xf0] }
 0x337   : > { %1699 = vst [vmem:[#allocation3 + $0x3b0] sm:$0xf0] %v1691_v7  ;;  %2445 = vmatpush.msrb.mxu2 %v4604_v54  ;;  %v1718_v42 = vpop.permute.xlu1 %1717  ;;  %v1806_v54 = vld [vmem:[#allocation2 + $0x18] sm:$0xf0]  ;;  %v2138_v7 = vld [vmem:[#allocation2 + $0x50] sm:$0xf0] }
 0x338   : > { %v4845_v38 = vpop.permute.xlu2 %2252  ;;  %2406 = vmatpush.msrb.mxu0 %v4600_v50  ;;  %v1725_v44 = vsel %vm688_vm8, %v4126_v40, %v1718_v42  ;;  %v1726_v49 = vsel %vm688_vm8, %v1718_v42, %v1720_v3  ;;  %v1996_v50 = vld [vmem:[#allocation2 + $0x48] sm:$0xf0]  ;;  %v4133_v59 = vpack.i.bf16 %v2912_v1, %v1779_v19  ;;  %v2137_v40 = vld [vmem:[#allocation2 + $0x20] sm:$0xf0]  ;;  %v2032_v42 = vld [vmem:[#allocation2 + $0x50] sm:$0xf0] }
 0x339   : > { %2446 = vmatpush.msrb.mxu2 %v4610_v55  ;;  %1733 = vst [vmem:[#allocation3 + $0x10] sm:$0xf] %v1725_v44  ;;  %v1858_v55 = vld [vmem:[#allocation2 + $0x48] sm:$0xf0]  ;;  %v3438_v1 = vld [vmem:[#allocation3 + $0x40] sm:$0xff] }
 0x33a   : > { %1734 = vst [vmem:[#allocation3 + $0x2f0] sm:$0xf] %v1726_v49  ;;  %2407 = vmatpush.msrb.mxu0 %v4606_v53  ;;  %v5666_v44 = vld [vmem:[#allocation5_spill] sm:$0xff] }
 0x33b   : > { %2447 = vmatpush.msrb.mxu2 %v4617_v61  ;;  %1937 = vrot.lane.b32.xlu0 %v1927_v58, %s5661_s21  ;;  %v4138_v61 = vpack.i.bf16 %v2954_v46, %v1806_v54  ;;  %v5667_v58 = vld [vmem:[#allocation6_spill] sm:$0xff]  ;;  %v3442_v19 = vld [vmem:[#allocation3 + $0x1a8] sm:$0xff] }
 0x33c   : > { %2408 = vmatpush.msrb.mxu0 %v4612_v56 }
 0x33d   : > { %2448 = vmatpush.msrb.mxu2 %v4629_v8  ;;  %v1722_v5 = vpop.permute.xlu0 %1721  ;;  %1868 = vrot.lane.b32.xlu1 %v1858_v55, %s5662_s22  ;;  %v2276_v8 = vld [vmem:[%s5580_s4] sm:$0xff] }
 0x33e   : > { %2006 = vrot.lane.b32.xlu2 %v1996_v50, %s5659_s18  ;;  %v1727_v9 = vsel %vm688_vm8, %v1720_v3, %v1722_v5  ;;  %2409 = vmatpush.msrb.mxu0 %v4619_v0  ;;  %2388 = vst [vmem:[#allocation1] ss:$2 sm:$0xff] %v2276_v8  ;;  %v2238_v0 = vld [vmem:[#allocation2 + $0x20] sm:$0xf0]  ;;  %v3454_v8 = vld [vmem:[#allocation3 + $0x498] sm:$0xff] }
 0x33f   : > { %1735 = vst [vmem:[#allocation3 + $0xe0] sm:$0xf] %v1727_v9  ;;  %2449 = vmatpush.msrb.mxu2 %v4635_v10  ;;  %v1724_v56 = vpop.permute.xlu1 %1723  ;;  %v2336_v10 = vld [vmem:[#allocation3 + $0x8] sm:$0xff]  ;;  %v2248_v4 = vrot.slane %v2238_v0, 4  ;;  %v3458_v9 = vld [vmem:[#allocation3 + $0x138] sm:$0xff]  ;;  %v3450_v0 = vld [vmem:[#allocation3 + $0x250] sm:$0xff] }
 0x340   : > { %v4861_v53 = vpop.permute.xlu2 %2185  ;;  %2410 = vmatpush.msrb.mxu0 %v4631_v6  ;;  %v1728_v16 = vsel %vm688_vm8, %v1722_v5, %v1724_v56  ;;  %v2111_v5 = vrot.slane %v2101_v39, 4  ;;  %v1999_v39 = vld [vmem:[#allocation2 + $0x20] sm:$0xf0] }
 0x341   : > { %2450 = vmatpush.msrb.mxu2 %v4640_v13  ;;  %1736 = vst [vmem:[#allocation3 + $0x4c0] sm:$0xf] %v1728_v16 }
 0x342   : > { %2515 = vmatpush.msra.mxu0 %v2340_v24 }
 0x343   : > { %4139 = vrot.lane.b32.xlu0 %v4138_v61, %s5664_s24  ;;  %v1962_v61 = vld [vmem:[#allocation2 + $0x20] sm:$0xf0] }
 0x344   : > { %2516 = vmatpush.msra.mxu0 %v2336_v10  ;;  %v1972_v10 = vrot.slane %v1962_v61, 4 }
 0x345   : > { %v4871_v6 = vpop.permute.xlu0 %2254  ;;  %2256 = vrot.lane.b32.xlu1 %v2248_v4, %s4171_s28  ;;  %v4882_v20 = vld.sshfl [vmem:[#allocation1] sm:$0xff pattern:$0x75316420] }
 0x346   : > { %2517 = vmatpush.msra.mxu0 %v2332_v35  ;;  %1905 = vrot.lane.b32.xlu2 %v1900_v30, %s5660_s20  ;;  %v2261_v13 = vsel %vm1231_vm10, %v4845_v38, %v4871_v6  ;;  %v3446_v30 = vld [vmem:[#allocation3 + $0x188] sm:$0xff]  ;;  %v2041_v35 = vrot.slane %v2031_v29, 4 }
 0x347   : > { %2269 = vst [vmem:[#allocation3 + $0x378] sm:$0xf] %v2261_v13  ;;  %v4880_v28 = vpop.permute.xlu1 %2183  ;;  %2411 = vmatmul.f32.vlgmr.msrb.gmra.mxu0 %v4882_v20  ;;  %2451 = vmatmul.f32.vlgmr.msrb.gmra.mxu2 %v4882_v20 }
 0x348   : > { %2518 = vmatpush.msra.mxu0 %v4647_v23  ;;  %v4878_v27 = vpop.permute.xlu2 %2114  ;;  %v2192_v51 = vsel %vm1160_vm12, %v4880_v28, %v4861_v53  ;;  %v2180_v23 = vrot.slane %v2170_v26, 4 }
 0x349   : > { %2200 = vst [vmem:[#allocation3 + $0xb8] sm:$0xf] %v2192_v51 }
 0x34a   : > { %2519 = vmatpush.msra.mxu0 %v4650_v25 }
 0x34b   : > { %2187 = vrot.lane.b32.xlu0 %v2179_v41, %s5651_s29 }
 0x34c   : > { %2520 = vmatpush.msra.mxu0 %v4653_v31 }
 0x34d   : > { %v4894_v17 = vpop.permute.xlu0 %2215  ;;  %2189 = vrot.lane.b32.xlu1 %v2180_v23, %s5651_s29  ;;  %v3434_v23 = vld [vmem:[#allocation3 + $0x2a0] sm:$0xff] }
 0x34e   : > { %2521 = vmatpush.msra.mxu0 %v4656_v43  ;;  %4134 = vrot.lane.b32.xlu2 %v4133_v59, %s5663_s19  ;;  %v2378_v3 = vld [vmem:[#allocation3 + $0x378] sm:$0xff]  ;;  %v2207_v43 = vld [vmem:[#allocation2 + $0x50] sm:$0xf0] }
 0x34f   : > { %2461 = vmatpush.msrb.mxu3 %v2378_v3  ;;  %v4900_v12 = vpop.permute.xlu1 %2217  ;;  %v2000_v59 = vld [vmem:[#allocation2 + $0x50] sm:$0xf0]  ;;  %v1893_v3 = vld [vmem:[#allocation2 + $0x20] sm:$0xf0] }
 0x350   : > { %2522 = vmatpush.msra.mxu0 %v4659_v45  ;;  %v4898_v25 = vpop.permute.xlu2 %2148  ;;  %v2224_v31 = vsel %vm1198_vm14, %v4894_v17, %v4900_v12  ;;  %v2110_v45 = vrot.slane %v2100_v32, 4  ;;  %v3426_v32 = vld [vmem:[#allocation3 + $0x460] sm:$0xff] }
 0x351   : > { %2232 = vst [vmem:[#allocation3 + $0xb8] sm:$0xf0] %v2224_v31  ;;  %v3430_v31 = vld [vmem:[#allocation3 + $0x440] sm:$0xff] }
 0x352   : > { %2523 = vmatpush.msra.mxu0 %v4664_v47 }
 0x353   : > { %2221 = vrot.lane.b32.xlu0 %v2207_v43, %s5649_s11  ;;  %v1903_v43 = vrot.slane %v1893_v3, 4 }
 0x354   : > { %2524 = vmatpush.msra.mxu0 %v4667_v48 }
 0x355   : > { %v4910_v33 = vpop.permute.xlu0 %2116  ;;  %2118 = vrot.lane.b32.xlu1 %v2110_v45, %s5647_s16 }
 0x356   : > { %2525 = vmatpush.msra.mxu0 %v4670_v52  ;;  %2258 = vrot.lane.b32.xlu2 %v2249_v21, %s4171_s28  ;;  %v2123_v36 = vsel %vm1089_vm13, %v4878_v27, %v4910_v33 }
 0x357   : > { %2131 = vst [vmem:[#allocation3 + $0x370] sm:$0xf] %v2123_v36  ;;  %v4919_v48 = vpop.permute.xlu1 %2146 }
 0x358   : > { %2526 = vmatpush.msra.mxu0 %v4673_v57  ;;  %v4917_v47 = vpop.permute.xlu2 %2077  ;;  %v2155_v52 = vsel %vm1127_vm15, %v4919_v48, %v4898_v25  ;;  %v2374_v37 = vld [vmem:[#allocation3 + $0xb8] sm:$0xff]  ;;  %v2206_v57 = vld [vmem:[#allocation2 + $0x20] sm:$0xf0] }
 0x359   : > { %2163 = vst [vmem:[#allocation3 + $0x370] sm:$0xf0] %v2155_v52  ;;  %2462 = vmatpush.msrb.mxu3 %v2374_v37  ;;  %v3422_v52 = vld [vmem:[#allocation3 + $0x320] sm:$0xff] }
 0x35a   : > { %2527 = vmatpush.msra.mxu0 %v4676_v60 }
 0x35b   : > { %2150 = vrot.lane.b32.xlu0 %v2137_v40, %s5645_s12 }
 0x35c   : > { %2528 = vmatpush.msra.mxu0 %v4679_v62  ;;  %v2042_v62 = vrot.slane %v2032_v42, 4  ;;  %v1930_v42 = vld [vmem:[#allocation2 + $0x20] sm:$0xf0] }
 0x35d   : > { %v4929_v49 = vpop.permute.xlu0 %2045  ;;  %2152 = vrot.lane.b32.xlu1 %v2138_v7, %s5645_s12 }
 0x35e   : > { %2529 = vmatpush.msra.mxu0 %v5666_v44  ;;  %2219 = vrot.lane.b32.xlu2 %v2206_v57, %s5649_s11  ;;  %v3418_v57 = vld [vmem:[#allocation3 + $0x348] sm:$0xff]  ;;  %v1931_v44 = vld [vmem:[#allocation2 + $0x50] sm:$0xf0] }
 0x35f   : > { %v4935_v46 = vpop.permute.xlu1 %2047 }
 0x360   : > { %2530 = vmatpush.msra.mxu0 %v5667_v58  ;;  %v4933_v60 = vpop.permute.xlu2 %1976  ;;  %v2054_v50 = vsel %vm1018_vm11, %v4929_v49, %v4935_v46  ;;  %v2370_v54 = vld [vmem:[#allocation3 + $0x370] sm:$0xff] }
 0x361   : > { %2062 = vst [vmem:[#allocation3 + $0x360] sm:$0xf] %v2054_v50  ;;  %2463 = vmatpush.msrb.mxu3 %v2370_v54  ;;  %2531 = vmatmul.f32.vlgmr.msra.gmra.mxu0 %v4882_v20  ;;  %v1894_v50 = vld [vmem:[#allocation2 + $0x50] sm:$0xf0] }
 0x362   : > { %3644 = vmatpush.msrb.mxu0 %v4802_v2  ;;  %v2068_v2 = vld [vmem:[#allocation2 + $0x20] sm:$0xf0]  ;;  %v1904_v61 = vrot.slane %v1894_v50, 4 }
 0x363   : > { %2051 = vrot.lane.b32.xlu0 %v2042_v62, %s5643_s15  ;;  %v3410_v62 = vld [vmem:[#allocation3 + $0x448] sm:$0xff] }
 0x364   : > { %3645 = vmatpush.msrb.mxu0 %v4806_v15 }
 0x365   : > { %v4946_v55 = vpop.permute.xlu0 %2079  ;;  %2081 = vrot.lane.b32.xlu1 %v2068_v2, %s5641_s30 }
 0x366   : > { %3646 = vmatpush.msrb.mxu0 %v4812_v34  ;;  %2120 = vrot.lane.b32.xlu2 %v2111_v5, %s5647_s16  ;;  %v2086_v56 = vsel %vm5668_vm9, %v4917_v47, %v4946_v55  ;;  %v1963_v34 = vld [vmem:[#allocation2 + $0x50] sm:$0xf0]  ;;  %vm5669_vm9 = vcmask 891904  }
 0x367   : > { %2094 = vst [vmem:[#allocation3 + $0x360] sm:$0xf0] %v2086_v56  ;;  %v2251_v16 = vpop.permute.xlu1 %2250  ;;  %v1973_v18 = vrot.slane %v1963_v34, 4  ;;  %v1862_v56 = vld [vmem:[#allocation2 + $0x50] sm:$0xf0] }
 0x368   : > { %3647 = vmatpush.msrb.mxu0 %v3458_v9  ;;  %v4952_v15 = vpop.permute.xlu2 %2010  ;;  %v2260_v24 = vsel %vm1231_vm10, %v2251_v16, %v4845_v38 }
 0x369   : > { %2268 = vst [vmem:[#allocation3 + $0x308] sm:$0xf] %v2260_v24 }
 0x36a   : > { %3648 = vmatpush.msrb.mxu0 %v3454_v8  ;;  %v1772_v8 = vld [vmem:[#allocation2 + $0x30] sm:$0xf0] }
 0x36b   : > { %1980 = vrot.lane.b32.xlu0 %v1972_v10, %s5658_s17  ;;  %v1782_v16 = vrot.slane %v1772_v8, 4 }
 0x36c   : > { %3649 = vmatpush.msrb.mxu0 %v3450_v0 }
 0x36d   : > { %v4958_v4 = vpop.permute.xlu0 %1978  ;;  %1982 = vrot.lane.b32.xlu1 %v1973_v18, %s5658_s17 }
 0x36e   : > { %3650 = vmatpush.msrb.mxu0 %v3446_v30  ;;  %2049 = vrot.lane.b32.xlu2 %v2041_v35, %s5643_s15  ;;  %v1985_v38 = vsel %vm5669_vm9, %v4933_v60, %v4958_v4  ;;  %v2366_v13 = vld [vmem:[#allocation3 + $0x360] sm:$0xff]  ;;  %vm5672_vm9 = vcmask 900096   ;;  %v1809_v35 = vld [vmem:[#allocation2 + $0x30] sm:$0xf0] }
 0x36f   : > { %1993 = vst [vmem:[#allocation3 + $0x150] sm:$0xf] %v1985_v38  ;;  %2464 = vmatpush.msrb.mxu3 %v2366_v13  ;;  %v4966_v26 = vpop.permute.xlu1 %2008  ;;  %v1810_v38 = vld [vmem:[#allocation2 + $0x20] sm:$0xf0] }
 0x370   : > { %3651 = vmatpush.msrb.mxu0 %v3442_v19  ;;  %v4964_v11 = vpop.permute.xlu2 %1907  ;;  %v2017_v51 = vsel %vm5670_vm2, %v4966_v26, %v4952_v15  ;;  %v2377_v41 = vld [vmem:[#allocation3 + $0x308] sm:$0xff]  ;;  %vm5671_vm2 = vcmask 1031168   ;;  %v1861_v19 = vld [vmem:[#allocation2 + $0x20] sm:$0xf0] }
 0x371   : > { %2025 = vst [vmem:[#allocation3 + $0x150] sm:$0xf0] %v2017_v51  ;;  %2421 = vmatpush.msrb.mxu1 %v2377_v41  ;;  %v1773_v51 = vld [vmem:[#allocation2 + $0x20] sm:$0xf0] }
 0x372   : > { %3652 = vmatpush.msrb.mxu0 %v3438_v1 }
 0x373   : > { %2014 = vrot.lane.b32.xlu0 %v2000_v59, %s5659_s18  ;;  %v1741_v59 = vld [vmem:[#allocation2 + $0x20] sm:$0xf0] }
 0x374   : > { %3653 = vmatpush.msrb.mxu0 %v3434_v23  ;;  %v1783_v23 = vrot.slane %v1773_v51, 4 }
 0x375   : > { %v2182_v21 = vpop.permute.xlu0 %2181  ;;  %1911 = vrot.lane.b32.xlu1 %v1903_v43, %s5660_s20 }
 0x376   : > { %3654 = vmatpush.msrb.mxu0 %v3430_v31  ;;  %2083 = vrot.lane.b32.xlu2 %v2069_v63, %s5641_s30  ;;  %v2191_v45 = vsel %vm1160_vm12, %v2182_v21, %v4880_v28  ;;  %v3414_v28 = vld [vmem:[#allocation3 + $0x268] sm:$0xff]  ;;  %v5018_v63 = vld.sshfl [vmem:[#allocation1 + $0x8] sm:$0xff pattern:$0x75316420]  ;;  %v3407_v31 = vld [vmem:[%s5582_s6] sm:$0xff] }
 0x377   : > { %2199 = vst [vmem:[#allocation3 + $0x280] sm:$0xf] %v2191_v45  ;;  %v2214_v37 = vpop.permute.xlu1 %2213 }
 0x378   : > { %3655 = vmatpush.msrb.mxu0 %v3426_v32  ;;  %v4976_v36 = vpop.permute.xlu2 %1941  ;;  %v2223_v40 = vsel %vm1198_vm14, %v2214_v37, %v4894_v17  ;;  %v2362_v7 = vld [vmem:[#allocation3 + $0x150] sm:$0xff]  ;;  %3573 = vst [vmem:[#allocation1] ss:$2 sm:$0xff] %v3407_v31 }
 0x379   : > { %2231 = vst [vmem:[#allocation3 + $0x280] sm:$0xf0] %v2223_v40  ;;  %2465 = vmatpush.msrb.mxu3 %v2362_v7  ;;  %v1740_v37 = vld [vmem:[#allocation2 + $0x30] sm:$0xf0] }
 0x37a   : > { %3656 = vmatpush.msrb.mxu0 %v3422_v52 }
 0x37b   : > { %1943 = vrot.lane.b32.xlu0 %v1930_v42, %s5661_s21 }
 0x37c   : > { %3657 = vmatpush.msrb.mxu0 %v3418_v57 }
 0x37d   : > { %v4982_v58 = vpop.permute.xlu0 %1909  ;;  %1945 = vrot.lane.b32.xlu1 %v1931_v44, %s5661_s21  ;;  %v5680_v44 = vld [vmem:[#allocation4_spill] sm:$0xff] }
 0x37e   : > { %3658 = vmatpush.msrb.mxu0 %v3414_v28  ;;  %2012 = vrot.lane.b32.xlu2 %v1999_v39, %s5659_s18  ;;  %v1916_v17 = vsel %vm5671_vm2, %v4964_v11, %v4982_v58  ;;  %vm5673_vm2 = vcmask 867328   ;;  %v4131_v39 = vunpack.i.h.bf16 %v5680_v44  ;;  %v2331_v44 = vld [vmem:[#allocation3 + $0x398] sm:$0xff] }
 0x37f   : > { %1924 = vst [vmem:[#allocation3 + $0x3e0] sm:$0xf] %v1916_v17  ;;  %v4990_v5 = vpop.permute.xlu1 %1939 }
 0x380   : > { %3659 = vmatpush.msrb.mxu0 %v3410_v62  ;;  %v4988_v54 = vpop.permute.xlu2 %1870  ;;  %v1948_v2 = vsel %vm5672_vm9, %v4990_v5, %v4976_v36  ;;  %v2373_v9 = vld [vmem:[#allocation3 + $0x280] sm:$0xff]  ;;  %vm5674_vm9 = vcmask 1039360   ;;  %v2381_v62 = vld [vmem:[%s5581_s5] sm:$0xf] }
 0x381   : > { %1956 = vst [vmem:[#allocation3 + $0x3e0] sm:$0xf0] %v1948_v2  ;;  %2422 = vmatpush.msrb.mxu1 %v2373_v9 }
 0x383   : > { %1876 = vrot.lane.b32.xlu0 %v1862_v56, %s5662_s22 }
 0x385   : > { %v2113_v34 = vpop.permute.xlu0 %2112  ;;  %1790 = vrot.lane.b32.xlu1 %v1782_v16, %s5663_s19 }
 0x386   : > { %1913 = vrot.lane.b32.xlu2 %v1904_v61, %s5660_s20  ;;  %v2122_v24 = vsel %vm1089_vm13, %v2113_v34, %v4878_v27 }
 0x387   : > { %2130 = vst [vmem:[#allocation3 + $0x3a0] sm:$0xf] %v2122_v24  ;;  %v2145_v0 = vpop.permute.xlu1 %2144 }
 0x388   : > { %v2076_v29 = vpop.permute.xlu2 %2075  ;;  %v2154_v18 = vsel %vm1127_vm15, %v2145_v0, %v4919_v48  ;;  %v2358_v30 = vld [vmem:[#allocation3 + $0x3e0] sm:$0xff] }
 0x389   : > { %v2085_v10 = vsel %vm5673_vm2, %v2076_v29, %v4917_v47  ;;  %2466 = vmatpush.msrb.mxu3 %v2358_v30  ;;  %2162 = vst [vmem:[#allocation3 + $0x3a0] sm:$0xf0] %v2154_v18  ;;  %vm5675_vm2 = vcmask 883712   ;;  %v2342_v18 = vld [vmem:[#allocation3 + $0x480] sm:$0xff] }
 0x38a   : > { %2093 = vst [vmem:[#allocation3 + $0x3d0] sm:$0xf0] %v2085_v10 }
 0x38b   : > { %1822 = vrot.lane.b32.xlu0 %v1809_v35, %s5664_s24 }
 0x38d   : > { %v5006_v27 = vpop.permute.xlu0 %1872  ;;  %1824 = vrot.lane.b32.xlu1 %v1810_v38, %s5664_s24 }
 0x38e   : > { %1874 = vrot.lane.b32.xlu2 %v1861_v19, %s5662_s22  ;;  %v1879_v47 = vsel %vm5674_vm9, %v4988_v54, %v5006_v27  ;;  %vm5676_vm9 = vcmask 15360  }
 0x38f   : > { %1887 = vst [vmem:[#allocation3 + $0x208] sm:$0xf0] %v1879_v47  ;;  %v2044_v13 = vpop.permute.xlu1 %2043 }
 0x390   : > { %v5012_v48 = vpop.permute.xlu2 %1818  ;;  %v2053_v1 = vsel %vm1018_vm11, %v2044_v13, %v4929_v49  ;;  %v2369_v41 = vld [vmem:[#allocation3 + $0x3a0] sm:$0xff] }
 0x391   : > { %2061 = vst [vmem:[#allocation3 + $0x3d0] sm:$0xf] %v2053_v1  ;;  %2423 = vmatpush.msrb.mxu1 %v2369_v41 }
 0x393   : > { %1755 = vrot.lane.b32.xlu0 %v1741_v59, %s5665_s23 }
 0x395   : > { %v1787_v3 = vpop.permute.xlu0 %1786  ;;  %2384 = vperm.xlu1 %4143, %v2381_v62  }
 0x396   : > { %1792 = vrot.lane.b32.xlu2 %v1783_v23, %s5663_s19  ;;  %v2354_v43 = vld [vmem:[#allocation3 + $0x208] sm:$0xff] }
 0x397   : > { %2467 = vmatpush.msrb.mxu3 %v2354_v43  ;;  %v5025_v32 = vpop.permute.xlu1 %1788 }
 0x398   : > { %v2007_v49 = vpop.permute.xlu2 %2006  ;;  %v2365_v45 = vld [vmem:[#allocation3 + $0x3d0] sm:$0xff]  ;;  %v1795_v52 = vsel %vm5676_vm9, %v1787_v3, %v5025_v32  ;;  %vm5679_vm9 = vcmask 891904  }
 0x399   : > { %v2016_v21 = vsel %vm5675_vm2, %v2007_v49, %v4966_v26  ;;  %2424 = vmatpush.msrb.mxu1 %v2365_v45  ;;  %1803 = vst [vmem:[#allocation3 + $0x330] sm:$0xf] %v1795_v52  ;;  %vm5678_vm2 = vcmask 1031168   ;;  %v2341_v49 = vld [vmem:[#allocation3 + $0x90] sm:$0xff] }
 0x39a   : > { %2024 = vst [vmem:[#allocation3 + $0x128] sm:$0xf0] %v2016_v21 }
 0x39d   : > { %v5030_v40 = vpop.permute.xlu0 %1820 }
 0x39e   : > { %1753 = vrot.lane.b32.xlu2 %v1740_v37, %s5665_s23  ;;  %v1827_v7 = vsel %vm5677_vm1, %v5012_v48, %v5030_v40  ;;  %vm5681_vm1 = vcmask 146432  }
 0x39f   : > { %1835 = vst [vmem:[#allocation3 + $0x330] sm:$0xf0] %v1827_v7  ;;  %v1975_v42 = vpop.permute.xlu1 %1974 }
 0x3a0   : > { %v1906_v26 = vpop.permute.xlu2 %1905  ;;  %v1984_v28 = vsel %vm5679_vm9, %v1975_v42, %v4933_v60  ;;  %vm5683_vm9 = vcmask 15360  }
 0x3a1   : > { %v1915_v57 = vsel %vm5678_vm2, %v1906_v26, %v4964_v11  ;;  %1992 = vst [vmem:[#allocation3 + $0x128] sm:$0xf] %v1984_v28  ;;  %vm5682_vm2 = vmmov %vm5681_vm1 }
 0x3a2   : > { %1923 = vst [vmem:[#allocation3 + $0x1d0] sm:$0xf] %v1915_v57  ;;  %v2335_v57 = vld [vmem:[#allocation3 + $0x3f8] sm:$0xff] }
 0x3a5   : > { %v1750_v17 = vpop.permute.xlu0 %1749 }
 0x3a6   : > { %v1757_v50 = vsel %vm5681_vm1, %v4131_v39, %v1750_v17  ;;  %v2350_v2 = vld [vmem:[#allocation3 + $0x330] sm:$0xff]  ;;  %vm5684_vm1 = vcmask 900096   ;;  %v2327_v39 = vld [vmem:[#allocation3 + $0x178] sm:$0xff] }
 0x3a7   : > { %1765 = vst [vmem:[#allocation3 + $0x10] sm:$0xf0] %v1757_v50  ;;  %2468 = vmatpush.msrb.mxu3 %v2350_v2  ;;  %v5047_v56 = vpop.permute.xlu1 %1751 }
 0x3a8   : > { %v5044_v9 = vpop.permute.xlu2 %4134  ;;  %v1758_v60 = vsel %vm5682_vm2, %v1750_v17, %v5047_v56  ;;  %v2361_v61 = vld [vmem:[#allocation3 + $0x128] sm:$0xff]  ;;  %vm2392_vm2 = vcmask 654336  }
 0x3a9   : > { %v4136_v11 = vunpack.i.l.bf16 %v5044_v9  ;;  %1766 = vst [vmem:[#allocation3 + $0x2f0] sm:$0xf0] %v1758_v60  ;;  %2425 = vmatpush.msrb.mxu1 %v2361_v61  ;;  %v2315_v61 = vld [vmem:[#allocation3 + $0x278] sm:$0xff] }
 0x3ab   : > { %v1794_v8 = vsel %vm5683_vm9, %v4136_v11, %v1787_v3  ;;  %vm5686_vm9 = vcmask 7168   ;;  %v2319_v11 = vld [vmem:[#allocation3 + $0x30] sm:$0xff] }
 0x3ac   : > { %1802 = vst [vmem:[#allocation3 + $0x70] sm:$0xf] %v1794_v8  ;;  %v2311_v8 = vld [vmem:[#allocation3 + $0xf8] sm:$0xff] }
 0x3ad   : > { %v1938_v16 = vpop.permute.xlu0 %1937 }
 0x3ae   : > { %v1947_v34 = vsel %vm5684_vm1, %v1938_v16, %v4990_v5  ;;  %v2345_v31 = vld [vmem:[#allocation3 + $0x10] sm:$0xff]  ;;  %vm5688_vm1 = vcmask 867328  }
 0x3af   : > { %1955 = vst [vmem:[#allocation3 + $0x1d0] sm:$0xf0] %v1947_v34  ;;  %v1869_v29 = vpop.permute.xlu1 %1868 }
 0x3b0   : > { %v2259_v24 = vpop.permute.xlu2 %2258  ;;  %v1878_v0 = vsel %vm5685_vm3, %v1869_v29, %v4988_v54  ;;  %v2346_v10 = vld [vmem:[#allocation3 + $0x2f0] sm:$0xff]  ;;  %vm5687_vm3 = vcmask 883712  }
 0x3b1   : > { %1886 = vst [vmem:[#allocation3 + $0x130] sm:$0xf0] %v1878_v0  ;;  %2469 = vmatpush.msrb.mxu3 %v2346_v10 }
 0x3b3   : > { %2470 = vmatpush.msrb.mxu3 %v2342_v18  ;;  %v2303_v18 = vld [vmem:[#allocation3 + $0x3e8] sm:$0xff] }
 0x3b4   : > { %4033 = vmatmul.msk.f32.vlgmr.msrb.gmra.mxu3 %vm2392_vm2, %v5018_v63 }
 0x3b5   : > { %v5058_v30 = vpop.permute.xlu0 %4139 }
 0x3b6   : > { %v4141_v35 = vunpack.i.l.bf16 %v5058_v30  ;;  %v2357_v5 = vld [vmem:[#allocation3 + $0x1d0] sm:$0xff] }
 0x3b7   : > { %2426 = vmatpush.msrb.mxu1 %v2357_v5  ;;  %v2257_v47 = vpop.permute.xlu1 %2256 }
 0x3b8   : > { %v2220_v19 = vpop.permute.xlu2 %2219  ;;  %v1826_v38 = vsel %vm5686_vm9, %v4141_v35, %v5012_v48  ;;  %v2262_v13 = vsel %vm1231_vm10, %v4871_v6, %v2257_v47  ;;  %v2263_v1 = vsel %vm1231_vm10, %v2257_v47, %v2259_v24  ;;  %v2353_v51 = vld [vmem:[#allocation3 + $0x130] sm:$0xff]  ;;  %vm5689_vm9 = vmmov %vm5688_vm1 }
 0x3b9   : > { %v2225_v54 = vsel %vm1198_vm14, %v4900_v12, %v2220_v19  ;;  %1834 = vst [vmem:[#allocation3 + $0x70] sm:$0xf0] %v1826_v38  ;;  %2427 = vmatpush.msrb.mxu1 %v2353_v51  ;;  %v2299_v38 = vld [vmem:[#allocation3 + $0x168] sm:$0xff]  ;;  %v2287_v51 = vld [vmem:[#allocation3 + $0x120] sm:$0xff] }
 0x3ba   : > { %2233 = vst [vmem:[#allocation3 + $0x160] sm:$0xf0] %v2225_v54  ;;  %v2295_v54 = vld [vmem:[#allocation3 + $0x350] sm:$0xff] }
 0x3bb   : > { %2270 = vst [vmem:[#allocation3 + $0x190] sm:$0xf] %v2262_v13  ;;  %v2291_v13 = vld [vmem:[#allocation3 + $0x4b8] sm:$0xff] }
 0x3bc   : > { %2271 = vst [vmem:[#allocation3 + $0x68] sm:$0xf] %v2263_v1 }
 0x3bd   : > { %v2188_v41 = vpop.permute.xlu0 %2187 }
 0x3be   : > { %v2193_v59 = vsel %vm1160_vm12, %v4861_v53, %v2188_v41  ;;  %v2339_v53 = vld [vmem:[#allocation3 + $0x2a8] sm:$0xff] }
 0x3bf   : > { %2201 = vst [vmem:[#allocation3 + $0x160] sm:$0xf] %v2193_v59  ;;  %v2190_v23 = vpop.permute.xlu1 %2189 }
 0x3c0   : > { %v2121_v48 = vpop.permute.xlu2 %2120  ;;  %v2349_v12 = vld [vmem:[#allocation3 + $0x70] sm:$0xff]  ;;  %v2194_v3 = vsel %vm1160_vm12, %v2188_v41, %v2190_v23  ;;  %v2283_v23 = vld [vmem:[#allocation3 + $0x358] sm:$0xff] }
 0x3c1   : > { %2428 = vmatpush.msrb.mxu1 %v2349_v12  ;;  %2202 = vst [vmem:[#allocation3 + $0x2b8] sm:$0xf] %v2194_v3  ;;  %v2279_v12 = vld [vmem:[#allocation3 + $0x2d0] sm:$0xff] }
 0x3c2   : > { %v2379_v6 = vld [vmem:[#allocation3 + $0x190] sm:$0xff] }
 0x3c3   : > { %2501 = vmatpush.msra.mxu3 %v2379_v6  ;;  %v2380_v43 = vld [vmem:[#allocation3 + $0x68] sm:$0xff]  ;;  %2429 = vmatpush.msrb.mxu1 %v2345_v31 }
 0x3c4   : > { %2541 = vmatpush.msra.mxu2 %v2380_v43 }
 0x3c5   : > { %v2222_v21 = vpop.permute.xlu0 %2221  ;;  %2430 = vmatpush.msrb.mxu1 %v2341_v49 }
 0x3c6   : > { %v2226_v45 = vsel %vm1198_vm14, %v2220_v19, %v2222_v21  ;;  %4032 = vmatmul.msk.f32.vlgmr.msrb.gmra.mxu1 %vm2392_vm2, %v5018_v63  ;;  %v2375_v52 = vld [vmem:[#allocation3 + $0x160] sm:$0xff] }
 0x3c7   : > { %2234 = vst [vmem:[#allocation3 + $0x2b8] sm:$0xf0] %v2226_v45  ;;  %2475 = vmatpush.msra.mxu1 %v2339_v53  ;;  %2502 = vmatpush.msra.mxu3 %v2375_v52  ;;  %v2119_v26 = vpop.permute.xlu1 %2118 }
 0x3c8   : > { %v2050_v37 = vpop.permute.xlu2 %2049  ;;  %v2124_v42 = vsel %vm1089_vm13, %v4910_v33, %v2119_v26  ;;  %v2125_v28 = vsel %vm1089_vm13, %v2119_v26, %v2121_v48 }
 0x3c9   : > { %v2055_v7 = vsel %vm1018_vm11, %v4935_v46, %v2050_v37  ;;  %2476 = vmatpush.msra.mxu1 %v2335_v57  ;;  %2132 = vst [vmem:[#allocation3 + $0x310] sm:$0xf] %v2124_v42  ;;  %v2323_v46 = vld [vmem:[#allocation3 + $0x458] sm:$0xff] }
 0x3ca   : > { %2063 = vst [vmem:[#allocation3 + $0x28] sm:$0xf] %v2055_v7 }
 0x3cb   : > { %2133 = vst [vmem:[#allocation3 + $0x408] sm:$0xf] %v2125_v28  ;;  %2477 = vmatpush.msra.mxu1 %v2331_v44 }
 0x3cd   : > { %2478 = vmatpush.msra.mxu1 %v2327_v39  ;;  %v2151_v62 = vpop.permute.xlu0 %2150 }
 0x3ce   : > { %v2156_v17 = vsel %vm1127_vm15, %v4898_v25, %v2151_v62  ;;  %v2376_v50 = vld [vmem:[#allocation3 + $0x2b8] sm:$0xff]  ;;  %v2307_v25 = vld [vmem:[#allocation3 + $0x80] sm:$0xff] }
 0x3cf   : > { %2164 = vst [vmem:[#allocation3 + $0x310] sm:$0xf0] %v2156_v17  ;;  %2479 = vmatpush.msra.mxu1 %v2323_v46  ;;  %2542 = vmatpush.msra.mxu2 %v2376_v50  ;;  %v2153_v33 = vpop.permute.xlu1 %2152 }
 0x3d0   : > { %v2084_v2 = vpop.permute.xlu2 %2083  ;;  %v2157_v60 = vsel %vm1127_vm15, %v2151_v62, %v2153_v33 }
 0x3d1   : > { %2480 = vmatpush.msra.mxu1 %v2319_v11  ;;  %2165 = vst [vmem:[#allocation3 + $0x408] sm:$0xf0] %v2157_v60 }
 0x3d3   : > { %2481 = vmatpush.msra.mxu1 %v2315_v61 }
 0x3d5   : > { %2482 = vmatpush.msra.mxu1 %v2311_v8  ;;  %v2052_v16 = vpop.permute.xlu0 %2051 }
 0x3d6   : > { %v2056_v34 = vsel %vm1018_vm11, %v2050_v37, %v2052_v16  ;;  %v2371_v24 = vld [vmem:[#allocation3 + $0x310] sm:$0xff] }
 0x3d7   : > { %2064 = vst [vmem:[#allocation3 + $0x298] sm:$0xf] %v2056_v34  ;;  %2483 = vmatpush.msra.mxu1 %v2307_v25  ;;  %2503 = vmatpush.msra.mxu3 %v2371_v24  ;;  %v2082_v10 = vpop.permute.xlu1 %2081  ;;  %v2343_v16 = vld [vmem:[#allocation3 + $0x470] sm:$0xff]  ;;  %v3465_v34 = vld [vmem:[#allocation3 + $0x2e0] sm:$0xff] }
 0x3d8   : > { %v2013_v29 = vpop.permute.xlu2 %2012  ;;  %v2087_v35 = vsel %vm5688_vm1, %v4946_v55, %v2082_v10  ;;  %v2088_v5 = vsel %vm5689_vm9, %v2082_v10, %v2084_v2  ;;  %v2372_v19 = vld [vmem:[#allocation3 + $0x408] sm:$0xff]  ;;  %vm5692_vm9 = vcmask 883712   ;;  %v3461_v24 = vld [vmem:[#allocation3 + $0xc0] sm:$0xff] }
 0x3d9   : > { %v2018_v0 = vsel %vm5687_vm3, %v4952_v15, %v2013_v29  ;;  %2484 = vmatpush.msra.mxu1 %v2303_v18  ;;  %2095 = vst [vmem:[#allocation3 + $0x28] sm:$0xf0] %v2087_v35  ;;  %2543 = vmatpush.msra.mxu2 %v2372_v19  ;;  %vm5690_vm3 = vcmask 891904   ;;  %v3453_v10 = vld [vmem:[#allocation3 + $0x328] sm:$0xff]  ;;  %v3449_v18 = vld [vmem:[#allocation3 + $0x1f0] sm:$0xff] }
 0x3da   : > { %2026 = vst [vmem:[#allocation3 + $0x18] sm:$0xf0] %v2018_v0  ;;  %vm5691_vm1 = vmmov %vm5690_vm3  ;;  %v3457_v0 = vld [vmem:[#allocation3 + $0x2e8] sm:$0xff] }
 0x3db   : > { %2096 = vst [vmem:[#allocation3 + $0x298] sm:$0xf0] %v2088_v5  ;;  %2485 = vmatpush.msra.mxu1 %v2299_v38  ;;  %v3445_v35 = vld [vmem:[#allocation3 + $0x468] sm:$0xff]  ;;  %v3441_v5 = vld [vmem:[#allocation3 + $0x438] sm:$0xff] }
 0x3dc   : > { %v3437_v19 = vld [vmem:[#allocation3 + $0x48] sm:$0xff]  ;;  %v3433_v38 = vld [vmem:[#allocation3 + $0x338] sm:$0xff] }
 0x3dd   : > { %2486 = vmatpush.msra.mxu1 %v2295_v54  ;;  %v1981_v47 = vpop.permute.xlu0 %1980  ;;  %v3429_v54 = vld [vmem:[#allocation3 + $0x230] sm:$0xff] }
 0x3de   : > { %v1986_v15 = vsel %vm5690_vm3, %v4958_v4, %v1981_v47  ;;  %vm5693_vm3 = vcmask 1039360  }
 0x3df   : > { %1994 = vst [vmem:[#allocation3 + $0x18] sm:$0xf] %v1986_v15  ;;  %2487 = vmatpush.msra.mxu1 %v2291_v13  ;;  %v1983_v55 = vpop.permute.xlu1 %1982  ;;  %v3421_v15 = vld [vmem:[#allocation3 + $0x60] sm:$0xff]  ;;  %v3413_v13 = vld [vmem:[#allocation3 + $0x2c8] sm:$0xff] }
 0x3e0   : > { %v1914_v1 = vpop.permute.xlu2 %1913  ;;  %v1987_v41 = vsel %vm5691_vm1, %v1981_v47, %v1983_v55  ;;  %v2367_v59 = vld [vmem:[#allocation3 + $0x28] sm:$0xff]  ;;  %vm5694_vm1 = vcmask 1031168   ;;  %v3425_v47 = vld [vmem:[#allocation3 + $0x418] sm:$0xff]  ;;  %v2452_v55 = vpop.f32.mrf.mxu2 }
 0x3e1   : > { %2488 = vmatpush.msra.mxu1 %v2287_v51  ;;  %1995 = vst [vmem:[#allocation3 + $0x300] sm:$0xf] %v1987_v41  ;;  %2504 = vmatpush.msra.mxu3 %v2367_v59  ;;  %vm5695_vm0 = vmmov %vm5694_vm1 }
 0x3e2   : > { %v2368_v48 = vld [vmem:[#allocation3 + $0x298] sm:$0xff] }
 0x3e3   : > { %2544 = vmatpush.msra.mxu2 %v2368_v48  ;;  %2489 = vmatpush.msra.mxu1 %v2283_v23 }
 0x3e5   : > { %2490 = vmatpush.msra.mxu1 %v2279_v12  ;;  %v2015_v3 = vpop.permute.xlu0 %2014  ;;  %v5703_v12 = vld [vmem:[#allocation8_spill] sm:$0xff] }
 0x3e6   : > { %v2019_v4 = vsel %vm5692_vm9, %v2013_v29, %v2015_v3  ;;  %2491 = vmatmul.f32.vlgmr.msra.gmra.mxu1 %v4882_v20  ;;  %v2363_v6 = vld [vmem:[#allocation3 + $0x18] sm:$0xff]  ;;  %vm5696_vm9 = vcmask 900096   ;;  %v2344_v29 = vld [vmem:[#allocation3 + $0x3b0] sm:$0xff] }
 0x3e7   : > { %2027 = vst [vmem:[#allocation3 + $0x300] sm:$0xf0] %v2019_v4  ;;  %2505 = vmatpush.msra.mxu3 %v2363_v6  ;;  %v1912_v49 = vpop.permute.xlu1 %1911  ;;  %vm5697_vm5 = vmmov %vm5696_vm9  ;;  %v2412_v4 = vpop.f32.mrf.mxu0 }
 0x3e8   : > { %v1875_v31 = vpop.permute.xlu2 %1874  ;;  %v1917_v21 = vsel %vm5694_vm1, %v4982_v58, %v1912_v49  ;;  %v1918_v45 = vsel %vm5695_vm0, %v1912_v49, %v1914_v1  ;;  %vm5698_vm0 = vcmask 146432   ;;  %vm5699_vm1 = vcmask 15360   ;;  %v3409_v1 = vld [vmem:[#allocation3 + $0x4c8] sm:$0xff] }
 0x3e9   : > { %v1880_v43 = vsel %vm5693_vm3, %v5006_v27, %v1875_v31  ;;  %1925 = vst [vmem:[#allocation3 + $0x270] sm:$0xf] %v1917_v21 }
 0x3ea   : > { %1888 = vst [vmem:[#allocation3 + $0x420] sm:$0xf0] %v1880_v43 }
 0x3eb   : > { %1926 = vst [vmem:[#allocation3 + $0x388] sm:$0xf] %v1918_v45  ;;  %v5704_v45 = vld [vmem:[#allocation7_spill] sm:$0xff] }
 0x3ed   : > { %v1944_v53 = vpop.permute.xlu0 %1943 }
 0x3ee   : > { %v1949_v20 = vsel %vm5696_vm9, %v4976_v36, %v1944_v53  ;;  %v2364_v52 = vld [vmem:[#allocation3 + $0x300] sm:$0xff]  ;;  %vm5700_vm9 = vmmov %vm5699_vm1 }
 0x3ef   : > { %1957 = vst [vmem:[#allocation3 + $0x270] sm:$0xf0] %v1949_v20  ;;  %2545 = vmatpush.msra.mxu2 %v2364_v52  ;;  %v1946_v7 = vpop.permute.xlu1 %1945 }
 0x3f0   : > { %v1793_v37 = vpop.permute.xlu2 %1792  ;;  %v1950_v27 = vsel %vm5697_vm5, %v1944_v53, %v1946_v7  ;;  %vm5701_vm5 = vcmask 7168  }
 0x3f1   : > { %1958 = vst [vmem:[#allocation3 + $0x388] sm:$0xf0] %v1950_v27  ;;  %v2355_v36 = vld [vmem:[#allocation3 + $0x420] sm:$0xff] }
 0x3f5   : > { %v1877_v26 = vpop.permute.xlu0 %1876 }
 0x3f6   : > { %v1881_v57 = vsel %vm5693_vm3, %v1875_v31, %v1877_v26  ;;  %v2359_v58 = vld [vmem:[#allocation3 + $0x270] sm:$0xff]  ;;  %vm5702_vm3 = vmmov %vm5701_vm5 }
 0x3f7   : > { %1889 = vst [vmem:[#allocation3 + $0x430] sm:$0xf0] %v1881_v57  ;;  %2506 = vmatpush.msra.mxu3 %v2359_v58  ;;  %v1791_v44 = vpop.permute.xlu1 %1790 }
 0x3f8   : > { %v1754_v42 = vpop.permute.xlu2 %1753  ;;  %v1796_v39 = vsel %vm5699_vm1, %v5025_v32, %v1791_v44  ;;  %v1797_v62 = vsel %vm5700_vm9, %v1791_v44, %v1793_v37  ;;  %v2360_v17 = vld [vmem:[#allocation3 + $0x388] sm:$0xff]  ;;  %vm5714_vm9 = vmmov %vm5699_vm1 }
 0x3f9   : > { %v1759_v28 = vsel %vm5698_vm0, %v5047_v56, %v1754_v42  ;;  %2507 = vmatpush.msra.mxu3 %v2355_v36  ;;  %1804 = vst [vmem:[#allocation3 + $0x3f0] sm:$0xf] %v1796_v39  ;;  %2546 = vmatpush.msra.mxu2 %v2360_v17 }
 0x3fa   : > { %1767 = vst [vmem:[#allocation3 + $0xe0] sm:$0xf0] %v1759_v28 }
 0x3fb   : > { %1805 = vst [vmem:[#allocation3 + $0x258] sm:$0xf] %v1797_v62 }
 0x3fd   : > { %v1823_v46 = vpop.permute.xlu0 %1822 }
 0x3fe   : > { %v1828_v50 = vsel %vm5701_vm5, %v5030_v40, %v1823_v46  ;;  %v2356_v2 = vld [vmem:[#allocation3 + $0x430] sm:$0xff] }
 0x3ff   : > { %1836 = vst [vmem:[#allocation3 + $0x3f0] sm:$0xf0] %v1828_v50  ;;  %2547 = vmatpush.msra.mxu2 %v2356_v2  ;;  %v1825_v56 = vpop.permute.xlu1 %1824  ;;  %v3469_v40 = vld [vmem:[#allocation3 + $0x170] sm:$0xff] }
 0x400   : > { %v1829_v33 = vsel %vm5702_vm3, %v1823_v46, %v1825_v56 }
 0x401   : > { %1837 = vst [vmem:[#allocation3 + $0x258] sm:$0xf0] %v1829_v33  ;;  %v2347_v61 = vld [vmem:[#allocation3 + $0xe0] sm:$0xff] }
 0x405   : > { %v1756_v11 = vpop.permute.xlu0 %1755 }
 0x406   : > { %v1760_v32 = vsel %vm5698_vm0, %v1754_v42, %v1756_v11  ;;  %v2351_v60 = vld [vmem:[#allocation3 + $0x3f0] sm:$0xff] }
 0x407   : > { %1768 = vst [vmem:[#allocation3 + $0x4c0] sm:$0xf0] %v1760_v32  ;;  %2508 = vmatpush.msra.mxu3 %v2351_v60  ;;  %v5115_v51 = vpop.permute.xlu1 %2384 }
 0x408   : > { %v2352_v8 = vld [vmem:[#allocation3 + $0x258] sm:$0xff]  ;;  %v2453_v41 = vadd.f32 %v2452_v55, %v5115_v51  ;;  %v2413_v6 = vadd.f32 %v2412_v4, %v5115_v51  ;;  %v2532_v55 = vpop.f32.mrf.mxu0 }
 0x409   : > { %2509 = vmatpush.msra.mxu3 %v2347_v61  ;;  %2548 = vmatpush.msra.mxu2 %v2352_v8 }
 0x40b   : > { %2510 = vmatpush.msra.mxu3 %v2343_v16 }
 0x40c   : > { %4034 = vmatmul.msk.f32.vlgmr.msra.gmra.mxu3 %vm2392_vm2, %v5018_v63 }
 0x40d   : > { %3584 = vmatpush.msrb.mxu3 %v3469_v40 }
 0x40e   : > { %v2348_v25 = vld [vmem:[#allocation3 + $0x4c0] sm:$0xff] }
 0x40f   : > { %3585 = vmatpush.msrb.mxu3 %v3465_v34  ;;  %2549 = vmatpush.msra.mxu2 %v2348_v25 }
 0x411   : > { %3586 = vmatpush.msrb.mxu3 %v3461_v24  ;;  %2550 = vmatpush.msra.mxu2 %v2344_v29 }
 0x412   : > { %4035 = vmatmul.msk.f32.vlgmr.msra.gmra.mxu2 %vm2392_vm2, %v5018_v63  ;;  %v3417_v63 = vld [vmem:[#allocation3 + $0x98] sm:$0xff]  ;;  %vm5711_vm2 = vmmov %vm5702_vm3  ;;  %vm5716_vm3 = vcmask 867328  }
 0x413   : > { %3587 = vmatpush.msrb.mxu3 %v3457_v0  ;;  %vm5715_vm5 = vmmov %vm5711_vm2 }
 0x415   : > { %3588 = vmatpush.msrb.mxu3 %v3453_v10 }
 0x417   : > { %3589 = vmatpush.msrb.mxu3 %v3449_v18 }
 0x419   : > { %3590 = vmatpush.msrb.mxu3 %v3445_v35 }
 0x41b   : > { %3591 = vmatpush.msrb.mxu3 %v3441_v5 }
 0x41d   : > { %3592 = vmatpush.msrb.mxu3 %v3437_v19 }
 0x41f   : > { %3593 = vmatpush.msrb.mxu3 %v3433_v38 }
 0x421   : > { %3594 = vmatpush.msrb.mxu3 %v3429_v54 }
 0x423   : > { %3595 = vmatpush.msrb.mxu3 %v3425_v47 }
 0x425   : > { %3596 = vmatpush.msrb.mxu3 %v3421_v15 }
 0x427   : > { %3597 = vmatpush.msrb.mxu3 %v3417_v63 }
 0x429   : > { %3598 = vmatpush.msrb.mxu3 %v3413_v13 }
 0x42b   : > { %3599 = vmatpush.msrb.mxu3 %v3409_v1 }
 0x437   : > { %v2472_v59 = vpop.f32.mrf.mxu3 }
 0x438   : > { %v2473_v48 = vadd.f32 %v2472_v59, %v2453_v41 }
 0x43a   : > { %v2556_v23 = vmax.f32 %v2473_v48, 0.0 }
 0x43c   : > { %v2560_v3 = vmul.f32 %v2556_v23, %v5703_v12  ;;  %v2533_v23 = vadd.f32 %v2532_v55, %v5115_v51 }
 0x43e   : > { %2564 = vst [vmem:[#allocation2 + $0x40] sm:$0xf] %v2560_v3 }
 0x443   : > { %v2432_v31 = vpop.f32.mrf.mxu1 }
 0x444   : > { %v2433_v43 = vadd.f32 %v2432_v31, %v2413_v6  ;;  %v2875_v31 = vld [vmem:[#allocation2] sm:$0xf] }
 0x445   : > { %v3372_v21 = vld [vmem:[#allocation2 + $0x40] sm:$0xf] }
 0x446   : > { %v2555_v49 = vmax.f32 %v2433_v43, 0.0  ;;  %3383 = vrot.lane.b32.xlu0 %v3372_v21, %s4171_s28  ;;  %v3335_v27 = vld [vmem:[#allocation2 + $0x40] sm:$0xf] }
 0x447   : > { %v3345_v26 = vrot.slane %v3335_v27, 4  ;;  %v3303_v57 = vld [vmem:[#allocation2 + $0x40] sm:$0xf] }
 0x448   : > { %v2559_v53 = vmul.f32 %v2555_v49, %v5704_v45  ;;  %v3234_v58 = vld [vmem:[#allocation2 + $0x40] sm:$0xf] }
 0x449   : > { %v2982_v44 = vld [vmem:[#allocation2 + $0x40] sm:$0xf] }
 0x44a   : > { %2563 = vst [vmem:[#allocation2 + $0x10] sm:$0xf] %v2559_v53  ;;  %v3266_v17 = vld [vmem:[#allocation2 + $0x40] sm:$0xf]  ;;  %v2885_v53 = vrot.slane %v2875_v31, 4 }
 0x44b   : > { %2986 = vst [vmem:[#allocation3 + $0x50] sm:$0xf] %v2982_v44  ;;  %v2946_v46 = vld [vmem:[#allocation2 + $0x40] sm:$0xf]  ;;  %v3276_v50 = vrot.slane %v3266_v17, 4 }
 0x44c   : > { %v2914_v2 = vld [vmem:[#allocation2 + $0x40] sm:$0xf]  ;;  %v2956_v56 = vrot.slane %v2946_v46, 4 }
 0x44d   : > { %v3197_v8 = vld [vmem:[#allocation2 + $0x40] sm:$0xf] }
 0x44e   : > { %v3207_v16 = vrot.slane %v3197_v8, 4  ;;  %v3165_v40 = vld [vmem:[#allocation2 + $0x40] sm:$0xf] }
 0x44f   : > { %v2845_v34 = vld [vmem:[#allocation2 + $0x40] sm:$0xf] }
 0x450   : > { %v2877_v10 = vld [vmem:[#allocation2 + $0x40] sm:$0xf] }
 0x451   : > { %v3371_v20 = vld [vmem:[#allocation2 + $0x10] sm:$0xf]  ;;  %v3128_v18 = vld [vmem:[#allocation2 + $0x40] sm:$0xf]  ;;  %v2887_v35 = vrot.slane %v2877_v10, 4 }
 0x452   : > { %v3302_v52 = vld [vmem:[#allocation2 + $0x10] sm:$0xf]  ;;  %3381 = vrot.lane.b32.xlu2 %v3371_v20, %s4171_s28  ;;  %v3096_v5 = vld [vmem:[#allocation2 + $0x40] sm:$0xf]  ;;  %v3138_v19 = vrot.slane %v3128_v18, 4 }
 0x453   : > { %v3334_v37 = vld [vmem:[#allocation2 + $0x10] sm:$0xf]  ;;  %3312 = vrot.lane.b32.xlu1 %v3302_v52, %s5651_s29  ;;  %v2808_v6 = vld [vmem:[#allocation2 + $0x40] sm:$0xf] }
 0x454   : > { %v3344_v7 = vrot.slane %v3334_v37, 4  ;;  %v2981_v42 = vld [vmem:[#allocation2 + $0x10] sm:$0xf]  ;;  %v2818_v21 = vrot.slane %v2808_v6, 4  ;;  %v2776_v20 = vld [vmem:[#allocation2 + $0x40] sm:$0xf] }
 0x455   : > { %v3265_v28 = vld [vmem:[#allocation2 + $0x10] sm:$0xf]  ;;  %2985 = vst [vmem:[#allocation3 + $0x88] sm:$0xf] %v2981_v42  ;;  %v2707_v42 = vld [vmem:[#allocation2 + $0x40] sm:$0xf] }
 0x456   : > { %3349 = vrot.lane.b32.xlu0 %v3344_v7, %s5649_s11  ;;  %v3275_v36 = vrot.slane %v3265_v28, 4  ;;  %v3233_v39 = vld [vmem:[#allocation2 + $0x10] sm:$0xf]  ;;  %v2806_v17 = vld [vmem:[#allocation2] sm:$0xf] }
 0x457   : > { %v2913_v62 = vld [vmem:[#allocation2 + $0x10] sm:$0xf] }
 0x458   : > { %v2945_v33 = vld [vmem:[#allocation2 + $0x10] sm:$0xf] }
 0x459   : > { %v3196_v11 = vld [vmem:[#allocation2 + $0x10] sm:$0xf]  ;;  %v2955_v32 = vrot.slane %v2945_v33, 4  ;;  %v2816_v33 = vrot.slane %v2806_v17, 4  ;;  %v2599_v17 = vld [vmem:[#allocation2] sm:$0xf] }
 0x45a   : > { %3314 = vrot.lane.b32.xlu2 %v3303_v57, %s5651_s29  ;;  %v3164_v60 = vld [vmem:[#allocation2 + $0x10] sm:$0xf]  ;;  %v3206_v61 = vrot.slane %v3196_v11, 4  ;;  %v2990_v11 = vld [vmem:[#allocation2 + $0x40] sm:$0xf]  ;;  %s5713_s29 = smov 41  }
 0x45b   : > { %3351 = vrot.lane.b32.xlu1 %v3345_v26, %s5649_s11  ;;  %v2876_v25 = vld [vmem:[#allocation2 + $0x10] sm:$0xf]  ;;  %v3059_v26 = vld [vmem:[#allocation2 + $0x40] sm:$0xf]  ;;  %v3000_v8 = vrot.slane %v2990_v11, 4  ;;  %s5712_s11 = smov 42  }
 0x45c   : > { %v2886_v24 = vrot.slane %v2876_v25, 4  ;;  %v2844_v29 = vld [vmem:[#allocation2 + $0x10] sm:$0xf]  ;;  %v3069_v57 = vrot.slane %v3059_v26, 4  ;;  %v2609_v11 = vrot.slane %v2599_v17, 4 }
 0x45d   : > { %v3095_v0 = vld [vmem:[#allocation2 + $0x10] sm:$0xf] }
 0x45e   : > { %3245 = vrot.lane.b32.xlu0 %v3234_v58, %s5647_s16  ;;  %v3127_v54 = vld [vmem:[#allocation2 + $0x10] sm:$0xf]  ;;  %v3027_v58 = vld [vmem:[#allocation2 + $0x40] sm:$0xf] }
 0x45f   : > { %v2807_v63 = vld [vmem:[#allocation2 + $0x10] sm:$0xf]  ;;  %v3137_v1 = vrot.slane %v3127_v54, 4 }
 0x460   : > { %v2775_v41 = vld [vmem:[#allocation2 + $0x10] sm:$0xf]  ;;  %v2817_v48 = vrot.slane %v2807_v63, 4  ;;  %v4142_v63 = vunpack.i.h.bf16 %v5058_v30 }
 0x461   : > { %v3058_v37 = vld [vmem:[#allocation2 + $0x10] sm:$0xf] }
 0x462   : > { %3243 = vrot.lane.b32.xlu2 %v3233_v39, %s5647_s16  ;;  %v3026_v7 = vld [vmem:[#allocation2 + $0x10] sm:$0xf]  ;;  %v3068_v27 = vrot.slane %v3058_v37, 4  ;;  %s5710_s16 = smov 39  }
 0x463   : > { %3280 = vrot.lane.b32.xlu1 %v3275_v36, %s5645_s12  ;;  %v2492_v38 = vpop.f32.mrf.mxu1  ;;  %v2738_v44 = vld [vmem:[#allocation2 + $0x10] sm:$0xf] }
 0x464   : > { %v2493_v47 = vadd.f32 %v2492_v38, %v5115_v51  ;;  %v2843_v51 = vld [vmem:[#allocation2] sm:$0xf]  ;;  %v2748_v36 = vrot.slane %v2738_v44, 4  ;;  %v2706_v39 = vld [vmem:[#allocation2 + $0x10] sm:$0xf] }
 0x465   : > { %v2568_v30 = vld [vmem:[#allocation2 + $0x10] sm:$0xf] }
 0x466   : > { %2924 = vrot.lane.b32.xlu0 %v2913_v62, %s5663_s19  ;;  %v2774_v62 = vld [vmem:[#allocation2] sm:$0xf] }
 0x46a   : > { %3282 = vrot.lane.b32.xlu2 %v3276_v50, %s5645_s12  ;;  %s5709_s12 = smov 40  }
 0x46b   : > { %2926 = vrot.lane.b32.xlu1 %v2914_v2, %s5663_s19  ;;  %v2739_v2 = vld [vmem:[#allocation2 + $0x40] sm:$0xf] }
 0x46e   : > { %2963 = vrot.lane.b32.xlu0 %v2956_v56, %s5664_s24 }
 0x472   : > { %2961 = vrot.lane.b32.xlu2 %v2955_v32, %s5664_s24  ;;  %v2749_v32 = vrot.slane %v2739_v2, 4 }
 0x473   : > { %3174 = vrot.lane.b32.xlu1 %v3164_v60, %s5643_s15 }
 0x476   : > { %3211 = vrot.lane.b32.xlu0 %v3206_v61, %s5641_s30 }
 0x47a   : > { %3176 = vrot.lane.b32.xlu2 %v3165_v40, %s5643_s15  ;;  %s5708_s15 = smov 22   ;;  %v2989_v40 = vld [vmem:[#allocation2 + $0x10] sm:$0xf] }
 0x47b   : > { %3213 = vrot.lane.b32.xlu1 %v3207_v16, %s5641_s30  ;;  %s5707_s30 = smov 38   ;;  %v2999_v25 = vrot.slane %v2989_v40, 4 }
 0x47e   : > { %2857 = vrot.lane.b32.xlu0 %v2845_v34, %s4161_s27  ;;  %v2669_v34 = vld [vmem:[#allocation2 + $0x10] sm:$0xf] }
 0x482   : > { %2855 = vrot.lane.b32.xlu2 %v2844_v29, %s4161_s27 }
 0x483   : > { %2892 = vrot.lane.b32.xlu1 %v2886_v24, %s5665_s23  ;;  %v2637_v24 = vld [vmem:[#allocation2 + $0x10] sm:$0xf] }
 0x486   : > { %3105 = vrot.lane.b32.xlu0 %v3095_v0, %s5658_s17  ;;  %v2679_v0 = vrot.slane %v2669_v34, 4 }
 0x48a   : > { %2894 = vrot.lane.b32.xlu2 %v2887_v35, %s5665_s23 }
 0x48b   : > { %3107 = vrot.lane.b32.xlu1 %v3096_v5, %s5658_s17  ;;  %v2670_v5 = vld [vmem:[#allocation2 + $0x40] sm:$0xf] }
 0x48c   : > { %v2680_v54 = vrot.slane %v2670_v5, 4 }
 0x48e   : > { %3144 = vrot.lane.b32.xlu0 %v3138_v19, %s5659_s18  ;;  %v2737_v19 = vld [vmem:[#allocation2] sm:$0xf] }
 0x48f   : > { %v2512_v15 = vpop.f32.mrf.mxu3 }
 0x490   : > { %v2513_v13 = vadd.f32 %v2512_v15, %v2493_v47  ;;  %v2747_v47 = vrot.slane %v2737_v19, 4  ;;  %v2638_v15 = vld [vmem:[#allocation2 + $0x40] sm:$0xf] }
 0x492   : > { %v2557_v59 = vmax.f32 %v2513_v13, 0.0  ;;  %3142 = vrot.lane.b32.xlu2 %v3137_v1, %s5659_s18 }
 0x493   : > { %2786 = vrot.lane.b32.xlu1 %v2775_v41, %s5705_s25 }
 0x494   : > { %v2561_v3 = vmul.f32 %v2557_v59, %v4702_v22 }
 0x495   : > { %v2552_v4 = vpop.f32.mrf.mxu2 }
 0x496   : > { %2823 = vrot.lane.b32.xlu0 %v2817_v48, %s5706_s26  ;;  %2565 = vst [vmem:[#allocation2 + $0x28] sm:$0xf] %v2561_v3  ;;  %v2553_v43 = vadd.f32 %v2552_v4, %v2533_v23  ;;  %v2705_v23 = vld [vmem:[#allocation2] sm:$0xf]  ;;  %v2600_v3 = vld [vmem:[#allocation2 + $0x10] sm:$0xf] }
 0x497   : > { %v2610_v4 = vrot.slane %v2600_v3, 4 }
 0x498   : > { %v2558_v49 = vmax.f32 %v2553_v43, 0.0  ;;  %v4137_v43 = vunpack.i.h.bf16 %v5044_v9 }
 0x49a   : > { %v2562_v52 = vmul.f32 %v2558_v49, %v4705_v14  ;;  %2788 = vrot.lane.b32.xlu2 %v2776_v20, %s5705_s25  ;;  %v2668_v20 = vld [vmem:[#allocation2] sm:$0xf] }
 0x49b   : > { %2825 = vrot.lane.b32.xlu1 %v2818_v21, %s5706_s26 }
 0x49c   : > { %2566 = vst [vmem:[#allocation2 + $0x38] sm:$0xf] %v2562_v52 }
 0x49d   : > { %v2983_v50 = vld [vmem:[#allocation2 + $0x28] sm:$0xf] }
 0x49e   : > { %2890 = vrot.lane.b32.xlu0 %v2885_v53, %s5665_s23  ;;  %2987 = vst [vmem:[#allocation3 + $0x3c0] sm:$0xf] %v2983_v50  ;;  %v2601_v53 = vld [vmem:[#allocation2 + $0x40] sm:$0xf] }
 0x49f   : > { %v2611_v37 = vrot.slane %v2601_v53, 4  ;;  %v2708_v53 = vld [vmem:[#allocation2 + $0x28] sm:$0xf] }
 0x4a2   : > { %2853 = vrot.lane.b32.xlu2 %v2843_v51, %s4161_s27 }
 0x4a3   : > { %3036 = vrot.lane.b32.xlu1 %v3026_v7, %s5660_s20  ;;  %v2984_v56 = vld [vmem:[#allocation2 + $0x38] sm:$0xf]  ;;  %v2678_v7 = vrot.slane %v2668_v20, 4 }
 0x4a4   : > { %2988 = vst [vmem:[#allocation3 + $0x2f8] sm:$0xf] %v2984_v56 }
 0x4a6   : > { %3073 = vrot.lane.b32.xlu0 %v3068_v27, %s5661_s21  ;;  %v2569_v27 = vld [vmem:[#allocation2 + $0x40] sm:$0xf] }
 0x4aa   : > { %3038 = vrot.lane.b32.xlu2 %v3027_v58, %s5660_s20 }
 0x4ab   : > { %3075 = vrot.lane.b32.xlu1 %v3069_v57, %s5661_s21 }
 0x4ac   : > { %v3382_v28 = vpop.permute.xlu2 %3381 }
 0x4ae   : > { %2719 = vrot.lane.b32.xlu0 %v2707_v42, %s5707_s30 }
 0x4b2   : > { %2717 = vrot.lane.b32.xlu2 %v2706_v39, %s5707_s30  ;;  %v2567_v39 = vld [vmem:[#allocation2] sm:$0xf] }
 0x4b3   : > { %2754 = vrot.lane.b32.xlu1 %v2748_v36, %s5708_s15  ;;  %v2636_v36 = vld [vmem:[#allocation2] sm:$0xf] }
 0x4b4   : > { %v5164_v46 = vpop.permute.xlu2 %3314 }
 0x4b6   : > { %2784 = vrot.lane.b32.xlu0 %v2774_v62, %s5705_s25  ;;  %v2915_v62 = vld [vmem:[#allocation2 + $0x28] sm:$0xf] }
 0x4b8   : > { %v5167_v60 = vpop.permute.xlu0 %3383 }
 0x4b9   : > { %v3391_v61 = vsel %vm1231_vm10, %v3382_v28, %v5167_v60 }
 0x4ba   : > { %2756 = vrot.lane.b32.xlu2 %v2749_v32, %s5708_s15  ;;  %3399 = vst [vmem:[#allocation3 + $0x100] sm:$0xf] %v3391_v61  ;;  %v2948_v32 = vld [vmem:[#allocation2 + $0x38] sm:$0xf] }
 0x4bb   : > { %2821 = vrot.lane.b32.xlu1 %v2816_v33, %s5706_s26  ;;  %v2916_v61 = vld [vmem:[#allocation2 + $0x38] sm:$0xf] }
 0x4bc   : > { %v3244_v16 = vpop.permute.xlu2 %3243 }
 0x4be   : > { %3006 = vrot.lane.b32.xlu0 %v3000_v8, %s5662_s22  ;;  %v2958_v8 = vrot.slane %v2948_v32, 4 }
 0x4c1   : > { %v3561_v29 = vld [vmem:[#allocation3 + $0x100] sm:$0xff] }
 0x4c2   : > { %3004 = vrot.lane.b32.xlu2 %v2999_v25, %s5662_s22  ;;  %3633 = vmatpush.msrb.mxu2 %v3561_v29  ;;  %v2947_v25 = vld [vmem:[#allocation2 + $0x28] sm:$0xf] }
 0x4c3   : > { %2648 = vrot.lane.b32.xlu1 %v2637_v24, %s5709_s12 }
 0x4c4   : > { %v5176_v18 = vpop.permute.xlu2 %3282 }
 0x4c5   : > { %v3313_v10 = vpop.permute.xlu1 %3312 }
 0x4c6   : > { %2685 = vrot.lane.b32.xlu0 %v2679_v0, %s5710_s16  ;;  %v3322_v35 = vsel %vm1160_vm12, %v3313_v10, %v5164_v46  ;;  %v2878_v0 = vld [vmem:[#allocation2 + $0x28] sm:$0xf]  ;;  %v2957_v10 = vrot.slane %v2947_v25, 4 }
 0x4c7   : > { %3330 = vst [vmem:[#allocation3 + $0xf0] sm:$0xf] %v3322_v35  ;;  %v2846_v35 = vld [vmem:[#allocation2 + $0x28] sm:$0xf]  ;;  %v2888_v5 = vrot.slane %v2878_v0, 4 }
 0x4c8   : > { %v3350_v38 = vpop.permute.xlu0 %3349 }
 0x4ca   : > { %2650 = vrot.lane.b32.xlu2 %v2638_v15, %s5709_s12  ;;  %v2879_v15 = vld [vmem:[#allocation2 + $0x38] sm:$0xf] }
 0x4cb   : > { %2687 = vrot.lane.b32.xlu1 %v2680_v54, %s5710_s16 }
 0x4cc   : > { %v2962_v1 = vpop.permute.xlu2 %2961 }
 0x4cd   : > { %v5184_v13 = vpop.permute.xlu1 %3351  ;;  %v2969_v41 = vsel %vm5711_vm2, %v4142_v63, %v2962_v1  ;;  %vm5717_vm2 = vcmask 891904  }
 0x4ce   : > { %2752 = vrot.lane.b32.xlu0 %v2747_v47, %s5708_s15  ;;  %v3359_v55 = vsel %vm1198_vm14, %v3350_v38, %v5184_v13  ;;  %2977 = vst [vmem:[#allocation3 + $0x488] sm:$0xf0] %v2969_v41  ;;  %v2778_v41 = vld [vmem:[#allocation2 + $0x38] sm:$0xf] }
 0x4cf   : > { %3367 = vst [vmem:[#allocation3 + $0xf0] sm:$0xf0] %v3359_v55  ;;  %v2847_v55 = vld [vmem:[#allocation2 + $0x38] sm:$0xf] }
 0x4d0   : > { %v5190_v59 = vpop.permute.xlu0 %3245 }
 0x4d1   : > { %v3253_v48 = vsel %vm1089_vm13, %v3244_v16, %v5190_v59 }
 0x4d2   : > { %3261 = vst [vmem:[#allocation3 + $0x158] sm:$0xf] %v3253_v48  ;;  %2715 = vrot.lane.b32.xlu2 %v2705_v23, %s5707_s30 }
 0x4d3   : > { %2579 = vrot.lane.b32.xlu1 %v2568_v30, %s5712_s11 }
 0x4d4   : > { %v5196_v31 = vpop.permute.xlu2 %3176 }
 0x4d5   : > { %v3281_v6 = vpop.permute.xlu1 %3280 }
 0x4d6   : > { %2616 = vrot.lane.b32.xlu0 %v2610_v4, %s5713_s29  ;;  %v3290_v49 = vsel %vm1127_vm15, %v3281_v6, %v5176_v18  ;;  %v3557_v21 = vld [vmem:[#allocation3 + $0xf0] sm:$0xff]  ;;  %v2809_v4 = vld [vmem:[#allocation2 + $0x28] sm:$0xf] }
 0x4d7   : > { %3298 = vst [vmem:[#allocation3 + $0x158] sm:$0xf0] %v3290_v49  ;;  %3634 = vmatpush.msrb.mxu2 %v3557_v21  ;;  %v2819_v49 = vrot.slane %v2809_v4, 4  ;;  %v2777_v21 = vld [vmem:[#allocation2 + $0x28] sm:$0xf] }
 0x4d8   : > { %v2925_v52 = vpop.permute.xlu0 %2924 }
 0x4d9   : > { %v2932_v51 = vsel %vm5699_vm1, %v4137_v43, %v2925_v52  ;;  %vm5718_vm1 = vcmask 883712  }
 0x4da   : > { %2940 = vst [vmem:[#allocation3 + $0x488] sm:$0xf] %v2932_v51  ;;  %2581 = vrot.lane.b32.xlu2 %v2569_v27, %s5712_s11 }
 0x4db   : > { %2618 = vrot.lane.b32.xlu1 %v2611_v37, %s5713_s29  ;;  %v2810_v37 = vld [vmem:[#allocation2 + $0x38] sm:$0xf] }
 0x4dc   : > { %v5207_v26 = vpop.permute.xlu2 %2855 }
 0x4dd   : > { %v5205_v9 = vpop.permute.xlu1 %2926 }
 0x4de   : > { %2683 = vrot.lane.b32.xlu0 %v2678_v7, %s5710_s16  ;;  %v2933_v57 = vsel %vm5714_vm9, %v2925_v52, %v5205_v9  ;;  %v3553_v58 = vld [vmem:[#allocation3 + $0x158] sm:$0xff]  ;;  %vm5719_vm9 = vmmov %vm5698_vm0 }
 0x4df   : > { %2941 = vst [vmem:[#allocation3 + $0xb0] sm:$0xf] %v2933_v57  ;;  %3635 = vmatpush.msrb.mxu2 %v3553_v58  ;;  %v2820_v57 = vrot.slane %v2810_v37, 4  ;;  %v2709_v58 = vld [vmem:[#allocation2 + $0x38] sm:$0xf] }
 0x4e0   : > { %v5212_v42 = vpop.permute.xlu0 %2963  ;;  %v3305_v37 = vld [vmem:[#allocation2 + $0x38] sm:$0xf] }
 0x4e1   : > { %v2970_v28 = vsel %vm5715_vm5, %v2962_v1, %v5212_v42  ;;  %v3533_v44 = vld [vmem:[#allocation3 + $0x488] sm:$0xff]  ;;  %v2889_v1 = vrot.slane %v2879_v15, 4  ;;  %vm5720_vm5 = vcmask 1031168  }
 0x4e2   : > { %2978 = vst [vmem:[#allocation3 + $0xb0] sm:$0xf0] %v2970_v28  ;;  %3604 = vmatpush.msrb.mxu1 %v3533_v44  ;;  %2646 = vrot.lane.b32.xlu2 %v2636_v36, %s5709_s12 }
 0x4e3   : > { %2577 = vrot.lane.b32.xlu1 %v2567_v39, %s5712_s11 }
 0x4e4   : > { %v5218_v2 = vpop.permute.xlu2 %2894 }
 0x4e5   : > { %v3175_v50 = vpop.permute.xlu1 %3174 }
 0x4e6   : > { %2928 = vrot.lane.b32.xlu0 %v2915_v62, %s5663_s19  ;;  %v3184_v56 = vsel %vm1018_vm11, %v3175_v50, %v5196_v31  ;;  %v2740_v62 = vld [vmem:[#allocation2 + $0x28] sm:$0xf] }
 0x4e7   : > { %3192 = vst [vmem:[#allocation3 + $0x4d8] sm:$0xf] %v3184_v56  ;;  %v2671_v56 = vld [vmem:[#allocation2 + $0x28] sm:$0xf] }
 0x4e8   : > { %v3212_v33 = vpop.permute.xlu0 %3211  ;;  %v2681_v32 = vrot.slane %v2671_v56, 4 }
 0x4ea   : > { %2614 = vrot.lane.b32.xlu2 %v2609_v11, %s5713_s29  ;;  %v2639_v11 = vld [vmem:[#allocation2 + $0x28] sm:$0xf] }
 0x4eb   : > { %2930 = vrot.lane.b32.xlu1 %v2916_v61, %s5663_s19  ;;  %s5725_s19 = smov 87  }
 0x4ec   : > { %v3143_v40 = vpop.permute.xlu2 %3142 }
 0x4ed   : > { %v5225_v16 = vpop.permute.xlu1 %3213 }
 0x4ee   : > { %2967 = vrot.lane.b32.xlu0 %v2958_v8, %s5664_s24  ;;  %v3221_v34 = vsel %vm5716_vm3, %v3212_v33, %v5225_v16  ;;  %v2750_v33 = vrot.slane %v2740_v62, 4  ;;  %vm5721_vm3 = vcmask 900096  }
 0x4ef   : > { %3229 = vst [vmem:[#allocation3 + $0x4d8] sm:$0xf0] %v3221_v34  ;;  %v2672_v34 = vld [vmem:[#allocation2 + $0x38] sm:$0xf] }
 0x4f0   : > { %v5230_v24 = vpop.permute.xlu0 %2857  ;;  %v2682_v0 = vrot.slane %v2672_v34, 4  ;;  %v3534_v34 = vld [vmem:[#allocation3 + $0xb0] sm:$0xff] }
 0x4f1   : > { %v2864_v29 = vsel %vm688_vm8, %v5207_v26, %v5230_v24 }
 0x4f2   : > { %2872 = vst [vmem:[#allocation3 + $0x1b8] sm:$0xf] %v2864_v29  ;;  %2965 = vrot.lane.b32.xlu2 %v2957_v10, %s5664_s24  ;;  %v2640_v10 = vld [vmem:[#allocation2 + $0x38] sm:$0xf]  ;;  %s5728_s24 = smov 89  }
 0x4f3   : > { %2859 = vrot.lane.b32.xlu1 %v2846_v35, %s4161_s27  ;;  %v2571_v35 = vld [vmem:[#allocation2 + $0x38] sm:$0xf] }
 0x4f4   : > { %v5237_v38 = vpop.permute.xlu2 %2788 }
 0x4f5   : > { %v2893_v19 = vpop.permute.xlu1 %2892 }
 0x4f6   : > { %2896 = vrot.lane.b32.xlu0 %v2888_v5, %s5665_s23  ;;  %v2901_v54 = vsel %vm5698_vm0, %v2893_v19, %v5218_v2  ;;  %v3549_v47 = vld [vmem:[#allocation3 + $0x4d8] sm:$0xff]  ;;  %vm5722_vm0 = vcmask 179200  }
 0x4f7   : > { %2909 = vst [vmem:[#allocation3 + $0x1b8] sm:$0xf0] %v2901_v54  ;;  %3636 = vmatpush.msrb.mxu2 %v3549_v47  ;;  %v2602_v47 = vld [vmem:[#allocation2 + $0x28] sm:$0xf] }
 0x4f8   : > { %v3106_v63 = vpop.permute.xlu0 %3105 }
 0x4fa   : > { %2861 = vrot.lane.b32.xlu2 %v2847_v55, %s4161_s27  ;;  %v2570_v55 = vld [vmem:[#allocation2 + $0x28] sm:$0xf]  ;;  %s5732_s27 = smov 107  }
 0x4fb   : > { %2898 = vrot.lane.b32.xlu1 %v2889_v1, %s5665_s23  ;;  %v2612_v1 = vrot.slane %v2602_v47, 4  ;;  %s5726_s23 = smov 90  }
 0x4fc   : > { %v2854_v23 = vpop.permute.xlu2 %2853 }
 0x4fd   : > { %v5244_v48 = vpop.permute.xlu1 %3107  ;;  %v2863_v30 = vsel %vm688_vm8, %v2854_v23, %v5207_v26  ;;  %v2741_v26 = vld [vmem:[#allocation2 + $0x38] sm:$0xf] }
 0x4fe   : > { %2792 = vrot.lane.b32.xlu0 %v2778_v41, %s5705_s25  ;;  %v3115_v3 = vsel %vm5717_vm2, %v3106_v63, %v5244_v48  ;;  %2871 = vst [vmem:[#allocation3 + $0xa8] sm:$0xf] %v2863_v30  ;;  %v2751_v28 = vrot.slane %v2741_v26, 4  ;;  %v3373_v41 = vld [vmem:[#allocation2 + $0x28] sm:$0xf]  ;;  %vm5724_vm2 = vcmask 1039360  }
 0x4ff   : > { %3123 = vst [vmem:[#allocation3 + $0x240] sm:$0xf] %v3115_v3 }
 0x500   : > { %v5251_v6 = vpop.permute.xlu0 %3144 }
 0x501   : > { %v3152_v43 = vsel %vm5718_vm1, %v3143_v40, %v5251_v6  ;;  %vm5727_vm1 = vcmask 326656  }
 0x502   : > { %3160 = vst [vmem:[#allocation3 + $0x240] sm:$0xf0] %v3152_v43  ;;  %2790 = vrot.lane.b32.xlu2 %v2777_v21, %s5705_s25  ;;  %v2603_v43 = vld [vmem:[#allocation2 + $0x38] sm:$0xf] }
 0x503   : > { %2827 = vrot.lane.b32.xlu1 %v2819_v49, %s5706_s26 }
 0x504   : > { %v5257_v20 = vpop.permute.xlu2 %3038 }
 0x505   : > { %v5259_v52 = vpop.permute.xlu1 %2786 }
 0x506   : > { %2721 = vrot.lane.b32.xlu0 %v2708_v53, %s5707_s30  ;;  %v2795_v51 = vsel %vm617_vm6, %v5259_v52, %v5237_v38  ;;  %v2613_v53 = vrot.slane %v2603_v43, 4 }
 0x507   : > { %2803 = vst [vmem:[#allocation3 + $0x410] sm:$0xf] %v2795_v51  ;;  %v3374_v51 = vld [vmem:[#allocation2 + $0x38] sm:$0xf] }
 0x508   : > { %v5265_v7 = vpop.permute.xlu0 %2823 }
 0x509   : > { %v3545_v27 = vld [vmem:[#allocation3 + $0x240] sm:$0xff] }
 0x50a   : > { %3637 = vmatpush.msrb.mxu2 %v3545_v27  ;;  %2829 = vrot.lane.b32.xlu2 %v2820_v57, %s5706_s26 }
 0x50b   : > { %2723 = vrot.lane.b32.xlu1 %v2709_v58, %s5707_s30 }
 0x50c   : > { %v5271_v36 = vpop.permute.xlu2 %2717 }
 0x50d   : > { %v5269_v44 = vpop.permute.xlu1 %2825 }
 0x50e   : > { %2760 = vrot.lane.b32.xlu0 %v2751_v28, %s5708_s15  ;;  %v2832_v39 = vsel %vm655_vm7, %v5265_v7, %v5269_v44  ;;  %v3336_v28 = vld [vmem:[#allocation2 + $0x28] sm:$0xf] }
 0x50f   : > { %2840 = vst [vmem:[#allocation3 + $0x410] sm:$0xf0] %v2832_v39  ;;  %v3346_v62 = vrot.slane %v3336_v28, 4 }
 0x510   : > { %v2891_v17 = vpop.permute.xlu0 %2890 }
 0x511   : > { %v2900_v50 = vsel %vm5719_vm9, %v2891_v17, %v2893_v19  ;;  %v3304_v17 = vld [vmem:[#allocation2 + $0x28] sm:$0xf]  ;;  %vm5729_vm9 = vmmov %vm5727_vm1 }
 0x512   : > { %2908 = vst [vmem:[#allocation3 + $0xa8] sm:$0xf0] %v2900_v50  ;;  %2758 = vrot.lane.b32.xlu2 %v2750_v33, %s5708_s15  ;;  %s5723_s15 = smov 88   ;;  %v3235_v50 = vld [vmem:[#allocation2 + $0x28] sm:$0xf] }
 0x513   : > { %2652 = vrot.lane.b32.xlu1 %v2639_v11, %s5709_s12  ;;  %v3337_v11 = vld [vmem:[#allocation2 + $0x38] sm:$0xf] }
 0x514   : > { %v5280_v8 = vpop.permute.xlu2 %2756 }
 0x515   : > { %v3037_v61 = vpop.permute.xlu1 %3036 }
 0x516   : > { %2689 = vrot.lane.b32.xlu0 %v2681_v32, %s5710_s16  ;;  %v3046_v40 = vsel %vm5720_vm5, %v3037_v61, %v5257_v20  ;;  %vm5730_vm5 = vcmask 318464  }
 0x517   : > { %3054 = vst [vmem:[#allocation3 + $0x3c8] sm:$0xf] %v3046_v40  ;;  %v3268_v40 = vld [vmem:[#allocation2 + $0x38] sm:$0xf] }
 0x518   : > { %v3074_v25 = vpop.permute.xlu0 %3073 }
 0x519   : > { %v3529_v29 = vld [vmem:[#allocation3 + $0xa8] sm:$0xff] }
 0x51a   : > { %3605 = vmatpush.msrb.mxu1 %v3529_v29  ;;  %2654 = vrot.lane.b32.xlu2 %v2640_v10, %s5709_s12  ;;  %v3236_v29 = vld [vmem:[#allocation2 + $0x38] sm:$0xf]  ;;  %v3278_v10 = vrot.slane %v3268_v40, 4 }
 0x51b   : > { %2691 = vrot.lane.b32.xlu1 %v2682_v0, %s5710_s16  ;;  %v3530_v0 = vld [vmem:[#allocation3 + $0x1b8] sm:$0xff] }
 0x51c   : > { %v3005_v19 = vpop.permute.xlu2 %3004 }
 0x51d   : > { %v5287_v5 = vpop.permute.xlu1 %3075 }
 0x51e   : > { %2585 = vrot.lane.b32.xlu0 %v2571_v35, %s5712_s11  ;;  %v3083_v54 = vsel %vm5721_vm3, %v3074_v25, %v5287_v5  ;;  %v3347_v25 = vrot.slane %v3337_v11, 4  ;;  %vm5731_vm3 = vmmov %vm5722_vm0  ;;  %v3129_v11 = vld [vmem:[#allocation2 + $0x28] sm:$0xf] }
 0x51f   : > { %3091 = vst [vmem:[#allocation3 + $0x3c8] sm:$0xf0] %v3083_v54  ;;  %v3526_v54 = vld [vmem:[#allocation3 + $0x410] sm:$0xff] }
 0x520   : > { %v5292_v15 = vpop.permute.xlu0 %2719 }
 0x521   : > { %v2726_v63 = vsel %vm546_vm4, %v5271_v36, %v5292_v15 }
 0x522   : > { %2734 = vst [vmem:[#allocation3 + $0x218] sm:$0xf] %v2726_v63  ;;  %2583 = vrot.lane.b32.xlu2 %v2570_v55, %s5712_s11 }
 0x523   : > { %2620 = vrot.lane.b32.xlu1 %v2612_v1, %s5713_s29  ;;  %v3267_v1 = vld [vmem:[#allocation2 + $0x28] sm:$0xf] }
 0x524   : > { %v5301_v3 = vpop.permute.xlu2 %2650  ;;  %v3277_v43 = vrot.slane %v3267_v1, 4 }
 0x525   : > { %v5299_v23 = vpop.permute.xlu1 %2754 }
 0x526   : > { %3385 = vrot.lane.b32.xlu0 %v3373_v41, %s4171_s28  ;;  %v2763_v30 = vsel %vm5722_vm0, %v5299_v23, %v5280_v8  ;;  %v3541_v4 = vld [vmem:[#allocation3 + $0x3c8] sm:$0xff]  ;;  %vm5734_vm0 = vcmask 343040  }
 0x527   : > { %2771 = vst [vmem:[#allocation3 + $0x218] sm:$0xf0] %v2763_v30  ;;  %3638 = vmatpush.msrb.mxu2 %v3541_v4  ;;  %v3198_v4 = vld [vmem:[#allocation2 + $0x28] sm:$0xf] }
 0x528   : > { %v2785_v49 = vpop.permute.xlu0 %2784 }
 0x529   : > { %v2794_v21 = vsel %vm617_vm6, %v2785_v49, %v5259_v52  ;;  %v3166_v49 = vld [vmem:[#allocation2 + $0x28] sm:$0xf] }
 0x52a   : > { %2802 = vst [vmem:[#allocation3 + $0x228] sm:$0xf] %v2794_v21  ;;  %2622 = vrot.lane.b32.xlu2 %v2613_v53, %s5713_s29  ;;  %v3208_v21 = vrot.slane %v3198_v4, 4  ;;  %s5733_s29 = smov 106  }
 0x52b   : > { %3387 = vrot.lane.b32.xlu1 %v3374_v51, %s4171_s28 }
 0x52c   : > { %v2716_v26 = vpop.permute.xlu2 %2715 }
 0x52d   : > { %v2822_v27 = vpop.permute.xlu1 %2821  ;;  %v2725_v58 = vsel %vm546_vm4, %v2716_v26, %v5271_v36 }
 0x52e   : > { %3318 = vrot.lane.b32.xlu0 %v3305_v37, %s5723_s15  ;;  %v2831_v57 = vsel %vm655_vm7, %v2822_v27, %v5265_v7  ;;  %2733 = vst [vmem:[#allocation3 + $0x200] sm:$0xf] %v2725_v58  ;;  %v3522_v41 = vld [vmem:[#allocation3 + $0x218] sm:$0xff] }
 0x52f   : > { %2839 = vst [vmem:[#allocation3 + $0x228] sm:$0xf0] %v2831_v57  ;;  %v3199_v27 = vld [vmem:[#allocation2 + $0x38] sm:$0xf] }
 0x530   : > { %v5316_v52 = vpop.permute.xlu0 %3006  ;;  %v3209_v28 = vrot.slane %v3199_v27, 4 }
 0x531   : > { %v3014_v39 = vsel %vm5724_vm2, %v3005_v19, %v5316_v52  ;;  %vm5735_vm2 = vcmask 334848  }
 0x532   : > { %3022 = vst [vmem:[#allocation3 + $0x88] sm:$0xf0] %v3014_v39  ;;  %3316 = vrot.lane.b32.xlu2 %v3304_v17, %s5723_s15  ;;  %v3167_v39 = vld [vmem:[#allocation2 + $0x38] sm:$0xf]  ;;  %v3408_v17 = vld [vmem:[%s5582_s6 + $0x8] sm:$0xf] }
 0x533   : > { %3353 = vrot.lane.b32.xlu1 %v3346_v62, %s5725_s19  ;;  %v3098_v62 = vld [vmem:[#allocation2 + $0x38] sm:$0xf]  ;;  %3575 = vst [vmem:[#allocation1 + $0x10] ss:$2 sm:$0xff] %v3408_v17 }
 0x534   : > { %v5322_v7 = vpop.permute.xlu2 %2581  ;;  %v2992_v17 = vld [vmem:[#allocation2 + $0x38] sm:$0xf] }
 0x535   : > { %v2649_v56 = vpop.permute.xlu1 %2648 }
 0x536   : > { %3247 = vrot.lane.b32.xlu0 %v3235_v50, %s5726_s23  ;;  %v2657_v36 = vsel %vm5727_vm1, %v2649_v56, %v5301_v3  ;;  %v3525_v33 = vld [vmem:[#allocation3 + $0x228] sm:$0xff]  ;;  %vm5736_vm1 = vcmask 7168  }
 0x537   : > { %2665 = vst [vmem:[#allocation3 + $0xd8] sm:$0xf] %v2657_v36  ;;  %3606 = vmatpush.msrb.mxu1 %v3525_v33 }
 0x538   : > { %v5327_v32 = vpop.permute.xlu0 %2685 }
 0x539   : > { %v3537_v61 = vld [vmem:[#allocation3 + $0x88] sm:$0xff] }
 0x53a   : > { %3639 = vmatpush.msrb.mxu2 %v3537_v61  ;;  %3355 = vrot.lane.b32.xlu2 %v3347_v25, %s5725_s19  ;;  %v3097_v25 = vld [vmem:[#allocation2 + $0x28] sm:$0xf] }
 0x53b   : > { %3249 = vrot.lane.b32.xlu1 %v3236_v29, %s5726_s23  ;;  %v3028_v29 = vld [vmem:[#allocation2 + $0x28] sm:$0xf] }
 0x53c   : > { %3664 = vmatpush.msra.mxu2 %v3534_v34  ;;  %v2647_v35 = vpop.permute.xlu2 %2646  ;;  %v3139_v34 = vrot.slane %v3129_v11, 4  ;;  %v3490_v11 = vld [vmem:[#allocation3 + $0x3e0] sm:$0xff] }
 0x53d   : > { %v5331_v19 = vpop.permute.xlu1 %2687  ;;  %v2656_v47 = vsel %vm5729_vm9, %v2647_v35, %v2649_v56  ;;  %vm5737_vm9 = vmmov %vm5735_vm2 }
 0x53e   : > { %3665 = vmatpush.msra.mxu2 %v3530_v0  ;;  %3286 = vrot.lane.b32.xlu0 %v3278_v10, %s5728_s24  ;;  %v2694_v63 = vsel %vm5730_vm5, %v5327_v32, %v5331_v19  ;;  %2664 = vst [vmem:[#allocation3 + $0x148] sm:$0xf] %v2656_v47 }
 0x53f   : > { %2702 = vst [vmem:[#allocation3 + $0xd8] sm:$0xf0] %v2694_v63 }
 0x540   : > { %3666 = vmatpush.msra.mxu2 %v3526_v54  ;;  %v2753_v55 = vpop.permute.xlu0 %2752  ;;  %v3130_v54 = vld [vmem:[#allocation2 + $0x38] sm:$0xf] }
 0x541   : > { %v2762_v30 = vsel %vm5731_vm3, %v2753_v55, %v5299_v23  ;;  %vm3581_vm3 = vcmask 457728   ;;  %v3140_v4 = vrot.slane %v3130_v54, 4 }
 0x542   : > { %3667 = vmatpush.msra.mxu2 %v3522_v41  ;;  %2770 = vst [vmem:[#allocation3 + $0x200] sm:$0xf0] %v2762_v30  ;;  %3284 = vrot.lane.b32.xlu2 %v3277_v43, %s5728_s24  ;;  %v3061_v41 = vld [vmem:[#allocation2 + $0x38] sm:$0xf] }
 0x543   : > { %3178 = vrot.lane.b32.xlu1 %v3166_v49, %s5732_s27  ;;  %v3510_v30 = vld [vmem:[#allocation3 + $0x378] sm:$0xff] }
 0x544   : > { %v2615_v53 = vpop.permute.xlu2 %2614  ;;  %v3029_v43 = vld [vmem:[#allocation2 + $0x38] sm:$0xf] }
 0x545   : > { %v2580_v51 = vpop.permute.xlu1 %2579  ;;  %v3506_v49 = vld [vmem:[#allocation3 + $0xb8] sm:$0xff] }
 0x546   : > { %3215 = vrot.lane.b32.xlu0 %v3208_v21, %s5733_s29  ;;  %v2588_v37 = vsel %vm5734_vm0, %v2580_v51, %v5322_v7  ;;  %v3518_v23 = vld [vmem:[#allocation3 + $0xd8] sm:$0xff]  ;;  %v3071_v21 = vrot.slane %v3061_v41, 4  ;;  %v3493_v41 = vld [vmem:[#allocation3 + $0x128] sm:$0xff] }
 0x547   : > { %2596 = vst [vmem:[#allocation3 + $0x4d0] sm:$0xf] %v2588_v37  ;;  %3668 = vmatpush.msra.mxu2 %v3518_v23 }
 0x548   : > { %v2617_v26 = vpop.permute.xlu0 %2616 }
 0x549   : > { %v2624_v57 = vsel %vm5735_vm2, %v2615_v53, %v2617_v26  ;;  %v3521_v58 = vld [vmem:[#allocation3 + $0x200] sm:$0xff]  ;;  %vm5738_vm2 = vcmask 15360  }
 0x54a   : > { %2632 = vst [vmem:[#allocation3 + $0x108] sm:$0xf0] %v2624_v57  ;;  %3607 = vmatpush.msrb.mxu1 %v3521_v58  ;;  %3180 = vrot.lane.b32.xlu2 %v3167_v39, %s5732_s27  ;;  %v3498_v58 = vld [vmem:[#allocation3 + $0x360] sm:$0xff] }
 0x54b   : > { %3217 = vrot.lane.b32.xlu1 %v3209_v28, %s5733_s29  ;;  %v3509_v28 = vld [vmem:[#allocation3 + $0x308] sm:$0xff] }
 0x54c   : > { %v2966_v50 = vpop.permute.xlu2 %2965 }
 0x54d   : > { %v5352_v56 = vpop.permute.xlu1 %2618  ;;  %v2971_v36 = vsel %vm5736_vm1, %v5212_v42, %v2966_v50  ;;  %v5362_v42 = vld.sshfl [vmem:[#allocation1 + $0x10] sm:$0xff pattern:$0x75316420]  ;;  %vm5739_vm1 = vmmov %vm5738_vm2 }
 0x54e   : > { %3111 = vrot.lane.b32.xlu0 %v3098_v62, %s5658_s17  ;;  %v2625_v33 = vsel %vm5737_vm9, %v2617_v26, %v5352_v56  ;;  %2979 = vst [vmem:[#allocation3 + $0x58] sm:$0xf0] %v2971_v36  ;;  %4036 = vmatmul.msk.f32.vlgmr.msrb.gmra.mxu2 %vm3581_vm3, %v5362_v42  ;;  %v3060_v26 = vld [vmem:[#allocation2 + $0x28] sm:$0xf]  ;;  %vm5740_vm9 = vcmask 7168   ;;  %v3494_v36 = vld [vmem:[#allocation3 + $0x150] sm:$0xff] }
 0x54f   : > { %2633 = vst [vmem:[#allocation3 + $0x4d0] sm:$0xf0] %v2625_v33  ;;  %v3375_v62 = vld [vmem:[#allocation2 + $0x58] sm:$0xf]  ;;  %v3505_v33 = vld [vmem:[#allocation3 + $0x280] sm:$0xff] }
 0x550   : > { %v2684_v61 = vpop.permute.xlu0 %2683 }
 0x551   : > { %v2693_v40 = vsel %vm5730_vm5, %v2684_v61, %v5327_v32  ;;  %v5369_v32 = vld.sshfl [vmem:[#allocation1] sm:$0xff pattern:$0x75316420]  ;;  %v3002_v61 = vrot.slane %v2992_v17, 4  ;;  %vm5741_vm5 = vcmask 146432  }
 0x552   : > { %2701 = vst [vmem:[#allocation3 + $0x148] sm:$0xf0] %v2693_v40  ;;  %3109 = vrot.lane.b32.xlu2 %v3097_v25, %s5658_s17  ;;  %3600 = vmatmul.f32.vlgmr.msrb.gmra.mxu3 %v5369_v32 }
 0x553   : > { %3146 = vrot.lane.b32.xlu1 %v3139_v34, %s5659_s18  ;;  %3660 = vmatmul.f32.vlgmr.msrb.gmra.mxu0 %v5369_v32  ;;  %v3486_v34 = vld [vmem:[#allocation3 + $0x208] sm:$0xff] }
 0x554   : > { %v5364_v0 = vpop.permute.xlu2 %2861 }
 0x555   : > { %v2578_v10 = vpop.permute.xlu1 %2577 }
 0x556   : > { %3040 = vrot.lane.b32.xlu0 %v3028_v29, %s5660_s20  ;;  %v2587_v35 = vsel %vm5734_vm0, %v2578_v10, %v2580_v51  ;;  %v3514_v63 = vld [vmem:[#allocation3 + $0x4d0] sm:$0xff]  ;;  %vm5743_vm0 = vmmov %vm5741_vm5 }
 0x557   : > { %2595 = vst [vmem:[#allocation3 + $0x108] sm:$0xf] %v2587_v35  ;;  %3669 = vmatpush.msra.mxu2 %v3514_v63  ;;  %v2991_v35 = vld [vmem:[#allocation2 + $0x28] sm:$0xf]  ;;  %v3482_v63 = vld [vmem:[#allocation3 + $0x330] sm:$0xff] }
 0x558   : > { %v2929_v47 = vpop.permute.xlu0 %2928 }
 0x559   : > { %v2934_v1 = vsel %vm5738_vm2, %v5205_v9, %v2929_v47  ;;  %v3517_v55 = vld [vmem:[#allocation3 + $0x148] sm:$0xff]  ;;  %3670 = vmatpush.msra.mxu2 %v3510_v30  ;;  %v3502_v9 = vld [vmem:[#allocation3 + $0x370] sm:$0xff] }
 0x55a   : > { %2942 = vst [vmem:[#allocation3 + $0x58] sm:$0xf] %v2934_v1  ;;  %3608 = vmatpush.msrb.mxu1 %v3517_v55  ;;  %3148 = vrot.lane.b32.xlu2 %v3140_v4, %s5659_s18  ;;  %v3306_v55 = vld [vmem:[#allocation2 + $0x58] sm:$0xf]  ;;  %v3478_v30 = vld [vmem:[#allocation3 + $0x2f0] sm:$0xff]  ;;  %v3001_v4 = vrot.slane %v2991_v35, 4 }
 0x55b   : > { %3042 = vrot.lane.b32.xlu1 %v3029_v43, %s5660_s20  ;;  %3671 = vmatpush.msra.mxu2 %v3506_v49  ;;  %v3474_v43 = vld [vmem:[#allocation3 + $0x480] sm:$0xff]  ;;  %v3467_v35 = vld [vmem:[#allocation3 + $0x3f8] sm:$0xff] }
 0x55c   : > { %v5378_v53 = vpop.permute.xlu2 %2790  ;;  %v5399_v49 = vld.sshfl [vmem:[#allocation1 + $0x8] sm:$0xff pattern:$0x75316420] }
 0x55d   : > { %v2931_v51 = vpop.permute.xlu1 %2930  ;;  %v2796_v37 = vsel %vm617_vm6, %v5237_v38, %v5378_v53  ;;  %3672 = vmatpush.msra.mxu2 %v3502_v9  ;;  %v3070_v38 = vrot.slane %v3060_v26, 4 }
 0x55e   : > { %3079 = vrot.lane.b32.xlu0 %v3071_v21, %s5661_s21  ;;  %v2935_v27 = vsel %vm5739_vm1, %v2929_v47, %v2931_v51  ;;  %v3513_v23 = vld [vmem:[#allocation3 + $0x108] sm:$0xff]  ;;  %2804 = vst [vmem:[#allocation3 + $0x1b0] sm:$0xf] %v2796_v37  ;;  %v3497_v47 = vld [vmem:[#allocation3 + $0x3d0] sm:$0xff]  ;;  %v3338_v21 = vld [vmem:[#allocation2 + $0x58] sm:$0xf] }
 0x55f   : > { %3609 = vmatpush.msrb.mxu1 %v3513_v23  ;;  %2943 = vst [vmem:[#allocation3 + $0x490] sm:$0xf] %v2935_v27  ;;  %3673 = vmatpush.msra.mxu2 %v3498_v58  ;;  %v3485_v51 = vld [vmem:[#allocation3 + $0x130] sm:$0xff]  ;;  %v3269_v27 = vld [vmem:[#allocation2 + $0x58] sm:$0xf]  ;;  %vm5748_vm1 = vcmask 318464  }
 0x560   : > { %v2968_v57 = vpop.permute.xlu0 %2967 }
 0x561   : > { %v2972_v39 = vsel %vm5740_vm9, %v2966_v50, %v2968_v57  ;;  %3610 = vmatpush.msrb.mxu1 %v3509_v28  ;;  %3674 = vmatpush.msra.mxu2 %v3494_v36  ;;  %v3501_v50 = vld [vmem:[#allocation3 + $0x3a0] sm:$0xff]  ;;  %v3468_v57 = vld [vmem:[#allocation3 + $0x8] sm:$0xff]  ;;  %v3481_v28 = vld [vmem:[#allocation3 + $0x70] sm:$0xff] }
 0x562   : > { %2980 = vst [vmem:[#allocation3 + $0x490] sm:$0xf0] %v2972_v39  ;;  %3077 = vrot.lane.b32.xlu2 %v3070_v38, %s5661_s21  ;;  %v3348_v39 = vrot.slane %v3338_v21, 4  ;;  %v3464_v36 = vld [vmem:[#allocation3 + $0x1c0] sm:$0xff]  ;;  %v3279_v38 = vrot.slane %v3269_v27, 4  ;;  %v3451_v27 = vld [vmem:[#allocation3 + $0x30] sm:$0xff]  ;;  %vm5749_vm9 = vmmov %vm5748_vm1 }
 0x563   : > { %3389 = vrot.lane.b32.xlu1 %v3375_v62, %s4171_s28  ;;  %3611 = vmatpush.msrb.mxu1 %v3505_v33  ;;  %v3200_v62 = vld [vmem:[#allocation2 + $0x58] sm:$0xf]  ;;  %v3460_v33 = vld [vmem:[#allocation3 + $0x2b0] sm:$0xff] }
 0x564   : > { %3675 = vmatpush.msra.mxu2 %v3490_v11  ;;  %v5388_v40 = vpop.permute.xlu2 %2829  ;;  %v3210_v11 = vrot.slane %v3200_v62, 4  ;;  %v3062_v21 = vld [vmem:[#allocation2 + $0x58] sm:$0xf] }
 0x565   : > { %v2860_v25 = vpop.permute.xlu1 %2859  ;;  %3612 = vmatpush.msrb.mxu1 %v3501_v50  ;;  %v3471_v50 = vld [vmem:[#allocation3 + $0x2a8] sm:$0xff]  ;;  %v3072_v62 = vrot.slane %v3062_v21, 4 }
 0x566   : > { %3010 = vrot.lane.b32.xlu0 %v3002_v61, %s5662_s22  ;;  %3676 = vmatpush.msra.mxu2 %v3486_v34  ;;  %v2865_v29 = vsel %vm688_vm8, %v5230_v24, %v2860_v25  ;;  %v2866_v10 = vsel %vm688_vm8, %v2860_v25, %v5364_v0  ;;  %v3237_v24 = vld [vmem:[#allocation2 + $0x58] sm:$0xf]  ;;  %v3489_v0 = vld [vmem:[#allocation3 + $0x1d0] sm:$0xff]  ;;  %vm5742_vm8 = vcmask 179200  }
 0x567   : > { %2873 = vst [vmem:[#allocation3 + $0x4a0] sm:$0xf] %v2865_v29  ;;  %3613 = vmatpush.msrb.mxu1 %v3497_v47  ;;  %v3473_v61 = vld [vmem:[#allocation3 + $0x90] sm:$0xff] }
 0x568   : > { %v2897_v54 = vpop.permute.xlu0 %2896  ;;  %2874 = vst [vmem:[#allocation3 + $0x38] sm:$0xf] %v2866_v10  ;;  %3677 = vmatpush.msra.mxu2 %v3482_v63  ;;  %v3456_v34 = vld [vmem:[#allocation3 + $0x390] sm:$0xff] }
 0x569   : > { %v2902_v1 = vsel %vm5741_vm5, %v5218_v2, %v2897_v54  ;;  %3614 = vmatpush.msrb.mxu1 %v3493_v41  ;;  %v3472_v2 = vld [vmem:[#allocation3 + $0x1f8] sm:$0xff] }
 0x56a   : > { %2910 = vst [vmem:[#allocation3 + $0x4a0] sm:$0xf0] %v2902_v1  ;;  %3678 = vmatpush.msra.mxu2 %v3478_v30  ;;  %3008 = vrot.lane.b32.xlu2 %v3001_v4, %s5662_s22  ;;  %v3463_v1 = vld [vmem:[#allocation3 + $0x398] sm:$0xff]  ;;  %v3444_v30 = vld [vmem:[#allocation3 + $0x180] sm:$0xff] }
 0x56b   : > { %3320 = vrot.lane.b32.xlu1 %v3306_v55, %s5723_s15  ;;  %3615 = vmatpush.msrb.mxu1 %v3489_v0  ;;  %v3448_v55 = vld [vmem:[#allocation3 + $0x1e8] sm:$0xff]  ;;  %v3099_v41 = vld [vmem:[#allocation2 + $0x58] sm:$0xf]  ;;  %v3440_v0 = vld [vmem:[#allocation3 + $0x290] sm:$0xff] }
 0x56c   : > { %3679 = vmatpush.msra.mxu2 %v3474_v43  ;;  %v5401_v9 = vpop.permute.xlu2 %2758  ;;  %v3030_v4 = vld [vmem:[#allocation2 + $0x58] sm:$0xf] }
 0x56d   : > { %v2899_v37 = vpop.permute.xlu1 %2898  ;;  %v2764_v23 = vsel %vm5742_vm8, %v5280_v8, %v5401_v9  ;;  %3616 = vmatpush.msrb.mxu1 %v3485_v51  ;;  %3680 = vmatmul.f32.vlgmr.msra.gmra.mxu2 %v5399_v49  ;;  %v3477_v8 = vld [vmem:[#allocation3 + $0x10] sm:$0xff] }
 0x56e   : > { %3764 = vmatpush.msrb.mxu2 %v3472_v2  ;;  %3251 = vrot.lane.b32.xlu0 %v3237_v24, %s5726_s23  ;;  %v2903_v26 = vsel %vm5743_vm0, %v2897_v54, %v2899_v37  ;;  %2772 = vst [vmem:[#allocation3] sm:$0xf0] %v2764_v23  ;;  %v3452_v54 = vld [vmem:[#allocation3 + $0xa0] sm:$0xff]  ;;  %v3455_v24 = vld [vmem:[#allocation3 + $0x458] sm:$0xff]  ;;  %v3436_v23 = vld [vmem:[#allocation3 + $0x210] sm:$0xff] }
 0x56f   : > { %2911 = vst [vmem:[#allocation3 + $0x38] sm:$0xf0] %v2903_v26  ;;  %3617 = vmatpush.msrb.mxu1 %v3481_v28  ;;  %v3131_v2 = vld [vmem:[#allocation2 + $0x58] sm:$0xf]  ;;  %v3432_v28 = vld [vmem:[#allocation3 + $0x260] sm:$0xff] }
 0x570   : > { %3765 = vmatpush.msrb.mxu2 %v3468_v57  ;;  %v2793_v58 = vpop.permute.xlu0 %2792 }
 0x571   : > { %v2797_v17 = vsel %vm617_vm6, %v5378_v53, %v2793_v58  ;;  %3618 = vmatpush.msrb.mxu1 %v3477_v8  ;;  %vm5744_vm6 = vcmask 343040   ;;  %v3447_v58 = vld [vmem:[#allocation3 + $0x278] sm:$0xff] }
 0x572   : > { %2805 = vst [vmem:[#allocation3 + $0x2d8] sm:$0xf] %v2797_v17  ;;  %3766 = vmatpush.msrb.mxu2 %v3464_v36  ;;  %3357 = vrot.lane.b32.xlu2 %v3348_v39, %s5725_s19  ;;  %v3141_v39 = vrot.slane %v3131_v2, 4  ;;  %v3428_v17 = vld [vmem:[#allocation3 + $0x78] sm:$0xff]  ;;  %vm5750_vm5 = vmmov %vm5744_vm6 }
 0x573   : > { %3288 = vrot.lane.b32.xlu1 %v3279_v38, %s5728_s24  ;;  %3619 = vmatpush.msrb.mxu1 %v3473_v61  ;;  %v3565_v36 = vld [vmem:[%s5583_s7] sm:$0xf]  ;;  %v3424_v38 = vld [vmem:[#allocation3 + $0x340] sm:$0xff] }
 0x574   : > { %3767 = vmatpush.msrb.mxu2 %v3460_v33  ;;  %v5413_v53 = vpop.permute.xlu2 %2654  ;;  %3620 = vmatmul.f32.vlgmr.msrb.gmra.mxu1 %v5399_v49 }
 0x575   : > { %3704 = vmatpush.msra.mxu1 %v3471_v50  ;;  %v2828_v25 = vpop.permute.xlu1 %2827 }
 0x576   : > { %3768 = vmatpush.msrb.mxu2 %v3456_v34  ;;  %3219 = vrot.lane.b32.xlu0 %v3210_v11, %s5733_s29  ;;  %v2833_v29 = vsel %vm655_vm7, %v5269_v44, %v2828_v25  ;;  %v2834_v10 = vsel %vm655_vm7, %v2828_v25, %v5388_v40  ;;  %v3168_v44 = vld [vmem:[#allocation2 + $0x58] sm:$0xf]  ;;  %vm5745_vm7 = vmmov %vm5742_vm8  ;;  %v3435_v34 = vld [vmem:[#allocation3 + $0x3e8] sm:$0xff]  ;;  %vm5751_vm8 = vcmask 334848  }
 0x577   : > { %2841 = vst [vmem:[#allocation3 + $0x1b0] sm:$0xf0] %v2833_v29  ;;  %3705 = vmatpush.msra.mxu1 %v3467_v35  ;;  %v3459_v40 = vld [vmem:[#allocation3 + $0x178] sm:$0xff]  ;;  %v3420_v25 = vld [vmem:[#allocation3 + $0x1e0] sm:$0xff]  ;;  %v3431_v35 = vld [vmem:[#allocation3 + $0x168] sm:$0xff] }
 0x578   : > { %3769 = vmatpush.msrb.mxu2 %v3452_v54  ;;  %v2722_v47 = vpop.permute.xlu0 %2721  ;;  %2842 = vst [vmem:[#allocation3 + $0x2d8] sm:$0xf0] %v2834_v10  ;;  %v2993_v11 = vld [vmem:[#allocation2 + $0x58] sm:$0xf]  ;;  %v3416_v54 = vld [vmem:[#allocation3 + $0x20] sm:$0xff]  ;;  %vm5752_vm0 = vmmov %vm5751_vm8 }
 0x579   : > { %v2727_v63 = vsel %vm546_vm4, %v5292_v15, %v2722_v47  ;;  %3706 = vmatpush.msra.mxu1 %v3463_v1  ;;  %v3423_v1 = vld [vmem:[#allocation3 + $0x4b8] sm:$0xff] }
 0x57a   : > { %2735 = vst [vmem:[#allocation3] sm:$0xf] %v2727_v63  ;;  %3770 = vmatpush.msrb.mxu2 %v3448_v55  ;;  %3182 = vrot.lane.b32.xlu2 %v3168_v44, %s5732_s27  ;;  %v3412_v63 = vld [vmem:[#allocation3 + $0x4b0] sm:$0xff] }
 0x57b   : > { %3707 = vmatpush.msra.mxu1 %v3459_v40  ;;  %3113 = vrot.lane.b32.xlu1 %v3099_v41, %s5658_s17  ;;  %v3419_v40 = vld [vmem:[#allocation3 + $0x120] sm:$0xff]  ;;  %s5770_s17 = sshll.u32 %s5772_s14, 4 }
 0x57c   : > { %3771 = vmatpush.msrb.mxu2 %v3444_v30  ;;  %v5425_v15 = vpop.permute.xlu2 %2583  ;;  %s359_s26 = scalar_lea.vmem %s5586_s10, %s5770_s17 }
 0x57d   : > { %3708 = vmatpush.msra.mxu1 %v3455_v24  ;;  %v2724_v43 = vpop.permute.xlu1 %2723  ;;  %v2589_v51 = vsel %vm5744_vm6, %v5322_v7, %v5425_v15  ;;  %v3443_v7 = vld [vmem:[#allocation3 + $0xf8] sm:$0xff]  ;;  %vm5753_vm6 = vcmask 891904  }
 0x57e   : > { %3772 = vmatpush.msrb.mxu2 %v3440_v0  ;;  %3044 = vrot.lane.b32.xlu0 %v3030_v4, %s5660_s20  ;;  %v2728_v37 = vsel %vm546_vm4, %v2722_v47, %v2724_v43  ;;  %2597 = vst [vmem:[#allocation3 + $0x428] sm:$0xf] %v2589_v51  ;;  %vm5746_vm4 = vcmask 326656   ;;  %v3003_v47 = vrot.slane %v2993_v11, 4  ;;  %v3415_v24 = vld [vmem:[#allocation3 + $0x358] sm:$0xff]  ;;  %v3411_v0 = vld [vmem:[#allocation3 + $0x2d0] sm:$0xff] }
 0x57f   : > { %3709 = vmatpush.msra.mxu1 %v3451_v27  ;;  %2736 = vst [vmem:[#allocation3 + $0x140] sm:$0xf] %v2728_v37  ;;  %vm5747_vm2 = vmmov %vm5746_vm4 }
 0x580   : > { %3773 = vmatpush.msrb.mxu2 %v3436_v23  ;;  %v2761_v26 = vpop.permute.xlu0 %2760 }
 0x581   : > { %v2765_v57 = vsel %vm5745_vm7, %v5401_v9, %v2761_v26  ;;  %3710 = vmatpush.msra.mxu1 %v3447_v58  ;;  %v3439_v9 = vld [vmem:[#allocation3 + $0x80] sm:$0xff]  ;;  %vm5754_vm7 = vcmask 867328  }
 0x582   : > { %2773 = vst [vmem:[#allocation3 + $0x140] sm:$0xf0] %v2765_v57  ;;  %3774 = vmatpush.msrb.mxu2 %v3432_v28  ;;  %3150 = vrot.lane.b32.xlu2 %v3141_v39, %s5659_s18 }
 0x583   : > { %3711 = vmatpush.msra.mxu1 %v3443_v7  ;;  %3081 = vrot.lane.b32.xlu1 %v3072_v62, %s5661_s21 }
 0x584   : > { %3775 = vmatpush.msrb.mxu2 %v3428_v17  ;;  %v2623_v8 = vpop.permute.xlu2 %2622 }
 0x585   : > { %3712 = vmatpush.msra.mxu1 %v3439_v9  ;;  %v2653_v33 = vpop.permute.xlu1 %2652 }
 0x586   : > { %3776 = vmatpush.msrb.mxu2 %v3424_v38  ;;  %3568 = vperm.xlu0 %4132, %v3565_v36   ;;  %v2658_v61 = vsel %vm5746_vm4, %v5301_v3, %v2653_v33  ;;  %v2659_v50 = vsel %vm5747_vm2, %v2653_v33, %v5413_v53  ;;  %v3857_v3 = vld [vmem:[%s5585_s9] sm:$0xf]  ;;  %v3427_v53 = vld [vmem:[#allocation3 + $0x350] sm:$0xff]  ;;  %vm5755_vm4 = vcmask 900096   ;;  %vm5756_vm2 = vmmov %vm5754_vm7 }
 0x587   : > { %2666 = vst [vmem:[#allocation3 + $0x1a0] sm:$0xf] %v2658_v61  ;;  %3713 = vmatpush.msra.mxu1 %v3435_v34 }
 0x588   : > { %3777 = vmatpush.msrb.mxu2 %v3420_v25  ;;  %v2690_v29 = vpop.permute.xlu0 %2689  ;;  %2667 = vst [vmem:[#allocation3 + $0xe8] sm:$0xf] %v2659_v50 }
 0x589   : > { %v2695_v10 = vsel %vm5748_vm1, %v5331_v19, %v2690_v29  ;;  %3714 = vmatpush.msra.mxu1 %v3431_v35  ;;  %vm5757_vm1 = vmmov %vm5753_vm6 }
 0x58a   : > { %2703 = vst [vmem:[#allocation3 + $0x1a0] sm:$0xf0] %v2695_v10  ;;  %3778 = vmatpush.msrb.mxu2 %v3416_v54  ;;  %3012 = vrot.lane.b32.xlu2 %v3003_v47, %s5662_s22 }
 0x58b   : > { %3715 = vmatpush.msra.mxu1 %v3427_v53  ;;  %3860 = vperm.xlu1 %4143, %v3857_v3  }
 0x58c   : > { %3779 = vmatpush.msrb.mxu2 %v3412_v63  ;;  %v3317_v19 = vpop.permute.xlu2 %3316 }
 0x58d   : > { %3780 = vmatmul.f32.vlgmr.msrb.gmra.mxu2 %v5369_v32  ;;  %3716 = vmatpush.msra.mxu1 %v3423_v1  ;;  %v2692_v55 = vpop.permute.xlu1 %2691  ;;  %v3323_v44 = vsel %vm1160_vm12, %v5164_v46, %v3317_v19 }
 0x58e   : > { %v2696_v41 = vsel %vm5749_vm9, %v2690_v29, %v2692_v55  ;;  %3331 = vst [vmem:[#allocation3 + $0xd0] sm:$0xf] %v3323_v44  ;;  %vm5758_vm9 = vcmask 1039360  }
 0x58f   : > { %3717 = vmatpush.msra.mxu1 %v3419_v40  ;;  %2704 = vst [vmem:[#allocation3 + $0xe8] sm:$0xf0] %v2696_v41 }
 0x590   : > { %v2586_v30 = vpop.permute.xlu0 %2585 }
 0x591   : > { %v2590_v4 = vsel %vm5750_vm5, %v5425_v15, %v2586_v30  ;;  %3718 = vmatpush.msra.mxu1 %v3415_v24  ;;  %vm5759_vm5 = vcmask 883712  }
 0x592   : > { %2598 = vst [vmem:[#allocation3 + $0x118] sm:$0xf] %v2590_v4 }
 0x593   : > { %3719 = vmatpush.msra.mxu1 %v3411_v0 }
 0x594   : > { %3720 = vmatmul.f32.vlgmr.msra.gmra.mxu1 %v5369_v32  ;;  %v5456_v43 = vpop.permute.xlu2 %3355 }
 0x595   : > { %v2621_v46 = vpop.permute.xlu1 %2620 }
 0x596   : > { %v2626_v2 = vsel %vm5751_vm8, %v5352_v56, %v2621_v46  ;;  %v2627_v21 = vsel %vm5752_vm0, %v2621_v46, %v2623_v8  ;;  %vm5760_vm8 = vmmov %vm5759_vm5  ;;  %vm5761_vm0 = vcmask 1031168  }
 0x597   : > { %2634 = vst [vmem:[#allocation3 + $0x428] sm:$0xf0] %v2626_v2 }
 0x598   : > { %v3386_v51 = vpop.permute.xlu0 %3385  ;;  %2635 = vst [vmem:[#allocation3 + $0x118] sm:$0xf0] %v2627_v21 }
 0x599   : > { %v3392_v15 = vsel %vm1231_vm10, %v5167_v60, %v3386_v51 }
 0x59a   : > { %3400 = vst [vmem:[#allocation3 + $0x3d8] sm:$0xf] %v3392_v15 }
 0x59c   : > { %v3285_v37 = vpop.permute.xlu2 %3284 }
 0x59d   : > { %v5463_v27 = vpop.permute.xlu1 %3387  ;;  %v3291_v32 = vsel %vm1127_vm15, %v5176_v18, %v3285_v37 }
 0x59e   : > { %v3393_v23 = vsel %vm1231_vm10, %v3386_v51, %v5463_v27  ;;  %3299 = vst [vmem:[#allocation3 + $0x3b8] sm:$0xf0] %v3291_v32 }
 0x59f   : > { %3401 = vst [vmem:[#allocation3 + $0x238] sm:$0xf] %v3393_v23  ;;  %v3531_v23 = vld [vmem:[#allocation3 + $0x4a0] sm:$0xff] }
 0x5a0   : > { %v5469_v56 = vpop.permute.xlu0 %3318 }
 0x5a1   : > { %v3324_v26 = vsel %vm1160_vm12, %v3317_v19, %v5469_v56  ;;  %v3562_v57 = vld [vmem:[#allocation3 + $0x3d8] sm:$0xff] }
 0x5a2   : > { %3332 = vst [vmem:[#allocation3 + $0xc8] sm:$0xf] %v3324_v26  ;;  %3693 = vmatpush.msra.mxu3 %v3562_v57 }
 0x5a4   : > { %v5473_v60 = vpop.permute.xlu2 %3180 }
 0x5a5   : > { %v3354_v58 = vpop.permute.xlu1 %3353 }
 0x5a6   : > { %v3360_v28 = vsel %vm1198_vm14, %v5184_v13, %v3354_v58  ;;  %v3361_v18 = vsel %vm1198_vm14, %v3354_v58, %v5456_v43  ;;  %v3563_v62 = vld [vmem:[#allocation3 + $0x238] sm:$0xff] }
 0x5a7   : > { %3368 = vst [vmem:[#allocation3 + $0xd0] sm:$0xf0] %v3360_v28  ;;  %3753 = vmatpush.msra.mxu0 %v3563_v62  ;;  %v3527_v28 = vld [vmem:[#allocation3 + $0x1b0] sm:$0xff] }
 0x5a8   : > { %v3248_v39 = vpop.permute.xlu0 %3247  ;;  %3369 = vst [vmem:[#allocation3 + $0xc8] sm:$0xf0] %v3361_v18  ;;  %v3523_v18 = vld [vmem:[#allocation3] sm:$0xff] }
 0x5a9   : > { %v3254_v7 = vsel %vm1089_vm13, %v5190_v59, %v3248_v39 }
 0x5aa   : > { %3262 = vst [vmem:[#allocation3 + $0x3b8] sm:$0xf] %v3254_v7 }
 0x5ac   : > { %v3110_v17 = vpop.permute.xlu2 %3109 }
 0x5ad   : > { %v5481_v36 = vpop.permute.xlu1 %3249  ;;  %v3116_v9 = vsel %vm5753_vm6, %v5244_v48, %v3110_v17  ;;  %vm5762_vm6 = vmmov %vm5761_vm0 }
 0x5ae   : > { %v3255_v13 = vsel %vm1089_vm13, %v3248_v39, %v5481_v36  ;;  %v3558_v38 = vld [vmem:[#allocation3 + $0xd0] sm:$0xff]  ;;  %3124 = vst [vmem:[#allocation3 + $0x288] sm:$0xf] %v3116_v9  ;;  %v3519_v39 = vld [vmem:[#allocation3 + $0x1a0] sm:$0xff]  ;;  %v3515_v9 = vld [vmem:[#allocation3 + $0x428] sm:$0xff] }
 0x5af   : > { %3694 = vmatpush.msra.mxu3 %v3558_v38  ;;  %v3559_v33 = vld [vmem:[#allocation3 + $0xc8] sm:$0xff]  ;;  %3263 = vst [vmem:[#allocation3 + $0x4a8] sm:$0xf] %v3255_v13 }
 0x5b0   : > { %v5487_v8 = vpop.permute.xlu0 %3286  ;;  %3754 = vmatpush.msra.mxu0 %v3559_v33 }
 0x5b1   : > { %v3292_v59 = vsel %vm1127_vm15, %v3285_v37, %v5487_v8  ;;  %v3554_v11 = vld [vmem:[#allocation3 + $0x3b8] sm:$0xff] }
 0x5b2   : > { %3300 = vst [vmem:[#allocation3 + $0x4a8] sm:$0xf0] %v3292_v59  ;;  %3695 = vmatpush.msra.mxu3 %v3554_v11  ;;  %v3511_v59 = vld [vmem:[#allocation3 + $0x190] sm:$0xff] }
 0x5b3   : > { %v3536_v11 = vld [vmem:[#allocation3 + $0x490] sm:$0xff] }
 0x5b4   : > { %v5491_v61 = vpop.permute.xlu2 %3148 }
 0x5b5   : > { %v3179_v48 = vpop.permute.xlu1 %3178 }
 0x5b6   : > { %v3185_v50 = vsel %vm1018_vm11, %v5196_v31, %v3179_v48  ;;  %v3186_v34 = vsel %vm1018_vm11, %v3179_v48, %v5473_v60  ;;  %v3532_v48 = vld [vmem:[#allocation3 + $0x38] sm:$0xff] }
 0x5b7   : > { %3193 = vst [vmem:[#allocation3 + $0x1c8] sm:$0xf] %v3185_v50  ;;  %v3528_v50 = vld [vmem:[#allocation3 + $0x2d8] sm:$0xff] }
 0x5b8   : > { %v3216_v25 = vpop.permute.xlu0 %3215  ;;  %3194 = vst [vmem:[#allocation3 + $0x3a8] sm:$0xf] %v3186_v34 }
 0x5b9   : > { %v3222_v29 = vsel %vm5754_vm7, %v5225_v16, %v3216_v25  ;;  %v3555_v10 = vld [vmem:[#allocation3 + $0x4a8] sm:$0xff]  ;;  %vm5763_vm7 = vmmov %vm5755_vm4 }
 0x5ba   : > { %3230 = vst [vmem:[#allocation3 + $0x1c8] sm:$0xf0] %v3222_v29  ;;  %3755 = vmatpush.msra.mxu0 %v3555_v10 }
 0x5bc   : > { %v3078_v35 = vpop.permute.xlu2 %3077 }
 0x5bd   : > { %v5499_v54 = vpop.permute.xlu1 %3217  ;;  %v3084_v47 = vsel %vm5755_vm4, %v5287_v5, %v3078_v35 }
 0x5be   : > { %v3223_v31 = vsel %vm5756_vm2, %v3216_v25, %v5499_v54  ;;  %3092 = vst [vmem:[#allocation3 + $0x1d8] sm:$0xf0] %v3084_v47  ;;  %v3524_v47 = vld [vmem:[#allocation3 + $0x140] sm:$0xff] }
 0x5bf   : > { %3231 = vst [vmem:[#allocation3 + $0x3a8] sm:$0xf0] %v3223_v31 }
 0x5c0   : > { %v5505_v3 = vpop.permute.xlu0 %3111 }
 0x5c1   : > { %v3117_v53 = vsel %vm5757_vm1, %v3110_v17, %v5505_v3  ;;  %v3550_v16 = vld [vmem:[#allocation3 + $0x1c8] sm:$0xff] }
 0x5c2   : > { %3125 = vst [vmem:[#allocation3 + $0x400] sm:$0xf] %v3117_v53  ;;  %3696 = vmatpush.msra.mxu3 %v3550_v16  ;;  %v3495_v16 = vld [vmem:[#allocation3 + $0x18] sm:$0xff] }
 0x5c4   : > { %v3009_v63 = vpop.permute.xlu2 %3008 }
 0x5c5   : > { %v3147_v1 = vpop.permute.xlu1 %3146  ;;  %v3015_v19 = vsel %vm5758_vm9, %v5316_v52, %v3009_v63 }
 0x5c6   : > { %v3153_v5 = vsel %vm5759_vm5, %v5251_v6, %v3147_v1  ;;  %v3154_v55 = vsel %vm5760_vm8, %v3147_v1, %v5491_v61  ;;  %3023 = vst [vmem:[#allocation3 + $0x50] sm:$0xf0] %v3015_v19  ;;  %v3551_v41 = vld [vmem:[#allocation3 + $0x3a8] sm:$0xff]  ;;  %v3491_v1 = vld [vmem:[#allocation3 + $0x270] sm:$0xff]  ;;  %v3516_v19 = vld [vmem:[#allocation3 + $0x118] sm:$0xff] }
 0x5c7   : > { %3161 = vst [vmem:[#allocation3 + $0x288] sm:$0xf0] %v3153_v5  ;;  %3756 = vmatpush.msra.mxu0 %v3551_v41  ;;  %v3512_v5 = vld [vmem:[#allocation3 + $0x68] sm:$0xff]  ;;  %v3483_v41 = vld [vmem:[#allocation3 + $0x3f0] sm:$0xff] }
 0x5c8   : > { %v3041_v44 = vpop.permute.xlu0 %3040  ;;  %3162 = vst [vmem:[#allocation3 + $0x400] sm:$0xf0] %v3154_v55 }
 0x5c9   : > { %v3047_v40 = vsel %vm5761_vm0, %v5257_v20, %v3041_v44 }
 0x5ca   : > { %3055 = vst [vmem:[#allocation3 + $0x1d8] sm:$0xf] %v3047_v40  ;;  %v3508_v40 = vld [vmem:[#allocation3 + $0x2b8] sm:$0xff] }
 0x5cc   : > { %v3358_v30 = vpop.permute.xlu2 %3357 }
 0x5cd   : > { %v5517_v4 = vpop.permute.xlu1 %3042  ;;  %v3362_v52 = vsel %vm1198_vm14, %v5456_v43, %v3358_v30  ;;  %v3538_v21 = vld [vmem:[#allocation3 + $0x50] sm:$0xff]  ;;  %v3535_v43 = vld [vmem:[#allocation3 + $0x58] sm:$0xff]  ;;  %vm5764_vm14 = vmmov %vm5758_vm9 }
 0x5ce   : > { %v3048_v6 = vsel %vm5762_vm6, %v3041_v44, %v5517_v4  ;;  %3370 = vst [vmem:[#allocation3 + $0x248] sm:$0xf0] %v3362_v52  ;;  %v3546_v0 = vld [vmem:[#allocation3 + $0x288] sm:$0xff] }
 0x5cf   : > { %3056 = vst [vmem:[#allocation3 + $0x380] sm:$0xf] %v3048_v6  ;;  %3697 = vmatpush.msra.mxu3 %v3546_v0  ;;  %v3547_v46 = vld [vmem:[#allocation3 + $0x400] sm:$0xff] }
 0x5d0   : > { %v5523_v24 = vpop.permute.xlu0 %3079  ;;  %3757 = vmatpush.msra.mxu0 %v3547_v46  ;;  %v3479_v6 = vld [vmem:[#allocation3 + $0xe0] sm:$0xff]  ;;  %v3475_v46 = vld [vmem:[#allocation3 + $0x470] sm:$0xff] }
 0x5d1   : > { %v3085_v20 = vsel %vm5763_vm7, %v3078_v35, %v5523_v24  ;;  %v3542_v2 = vld [vmem:[#allocation3 + $0x1d8] sm:$0xff]  ;;  %v3499_v35 = vld [vmem:[#allocation3 + $0x28] sm:$0xff] }
 0x5d2   : > { %3093 = vst [vmem:[#allocation3 + $0x380] sm:$0xf0] %v3085_v20  ;;  %3698 = vmatpush.msra.mxu3 %v3542_v2  ;;  %v3504_v20 = vld [vmem:[#allocation3 + $0x408] sm:$0xff]  ;;  %v3496_v2 = vld [vmem:[#allocation3 + $0x300] sm:$0xff] }
 0x5d4   : > { %3699 = vmatpush.msra.mxu3 %v3538_v21  ;;  %v3183_v15 = vpop.permute.xlu2 %3182 }
 0x5d5   : > { %4037 = vmatmul.msk.f32.vlgmr.msra.gmra.mxu3 %vm3581_vm3, %v5362_v42  ;;  %v3390_v51 = vpop.permute.xlu1 %3389  ;;  %v3187_v32 = vsel %vm1018_vm11, %v5473_v60, %v3183_v15  ;;  %vm5766_vm11 = vmmov %vm5758_vm9  ;;  %v3492_v15 = vld [vmem:[#allocation3 + $0x388] sm:$0xff] }
 0x5d6   : > { %3724 = vmatpush.msrb.mxu3 %v3535_v43  ;;  %v3394_v37 = vsel %vm1231_vm10, %v5463_v27, %v3390_v51  ;;  %3195 = vst [vmem:[#allocation3 + $0x368] sm:$0xf] %v3187_v32  ;;  %vm5765_vm10 = vmmov %vm5759_vm5  ;;  %v3601_v43 = vpop.f32.mrf.mxu3 }
 0x5d7   : > { %3402 = vst [vmem:[#allocation3 + $0x2c0] sm:$0xf] %v3394_v37 }
 0x5d8   : > { %v3011_v26 = vpop.permute.xlu0 %3010  ;;  %3725 = vmatpush.msrb.mxu3 %v3531_v23 }
 0x5d9   : > { %v3016_v57 = vsel %vm5764_vm14, %v3009_v63, %v3011_v26  ;;  %v3543_v58 = vld [vmem:[#allocation3 + $0x380] sm:$0xff]  ;;  %v3520_v63 = vld [vmem:[#allocation3 + $0xe8] sm:$0xff] }
 0x5da   : > { %3024 = vst [vmem:[#allocation3 + $0x3c0] sm:$0xf0] %v3016_v57  ;;  %3758 = vmatpush.msra.mxu0 %v3543_v58  ;;  %3726 = vmatpush.msrb.mxu3 %v3527_v28  ;;  %v3484_v58 = vld [vmem:[#allocation3 + $0x258] sm:$0xff]  ;;  %v3641_v28 = vpop.f32.mrf.mxu2 }
 0x5dc   : > { %3727 = vmatpush.msrb.mxu3 %v3523_v18  ;;  %v3151_v27 = vpop.permute.xlu2 %3150 }
 0x5dd   : > { %v3321_v62 = vpop.permute.xlu1 %3320  ;;  %v3155_v17 = vsel %vm5765_vm10, %v5491_v61, %v3151_v27  ;;  %v3503_v61 = vld [vmem:[#allocation3 + $0x310] sm:$0xff] }
 0x5de   : > { %3728 = vmatpush.msrb.mxu3 %v3519_v39  ;;  %v3325_v60 = vsel %vm1160_vm12, %v5469_v56, %v3321_v62  ;;  %v3564_v7 = vld [vmem:[#allocation3 + $0x2c0] sm:$0xff]  ;;  %3163 = vst [vmem:[#allocation3 + $0x450] sm:$0xf0] %v3155_v17  ;;  %vm5767_vm12 = vmmov %vm5756_vm2  ;;  %vm3863_vm2 = vcmask 130048  }
 0x5df   : > { %3333 = vst [vmem:[#allocation3 + $0x248] sm:$0xf] %v3325_v60  ;;  %3813 = vmatpush.msrb.mxu1 %v3564_v7  ;;  %v3507_v56 = vld [vmem:[#allocation3 + $0x160] sm:$0xff] }
 0x5e0   : > { %v3252_v13 = vpop.permute.xlu0 %3251  ;;  %3729 = vmatpush.msrb.mxu3 %v3515_v9  ;;  %v3480_v39 = vld [vmem:[#allocation3 + $0x4c0] sm:$0xff] }
 0x5e1   : > { %v3256_v38 = vsel %vm1089_vm13, %v5481_v36, %v3252_v13  ;;  %v3539_v33 = vld [vmem:[#allocation3 + $0x3c0] sm:$0xff]  ;;  %vm5768_vm13 = vmmov %vm5757_vm1  ;;  %v3856_v13 = vld [vmem:[%s5584_s8] sm:$0xf] }
 0x5e2   : > { %3264 = vst [vmem:[#allocation3 + $0x478] sm:$0xf] %v3256_v38  ;;  %3759 = vmatpush.msra.mxu0 %v3539_v33  ;;  %3730 = vmatpush.msrb.mxu3 %v3511_v59  ;;  %v3848_v38 = vld [vmem:[#allocation2 + $0x48] sm:$0xff] }
 0x5e3   : > { %4038 = vmatmul.msk.f32.vlgmr.msra.gmra.mxu0 %vm3581_vm3, %v5362_v42 }
 0x5e4   : > { %3784 = vmatpush.msrb.mxu0 %v3536_v11  ;;  %3731 = vmatpush.msrb.mxu3 %v3507_v56  ;;  %v3013_v34 = vpop.permute.xlu2 %3012 }
 0x5e5   : > { %v3289_v25 = vpop.permute.xlu1 %3288  ;;  %v3017_v29 = vsel %vm5766_vm11, %v3011_v26, %v3013_v34  ;;  %v3488_v26 = vld [vmem:[#allocation3 + $0x430] sm:$0xff]  ;;  %v3849_v34 = vld [vmem:[#allocation2 + $0x8] sm:$0xff] }
 0x5e6   : > { %3785 = vmatpush.msrb.mxu0 %v3532_v48  ;;  %3732 = vmatpush.msrb.mxu3 %v3503_v61  ;;  %v3560_v36 = vld [vmem:[#allocation3 + $0x248] sm:$0xff]  ;;  %v3293_v10 = vsel %vm1127_vm15, %v5487_v8, %v3289_v25  ;;  %3025 = vst [vmem:[#allocation3 + $0x2f8] sm:$0xf0] %v3017_v29  ;;  %v3487_v8 = vld [vmem:[#allocation3 + $0x420] sm:$0xff]  ;;  %vm5769_vm15 = vmmov %vm5761_vm0 }
 0x5e7   : > { %3814 = vmatpush.msrb.mxu1 %v3560_v36  ;;  %3301 = vst [vmem:[#allocation3 + $0x478] sm:$0xf0] %v3293_v10 }
 0x5e8   : > { %3786 = vmatpush.msrb.mxu0 %v3528_v50  ;;  %3733 = vmatpush.msrb.mxu3 %v3499_v35  ;;  %v3220_v31 = vpop.permute.xlu0 %3219 }
 0x5e9   : > { %v3224_v53 = vsel %vm5767_vm12, %v5499_v54, %v3220_v31 }
 0x5ea   : > { %3787 = vmatpush.msrb.mxu0 %v3524_v47  ;;  %3232 = vst [vmem:[#allocation3 + $0x368] sm:$0xf0] %v3224_v53  ;;  %3734 = vmatpush.msrb.mxu3 %v3495_v16 }
 0x5ec   : > { %3788 = vmatpush.msrb.mxu0 %v3520_v63  ;;  %3735 = vmatpush.msrb.mxu3 %v3491_v1 }
 0x5ed   : > { %v3114_v55 = vpop.permute.xlu1 %3113  ;;  %v3540_v7 = vld [vmem:[#allocation3 + $0x2f8] sm:$0xff] }
 0x5ee   : > { %3789 = vmatpush.msrb.mxu0 %v3516_v19  ;;  %3736 = vmatpush.msrb.mxu3 %v3487_v8  ;;  %v3118_v44 = vsel %vm5768_vm13, %v5505_v3, %v3114_v55  ;;  %v3556_v30 = vld [vmem:[#allocation3 + $0x478] sm:$0xff] }
 0x5ef   : > { %3126 = vst [vmem:[#allocation3 + $0x450] sm:$0xf] %v3118_v44  ;;  %3815 = vmatpush.msrb.mxu1 %v3556_v30  ;;  %v3500_v3 = vld [vmem:[#allocation3 + $0x298] sm:$0xff] }
 0x5f0   : > { %3790 = vmatpush.msrb.mxu0 %v3512_v5  ;;  %3737 = vmatpush.msrb.mxu3 %v3483_v41  ;;  %v3045_v54 = vpop.permute.xlu0 %3044  ;;  %v3681_v33 = vpop.f32.mrf.mxu2 }
 0x5f1   : > { %v3049_v52 = vsel %vm5769_vm15, %v5517_v4, %v3045_v54  ;;  %v3552_v0 = vld [vmem:[#allocation3 + $0x368] sm:$0xff]  ;;  %v3621_v32 = vpop.f32.mrf.mxu1  ;;  %v3850_v54 = vld [vmem:[#allocation2 + $0x30] sm:$0xff] }
 0x5f2   : > { %3791 = vmatpush.msrb.mxu0 %v3508_v40  ;;  %3057 = vst [vmem:[#allocation3 + $0x110] sm:$0xf] %v3049_v52  ;;  %3738 = vmatpush.msrb.mxu3 %v3479_v6 }
 0x5f3   : > { %3816 = vmatpush.msrb.mxu1 %v3552_v0 }
 0x5f4   : > { %3792 = vmatpush.msrb.mxu0 %v3504_v20  ;;  %3739 = vmatpush.msrb.mxu3 %v3475_v46 }
 0x5f5   : > { %3740 = vmatmul.f32.vlgmr.msrb.gmra.mxu3 %v5399_v49  ;;  %v3082_v21 = vpop.permute.xlu1 %3081 }
 0x5f6   : > { %3793 = vmatpush.msrb.mxu0 %v3500_v3  ;;  %v3086_v4 = vsel %vm5755_vm4, %v5523_v24, %v3082_v21  ;;  %v3548_v51 = vld [vmem:[#allocation3 + $0x450] sm:$0xff] }
 0x5f7   : > { %3094 = vst [vmem:[#allocation3 + $0x110] sm:$0xf0] %v3086_v4  ;;  %3817 = vmatpush.msrb.mxu1 %v3548_v51  ;;  %v3476_v24 = vld [vmem:[#allocation3 + $0x3b0] sm:$0xff] }
 0x5f8   : > { %3794 = vmatpush.msrb.mxu0 %v3496_v2  ;;  %v3569_v37 = vpop.permute.xlu0 %3568 }
 0x5f9   : > { %v3602_v23 = vadd.f32 %v3601_v43, %v3569_v37 }
 0x5fa   : > { %3795 = vmatpush.msrb.mxu0 %v3492_v15 }
 0x5fb   : > { %v3622_v57 = vadd.f32 %v3621_v32, %v3602_v23 }
 0x5fc   : > { %3796 = vmatpush.msrb.mxu0 %v3488_v26 }
 0x5fd   : > { %v3642_v18 = vadd.f32 %v3641_v28, %v3622_v57  ;;  %v3861_v6 = vpop.permute.xlu1 %3860 }
 0x5fe   : > { %3797 = vmatpush.msrb.mxu0 %v3484_v58  ;;  %v3544_v27 = vld [vmem:[#allocation3 + $0x110] sm:$0xff] }
 0x5ff   : > { %v3824_v62 = vmax.f32 %v3642_v18, 0.0  ;;  %3818 = vmatpush.msrb.mxu1 %v3544_v27 }
 0x600   : > { %3798 = vmatpush.msrb.mxu0 %v3480_v39 }
 0x601   : > { %v3828_v60 = vmul.f32 %v3824_v62, %v5704_v45  ;;  %3819 = vmatpush.msrb.mxu1 %v3540_v7  ;;  %v3661_v45 = vpop.f32.mrf.mxu0 }
 0x602   : > { %3799 = vmatpush.msrb.mxu0 %v3476_v24  ;;  %4039 = vmatmul.msk.f32.vlgmr.msrb.gmra.mxu1 %vm3581_vm3, %v5362_v42  ;;  %vm3957_vm3 = vcmask 1043456  }
 0x603   : > { %3800 = vmatmul.f32.vlgmr.msrb.gmra.mxu0 %v5399_v49  ;;  %v3836_v17 = vrot.slane %v3828_v60, 4  ;;  %v3662_v49 = vadd.f32 %v3661_v45, %v3569_v37 }
 0x605   : > { %3844 = vst [vmem:[#allocation2 + $0x10] sm:$0xf0] %v3836_v17  ;;  %v3682_v59 = vadd.f32 %v3681_v33, %v3662_v49 }
 0x60c   : > { %v3852_v9 = vld [vmem:[#allocation2 + $0x10] sm:$0xff] }
 0x60d   : > { %3881 = vmatpush.msra.mxu3 %v3852_v9 }
 0x60f   : > { %3882 = vmatpush.msra.mxu3 %v3848_v38 }
 0x610   : > { %4040 = vmatmul.msk.f32.vlgmr.msra.gmra.mxu3 %vm3863_vm2, %v3856_v13  ;;  %v3781_v47 = vpop.f32.mrf.mxu2 }
 0x611   : > { %v3721_v25 = vpop.f32.mrf.mxu1  ;;  %v3782_v53 = vadd.f32 %v3781_v47, %v3569_v37 }
 0x612   : > { %v3722_v29 = vadd.f32 %v3721_v25, %v3569_v37 }
 0x658   : > { %v3701_v11 = vpop.f32.mrf.mxu3 }
 0x659   : > { %v3702_v56 = vadd.f32 %v3701_v11, %v3682_v59 }
 0x65b   : > { %v3825_v48 = vmax.f32 %v3702_v56, 0.0 }
 0x65d   : > { %v3829_v42 = vmul.f32 %v3825_v48, %v5703_v12 }
 0x65f   : > { %v3837_v61 = vrot.slane %v3829_v42, 4 }
 0x660   : > { %v3761_v36 = vpop.f32.mrf.mxu0 }
 0x661   : > { %3845 = vst [vmem:[#allocation2 + $0x40] sm:$0xf0] %v3837_v61 }
 0x668   : > { %v3853_v50 = vld [vmem:[#allocation2 + $0x40] sm:$0xff] }
 0x669   : > { %3901 = vmatpush.msrb.mxu3 %v3853_v50 }
 0x66b   : > { %3902 = vmatpush.msrb.mxu3 %v3849_v34 }
 0x66c   : > { %4041 = vmatmul.msk.f32.vlgmr.msrb.gmra.mxu3 %vm3863_vm2, %v3856_v13 }
 0x678   : > { %v3741_v10 = vpop.f32.mrf.mxu3 }
 0x679   : > { %v3742_v35 = vadd.f32 %v3741_v10, %v3722_v29 }
 0x67b   : > { %v3762_v31 = vadd.f32 %v3761_v36, %v3742_v35 }
 0x67d   : > { %v3826_v16 = vmax.f32 %v3762_v31, 0.0 }
 0x67f   : > { %v3830_v12 = vmul.f32 %v3826_v16, %v4702_v22  ;;  %v3821_v19 = vpop.f32.mrf.mxu1  ;;  %v3851_v22 = vld [vmem:[#allocation2 + $0x20] sm:$0xff] }
 0x680   : > { %v3801_v63 = vpop.f32.mrf.mxu0 }
 0x681   : > { %v3802_v1 = vadd.f32 %v3801_v63, %v3782_v53  ;;  %v3838_v8 = vrot.slane %v3830_v12, 4 }
 0x683   : > { %v3822_v5 = vadd.f32 %v3821_v19, %v3802_v1  ;;  %3846 = vst [vmem:[#allocation2 + $0x28] sm:$0xf0] %v3838_v8 }
 0x685   : > { %v3827_v55 = vmax.f32 %v3822_v5, 0.0 }
 0x687   : > { %v3831_v44 = vmul.f32 %v3827_v55, %v4705_v14 }
 0x689   : > { %v3839_v41 = vrot.slane %v3831_v44, 4 }
 0x68a   : > { %v3854_v40 = vld [vmem:[#allocation2 + $0x28] sm:$0xff] }
 0x68b   : > { %3847 = vst [vmem:[#allocation2 + $0x38] sm:$0xf0] %v3839_v41  ;;  %3921 = vmatpush.msra.mxu1 %v3854_v40 }
 0x68d   : > { %3922 = vmatpush.msra.mxu1 %v3850_v54 }
 0x68e   : > { %4042 = vmatmul.msk.f32.vlgmr.msra.gmra.mxu1 %vm3863_vm2, %v3856_v13 }
 0x692   : > { %v3855_v30 = vld [vmem:[#allocation2 + $0x38] sm:$0xff] }
 0x693   : > { %3941 = vmatpush.msra.mxu2 %v3855_v30  ;;  %v3884_v52 = vpop.f32.mrf.mxu3 }
 0x694   : > { %v3885_v20 = vadd.f32 %v3884_v52, %v3861_v6 }
 0x695   : > { %3942 = vmatpush.msra.mxu2 %v3851_v22 }
 0x696   : > { %4043 = vmatmul.msk.f32.vlgmr.msra.gmra.mxu2 %vm3863_vm2, %v3856_v13  ;;  %v3947_v3 = vadd.f32 %v3885_v20, %v3848_v38 }
 0x6ef   : > { %v3904_v0 = vpop.f32.mrf.mxu3 }
 0x6f0   : > { %v3905_v14 = vadd.f32 %v3904_v0, %v3861_v6 }
 0x6f2   : > { %v3948_v46 = vadd.f32 %v3905_v14, %v3849_v34 }
 0x6f4   : > { %v3955_v2 = vrot.slane %v3948_v46, 4 }
 0x6f6   : > { %v3958_v21 = vsel %vm3957_vm3, %v3947_v3, %v3955_v2 }
 0x6f7   : > { %3962 = vst [vmem:[%s359_s26] sm:$0xff] %v3958_v21 }
 0x70b   : > { %v3924_v43 = vpop.f32.mrf.mxu1 }
 0x70c   : > { %v3925_v51 = vadd.f32 %v3924_v43, %v3861_v6 }
 0x70e   : > { %v3949_v32 = vadd.f32 %v3925_v51, %v3850_v54 }
 0x719   : > { %v3944_v4 = vpop.f32.mrf.mxu2 }
 0x71a   : > { %v3945_v15 = vadd.f32 %v3944_v4, %v3861_v6 }
 0x71c   : > { %v3950_v37 = vadd.f32 %v3945_v15, %v3851_v22 }
 0x71e   : > { %v3956_v23 = vrot.slane %v3950_v37, 4 }
 0x720   : > { %v3959_v26 = vsel %vm3957_vm3, %v3949_v32, %v3956_v23 }
 0x721   : > { %3963 = vst [vmem:[%s359_s26 + $0x8] sm:$0xff] %v3959_v26 }
 0x722 PF: > { %s20_s13 = sadd.s32 1, %s4150_s13  }
 0x723   : > { %p17_p4 = scmp.ge.s32.totalorder %s20_s13, 4  }
 0x725   :  { %19 = sbr.rel (!%p17_p4) target bundleno = 1 (0x1), region = 92 }

</bundles_post_ra>
